<compile_context>
chip_gen: v6e
topology: v6e:2x2x1
jax: 0.10.0
libtpu: 0.0.40
codegen_flags: <defaults>
</compile_context>

<pallas_src>
import functools

import jax
import jax.numpy as jnp
from jax import lax
from jax.experimental import pallas as pl
from jax.experimental.pallas import tpu as pltpu

_EPS = 1e-5
_C_PAD = 128          # lane-padded channel width of the running activation


def _dense_block_kernel(buf0_ref, mask_ref, gamma_ref, beta_ref, w_ref, bias_ref,
                        carry_ref, act_ref, *, n_real, w_pad, halo):
    """One DenseNet conv_block per grid step b:
       BN(batch stats) -> ReLU -> 3x3 conv(pad=1) -> +bias -> in-place concat."""
    b = pl.program_id(0)
    r = carry_ref.shape[0]

    @pl.when(b == 0)
    def _init():
        act_ref[...] = jnp.zeros_like(act_ref)     # zero the halo guard rows once
        carry_ref[...] = buf0_ref[...]             # halo + lane padded input

    # --- BatchNorm (training mode, biased variance).  Guard rows are zero and
    #     the divisor is the real element count, so stats are exact. ----------
    x = carry_ref[...]
    inv_n = 1.0 / n_real
    s1 = jnp.sum(x, axis=0, keepdims=True)
    s2 = jnp.sum(x * x, axis=0, keepdims=True)
    mean = s1 * inv_n
    var = jnp.maximum(s2 * inv_n - mean * mean, 0.0)
    scale = gamma_ref[...] * lax.rsqrt(var + _EPS)           # (1, 128)
    shift = beta_ref[...] - mean * scale

    # --- ReLU; stage into the haloed VMEM scratch with guard rows zeroed -----
    act_ref[pl.ds(halo, r), :] = mask_ref[...] * jnp.maximum(
        carry_ref[...] * scale + shift, 0.0)

    # --- 3x3 conv (padding=1) as 9 static-offset slices + accumulating MXU
    #     matmuls into the resident carry => dense concat in place ------------
    for t in range(9):
        off = (t // 3 - 1) * w_pad + (t % 3 - 1)
        tap = act_ref[pl.ds(halo + off, r), :]
        upd = jnp.dot(tap, w_ref[t], preferred_element_type=jnp.float32)
        if t == 0:
            upd = upd + bias_ref[...]              # bias columns at this block's offset
        if t == 8:
            carry_ref[...] = (carry_ref[...] + upd) * mask_ref[...]   # re-zero guards
        else:
            carry_ref[...] = carry_ref[...] + upd


def _make_dense_block_call(num_convs, n, hh, ww):
    r_halo = n * (hh + 2) * (ww + 2)
    halo = ((ww + 3) + 7) // 8 * 8                 # >= max |tap offset|, sublane aligned
    grid_spec = pltpu.PrefetchScalarGridSpec(
        num_scalar_prefetch=0,
        grid=(num_convs,),
        in_specs=[
            pl.BlockSpec((r_halo, _C_PAD), lambda b: (0, 0)),               # initial carry
            pl.BlockSpec((r_halo, 1), lambda b: (0, 0)),                    # interior mask
            pl.BlockSpec((None, 1, _C_PAD), lambda b: (b, 0, 0)),           # gamma
            pl.BlockSpec((None, 1, _C_PAD), lambda b: (b, 0, 0)),           # beta
            pl.BlockSpec((None, 9, _C_PAD, _C_PAD), lambda b: (b, 0, 0, 0)),  # conv weights
            pl.BlockSpec((None, 1, _C_PAD), lambda b: (b, 0, 0)),           # bias
        ],
        out_specs=pl.BlockSpec((r_halo, _C_PAD), lambda b: (0, 0)),         # resident carry
        scratch_shapes=[pltpu.VMEM((r_halo + 2 * halo, _C_PAD), jnp.float32)],
    )
    return pl.pallas_call(
        functools.partial(_dense_block_kernel, n_real=n * hh * ww,
                          w_pad=ww + 2, halo=halo),
        out_shape=jax.ShapeDtypeStruct((r_halo, _C_PAD), jnp.float32),
        grid_spec=grid_spec,
        input_output_aliases={0: 0},
        compiler_params=pltpu.CompilerParams(dimension_semantics=("arbitrary",)),
    )


def prepare_params(blocks_params, in_channels, out_channels):
    """One-time host-side re-layout: pad BN params / conv weights to the lane
    padded layout, pre-shift conv output columns to each block's channel
    offset, and stack everything on a leading per-block axis."""
    gs, bts, ws, bs = [], [], [], []
    c_in = in_channels
    for gamma, beta, w, b in blocks_params:
        g_p = jnp.zeros((1, _C_PAD), jnp.float32).at[0, :c_in].set(gamma)
        bt_p = jnp.zeros((1, _C_PAD), jnp.float32).at[0, :c_in].set(beta)
        # w: (Cout, Cin, 3, 3) -> per-tap (Cin, Cout), padded to (128, 128)
        # with output channels placed at column offset c_in.
        w_t = jnp.transpose(w, (2, 3, 1, 0)).reshape(9, c_in, out_channels)
        w_p = (jnp.zeros((9, _C_PAD, _C_PAD), jnp.float32)
               .at[:, :c_in, c_in:c_in + out_channels].set(w_t))
        b_p = (jnp.zeros((1, _C_PAD), jnp.float32)
               .at[0, c_in:c_in + out_channels].set(b))
        gs.append(g_p); bts.append(bt_p); ws.append(w_p); bs.append(b_p)
        c_in += out_channels
    return (jnp.stack(gs), jnp.stack(bts), jnp.stack(ws), jnp.stack(bs))


@functools.partial(jax.jit, static_argnums=(2, 3, 4))
def dense_block_forward(x_nchw, prepped, in_channels, out_channels, num_convs):
    n, c_in, hh, ww = x_nchw.shape
    c_total = in_channels + num_convs * out_channels
    r_halo = n * (hh + 2) * (ww + 2)

    x_nhwc = jnp.transpose(x_nchw, (0, 2, 3, 1)).astype(jnp.float32)
    # Initial carry: spatial halo (guard rows/cols = 0) + lane pad to 128.
    buf0 = (jnp.zeros((n, hh + 2, ww + 2, _C_PAD), jnp.float32)
            .at[:, 1:-1, 1:-1, :c_in].set(x_nhwc)
            .reshape(r_halo, _C_PAD))
    # Interior-row mask (1.0 for real pixels, 0.0 for guard rows) — constant.
    mask = (jnp.zeros((n, hh + 2, ww + 2, 1), jnp.float32)
            .at[:, 1:-1, 1:-1, :].set(1.0)
            .reshape(r_halo, 1))

    g_p, bt_p, w_p, b_p = prepped
    buf = _make_dense_block_call(num_convs, n, hh, ww)(buf0, mask, g_p, bt_p, w_p, b_p)

    out = buf.reshape(n, hh + 2, ww + 2, _C_PAD)[:, 1:-1, 1:-1, :c_total]
    return jnp.transpose(out, (0, 3, 1, 2))        # back to NCHW


def reference_forward(x_nchw, blocks_params):
    # Pure-JAX reference (NCHW, lax.conv) used only to validate the kernel.
    x = x_nchw.astype(jnp.float32)
    for gamma, beta, w, b in blocks_params:
        mean = jnp.mean(x, axis=(0, 2, 3), keepdims=True)
        var = jnp.mean((x - mean) ** 2, axis=(0, 2, 3), keepdims=True)
        xn = (x - mean) * lax.rsqrt(var + _EPS)
        xn = xn * gamma.reshape(1, -1, 1, 1) + beta.reshape(1, -1, 1, 1)
        act = jnp.maximum(xn, 0.0)
        y = lax.conv_general_dilated(
            act, w, window_strides=(1, 1), padding=((1, 1), (1, 1)),
            dimension_numbers=("NCHW", "OIHW", "NCHW"))
        y = y + b.reshape(1, -1, 1, 1)
        x = jnp.concatenate([x, y], axis=1)
    return x


if __name__ == "__main__":
    num_convs, in_channels, out_channels = 2, 3, 10

    key = jax.random.PRNGKey(0)
    keys = jax.random.split(key, 1 + 4 * num_convs)
    kx, kps = keys[0], keys[1:]

    # Same shape as the original script: X = torch.rand(4, 3, 8, 8)
    x = jax.random.uniform(kx, (4, in_channels, 8, 8), dtype=jnp.float32)

    blocks_params = []
    for i in range(num_convs):
        in_c = in_channels + i * out_channels
        k_g, k_b, k_w, k_bias = kps[4 * i:4 * i + 4]
        gamma = 1.0 + 0.1 * jax.random.normal(k_g, (in_c,), jnp.float32)
        beta = 0.1 * jax.random.normal(k_b, (in_c,), jnp.float32)
        w = 0.1 * jax.random.normal(k_w, (out_channels, in_c, 3, 3), jnp.float32)
        b = 0.1 * jax.random.normal(k_bias, (out_channels,), jnp.float32)
        blocks_params.append((gamma, beta, w, b))

    prepped = prepare_params(blocks_params, in_channels, out_channels)
    c_total = in_channels + num_convs * out_channels

    out = jax.block_until_ready(
        dense_block_forward(x, prepped, in_channels, out_channels, num_convs))
    ref = jax.block_until_ready(reference_forward(x, blocks_params))

    assert out.shape == (4, c_total, 8, 8), out.shape
    assert jnp.allclose(out, ref, atol=1e-4, rtol=1e-4), float(
        jnp.max(jnp.abs(out - ref)))
    print("KERNEL_OK")
</pallas_src>

<mosaic_0001>
module attributes {stable_mosaic.version = 11 : i64} {
  func.func @_dense_block_kernel(%arg0: i32, %arg1: memref<400x128xf32, #tpu.memory_space<vmem>>, %arg2: memref<400x1xf32, #tpu.memory_space<vmem>>, %arg3: memref<1x1x128xf32, #tpu.memory_space<vmem>>, %arg4: memref<1x1x128xf32, #tpu.memory_space<vmem>>, %arg5: memref<1x9x128x128xf32, #tpu.memory_space<vmem>>, %arg6: memref<1x1x128xf32, #tpu.memory_space<vmem>>, %arg7: memref<400x128xf32, #tpu.memory_space<vmem>>, %arg8: memref<432x128xf32, #tpu.memory_space<vmem>>) attributes {dimension_semantics = [#tpu.dimension_semantics<arbitrary>], iteration_bounds = array<i64: 2>, scalar_prefetch = 0 : i64, scratch_operands = 1 : i64, tpu.core_type = #tpu.core_type<tc>, window_params = [{pipeline_mode = #tpu.pipeline_mode<synchronous>, transform_indices = @transform_0, window_bounds = array<i64: 400, 128>}, {pipeline_mode = #tpu.pipeline_mode<synchronous>, transform_indices = @transform_1, window_bounds = array<i64: 400, 1>}, {transform_indices = @transform_2, window_bounds = array<i64: 1, 1, 128>}, {transform_indices = @transform_3, window_bounds = array<i64: 1, 1, 128>}, {transform_indices = @transform_4, window_bounds = array<i64: 1, 9, 128, 128>}, {transform_indices = @transform_5, window_bounds = array<i64: 1, 1, 128>}, {pipeline_mode = #tpu.pipeline_mode<synchronous>, transform_indices = @transform_6, window_bounds = array<i64: 400, 128>}]} {
    %c0_i32 = arith.constant 0 : i32
    %0 = arith.cmpi eq, %arg0, %c0_i32 : i32
    %1 = arith.extui %0 : i1 to i32
    %c0_i32_0 = arith.constant 0 : i32
    %2 = arith.cmpi ne, %1, %c0_i32_0 : i32
    scf.if %2 {
      %cst_110 = arith.constant 0.000000e+00 : f32
      %108 = vector.broadcast %cst_110 : f32 to vector<432x128xf32>
      %c0_111 = arith.constant 0 : index
      %c0_112 = arith.constant 0 : index
      %109 = vector.load %arg8[%c0_111, %c0_112] : memref<432x128xf32, #tpu.memory_space<vmem>>, vector<432x128xf32>
      tpu.vector_store %arg8[%c0_111, %c0_112], %108 {strides = array<i32>} : memref<432x128xf32, #tpu.memory_space<vmem>>, vector<432x128xf32>,
      %c0_113 = arith.constant 0 : index
      %c0_114 = arith.constant 0 : index
      %110 = vector.load %arg1[%c0_113, %c0_114] : memref<400x128xf32, #tpu.memory_space<vmem>>, vector<400x128xf32>
      %c0_115 = arith.constant 0 : index
      %c0_116 = arith.constant 0 : index
      %111 = vector.load %arg7[%c0_115, %c0_116] : memref<400x128xf32, #tpu.memory_space<vmem>>, vector<400x128xf32>
      tpu.vector_store %arg7[%c0_115, %c0_116], %110 {strides = array<i32>} : memref<400x128xf32, #tpu.memory_space<vmem>>, vector<400x128xf32>,
    } else {
    }
    %c0 = arith.constant 0 : index
    %c0_1 = arith.constant 0 : index
    %3 = vector.load %arg7[%c0, %c0_1] : memref<400x128xf32, #tpu.memory_space<vmem>>, vector<400x128xf32>
    %cst = arith.constant dense<0.000000e+00> : vector<128xf32>
    %4 = vector.multi_reduction <add>, %3, %cst [0] : vector<400x128xf32> to vector<128xf32>
    %5 = vector.shape_cast %4 : vector<128xf32> to vector<1x128xf32>
    %6 = arith.mulf %3, %3 : vector<400x128xf32>
    %cst_2 = arith.constant dense<0.000000e+00> : vector<128xf32>
    %7 = vector.multi_reduction <add>, %6, %cst_2 [0] : vector<400x128xf32> to vector<128xf32>
    %8 = vector.shape_cast %7 : vector<128xf32> to vector<1x128xf32>
    %cst_3 = arith.constant 3.906250e-03 : f32
    %9 = vector.broadcast %cst_3 : f32 to vector<1x128xf32>
    %10 = arith.mulf %5, %9 : vector<1x128xf32>
    %cst_4 = arith.constant 3.906250e-03 : f32
    %11 = vector.broadcast %cst_4 : f32 to vector<1x128xf32>
    %12 = arith.mulf %8, %11 : vector<1x128xf32>
    %13 = arith.mulf %10, %10 : vector<1x128xf32>
    %14 = arith.subf %12, %13 : vector<1x128xf32>
    %cst_5 = arith.constant 0.000000e+00 : f32
    %15 = vector.broadcast %cst_5 : f32 to vector<1x128xf32>
    %16 = arith.maximumf %14, %15 : vector<1x128xf32>
    %c0_6 = arith.constant 0 : index
    %c0_7 = arith.constant 0 : index
    %c0_8 = arith.constant 0 : index
    %17 = vector.load %arg3[%c0_6, %c0_7, %c0_8] : memref<1x1x128xf32, #tpu.memory_space<vmem>>, vector<1x1x128xf32>
    %18 = vector.shape_cast %17 : vector<1x1x128xf32> to vector<1x128xf32>
    %cst_9 = arith.constant 9.99999974E-6 : f32
    %19 = vector.broadcast %cst_9 : f32 to vector<1x128xf32>
    %20 = arith.addf %16, %19 : vector<1x128xf32>
    %21 = math.rsqrt %20 : vector<1x128xf32>
    %22 = arith.mulf %18, %21 : vector<1x128xf32>
    %c0_10 = arith.constant 0 : index
    %c0_11 = arith.constant 0 : index
    %c0_12 = arith.constant 0 : index
    %23 = vector.load %arg4[%c0_10, %c0_11, %c0_12] : memref<1x1x128xf32, #tpu.memory_space<vmem>>, vector<1x1x128xf32>
    %24 = vector.shape_cast %23 : vector<1x1x128xf32> to vector<1x128xf32>
    %25 = arith.mulf %10, %22 : vector<1x128xf32>
    %26 = arith.subf %24, %25 : vector<1x128xf32>
    %c0_13 = arith.constant 0 : index
    %c0_14 = arith.constant 0 : index
    %27 = vector.load %arg2[%c0_13, %c0_14] : memref<400x1xf32, #tpu.memory_space<vmem>>, vector<400x1xf32>
    %c0_15 = arith.constant 0 : index
    %c0_16 = arith.constant 0 : index
    %28 = vector.load %arg7[%c0_15, %c0_16] : memref<400x128xf32, #tpu.memory_space<vmem>>, vector<400x128xf32>
    %29 = vector.broadcast %22 : vector<1x128xf32> to vector<400x128xf32>
    %30 = arith.mulf %28, %29 : vector<400x128xf32>
    %31 = vector.broadcast %26 : vector<1x128xf32> to vector<400x128xf32>
    %32 = arith.addf %30, %31 : vector<400x128xf32>
    %cst_17 = arith.constant 0.000000e+00 : f32
    %33 = vector.broadcast %cst_17 : f32 to vector<400x128xf32>
    %34 = arith.maximumf %32, %33 : vector<400x128xf32>
    %35 = vector.broadcast %27 : vector<400x1xf32> to vector<400x128xf32>
    %36 = arith.mulf %35, %34 : vector<400x128xf32>
    %c16 = arith.constant 16 : index
    %c0_18 = arith.constant 0 : index
    %37 = vector.load %arg8[%c16, %c0_18] : memref<432x128xf32, #tpu.memory_space<vmem>>, vector<400x128xf32>
    tpu.vector_store %arg8[%c16, %c0_18], %36 {strides = array<i32>} : memref<432x128xf32, #tpu.memory_space<vmem>>, vector<400x128xf32>,
    %c5 = arith.constant 5 : index
    %c0_19 = arith.constant 0 : index
    %38 = vector.load %arg8[%c5, %c0_19] : memref<432x128xf32, #tpu.memory_space<vmem>>, vector<400x128xf32>
    %c0_20 = arith.constant 0 : index
    %c0_21 = arith.constant 0 : index
    %c0_22 = arith.constant 0 : index
    %c0_23 = arith.constant 0 : index
    %39 = vector.load %arg5[%c0_20, %c0_21, %c0_22, %c0_23] : memref<1x9x128x128xf32, #tpu.memory_space<vmem>>, vector<1x1x128x128xf32>
    %40 = vector.shape_cast %39 : vector<1x1x128x128xf32> to vector<128x128xf32>
    %cst_24 = arith.constant dense<0.000000e+00> : vector<400x128xf32>
    %41 = tpu.matmul %38, %40, %cst_24 {dimension_numbers = #tpu.dot_dimension_numbers<[1], [0], [0], [1], [0, 0, 1, 1], [], []>} : vector<400x128xf32>, vector<128x128xf32>, vector<400x128xf32> -> vector<400x128xf32>
    %c0_25 = arith.constant 0 : index
    %c0_26 = arith.constant 0 : index
    %c0_27 = arith.constant 0 : index
    %42 = vector.load %arg6[%c0_25, %c0_26, %c0_27] : memref<1x1x128xf32, #tpu.memory_space<vmem>>, vector<1x1x128xf32>
    %43 = vector.shape_cast %42 : vector<1x1x128xf32> to vector<1x128xf32>
    %44 = vector.broadcast %43 : vector<1x128xf32> to vector<400x128xf32>
    %45 = arith.addf %41, %44 : vector<400x128xf32>
    %c0_28 = arith.constant 0 : index
    %c0_29 = arith.constant 0 : index
    %46 = vector.load %arg7[%c0_28, %c0_29] : memref<400x128xf32, #tpu.memory_space<vmem>>, vector<400x128xf32>
    %47 = arith.addf %46, %45 : vector<400x128xf32>
    %c0_30 = arith.constant 0 : index
    %c0_31 = arith.constant 0 : index
    %48 = vector.load %arg7[%c0_30, %c0_31] : memref<400x128xf32, #tpu.memory_space<vmem>>, vector<400x128xf32>
    tpu.vector_store %arg7[%c0_30, %c0_31], %47 {strides = array<i32>} : memref<400x128xf32, #tpu.memory_space<vmem>>, vector<400x128xf32>,
    %c6 = arith.constant 6 : index
    %c0_32 = arith.constant 0 : index
    %49 = vector.load %arg8[%c6, %c0_32] : memref<432x128xf32, #tpu.memory_space<vmem>>, vector<400x128xf32>
    %c0_33 = arith.constant 0 : index
    %c1 = arith.constant 1 : index
    %c0_34 = arith.constant 0 : index
    %c0_35 = arith.constant 0 : index
    %50 = vector.load %arg5[%c0_33, %c1, %c0_34, %c0_35] : memref<1x9x128x128xf32, #tpu.memory_space<vmem>>, vector<1x1x128x128xf32>
    %51 = vector.shape_cast %50 : vector<1x1x128x128xf32> to vector<128x128xf32>
    %cst_36 = arith.constant dense<0.000000e+00> : vector<400x128xf32>
    %52 = tpu.matmul %49, %51, %cst_36 {dimension_numbers = #tpu.dot_dimension_numbers<[1], [0], [0], [1], [0, 0, 1, 1], [], []>} : vector<400x128xf32>, vector<128x128xf32>, vector<400x128xf32> -> vector<400x128xf32>
    %c0_37 = arith.constant 0 : index
    %c0_38 = arith.constant 0 : index
    %53 = vector.load %arg7[%c0_37, %c0_38] : memref<400x128xf32, #tpu.memory_space<vmem>>, vector<400x128xf32>
    %54 = arith.addf %53, %52 : vector<400x128xf32>
    %c0_39 = arith.constant 0 : index
    %c0_40 = arith.constant 0 : index
    %55 = vector.load %arg7[%c0_39, %c0_40] : memref<400x128xf32, #tpu.memory_space<vmem>>, vector<400x128xf32>
    tpu.vector_store %arg7[%c0_39, %c0_40], %54 {strides = array<i32>} : memref<400x128xf32, #tpu.memory_space<vmem>>, vector<400x128xf32>,
    %c7 = arith.constant 7 : index
    %c0_41 = arith.constant 0 : index
    %56 = vector.load %arg8[%c7, %c0_41] : memref<432x128xf32, #tpu.memory_space<vmem>>, vector<400x128xf32>
    %c0_42 = arith.constant 0 : index
    %c2 = arith.constant 2 : index
    %c0_43 = arith.constant 0 : index
    %c0_44 = arith.constant 0 : index
    %57 = vector.load %arg5[%c0_42, %c2, %c0_43, %c0_44] : memref<1x9x128x128xf32, #tpu.memory_space<vmem>>, vector<1x1x128x128xf32>
    %58 = vector.shape_cast %57 : vector<1x1x128x128xf32> to vector<128x128xf32>
    %cst_45 = arith.constant dense<0.000000e+00> : vector<400x128xf32>
    %59 = tpu.matmul %56, %58, %cst_45 {dimension_numbers = #tpu.dot_dimension_numbers<[1], [0], [0], [1], [0, 0, 1, 1], [], []>} : vector<400x128xf32>, vector<128x128xf32>, vector<400x128xf32> -> vector<400x128xf32>
    %c0_46 = arith.constant 0 : index
    %c0_47 = arith.constant 0 : index
    %60 = vector.load %arg7[%c0_46, %c0_47] : memref<400x128xf32, #tpu.memory_space<vmem>>, vector<400x128xf32>
    %61 = arith.addf %60, %59 : vector<400x128xf32>
    %c0_48 = arith.constant 0 : index
    %c0_49 = arith.constant 0 : index
    %62 = vector.load %arg7[%c0_48, %c0_49] : memref<400x128xf32, #tpu.memory_space<vmem>>, vector<400x128xf32>
    tpu.vector_store %arg7[%c0_48, %c0_49], %61 {strides = array<i32>} : memref<400x128xf32, #tpu.memory_space<vmem>>, vector<400x128xf32>,
    %c15 = arith.constant 15 : index
    %c0_50 = arith.constant 0 : index
    %63 = vector.load %arg8[%c15, %c0_50] : memref<432x128xf32, #tpu.memory_space<vmem>>, vector<400x128xf32>
    %c0_51 = arith.constant 0 : index
    %c3 = arith.constant 3 : index
    %c0_52 = arith.constant 0 : index
    %c0_53 = arith.constant 0 : index
    %64 = vector.load %arg5[%c0_51, %c3, %c0_52, %c0_53] : memref<1x9x128x128xf32, #tpu.memory_space<vmem>>, vector<1x1x128x128xf32>
    %65 = vector.shape_cast %64 : vector<1x1x128x128xf32> to vector<128x128xf32>
    %cst_54 = arith.constant dense<0.000000e+00> : vector<400x128xf32>
    %66 = tpu.matmul %63, %65, %cst_54 {dimension_numbers = #tpu.dot_dimension_numbers<[1], [0], [0], [1], [0, 0, 1, 1], [], []>} : vector<400x128xf32>, vector<128x128xf32>, vector<400x128xf32> -> vector<400x128xf32>
    %c0_55 = arith.constant 0 : index
    %c0_56 = arith.constant 0 : index
    %67 = vector.load %arg7[%c0_55, %c0_56] : memref<400x128xf32, #tpu.memory_space<vmem>>, vector<400x128xf32>
    %68 = arith.addf %67, %66 : vector<400x128xf32>
    %c0_57 = arith.constant 0 : index
    %c0_58 = arith.constant 0 : index
    %69 = vector.load %arg7[%c0_57, %c0_58] : memref<400x128xf32, #tpu.memory_space<vmem>>, vector<400x128xf32>
    tpu.vector_store %arg7[%c0_57, %c0_58], %68 {strides = array<i32>} : memref<400x128xf32, #tpu.memory_space<vmem>>, vector<400x128xf32>,
    %c16_59 = arith.constant 16 : index
    %c0_60 = arith.constant 0 : index
    %70 = vector.load %arg8[%c16_59, %c0_60] : memref<432x128xf32, #tpu.memory_space<vmem>>, vector<400x128xf32>
    %c0_61 = arith.constant 0 : index
    %c4 = arith.constant 4 : index
    %c0_62 = arith.constant 0 : index
    %c0_63 = arith.constant 0 : index
    %71 = vector.load %arg5[%c0_61, %c4, %c0_62, %c0_63] : memref<1x9x128x128xf32, #tpu.memory_space<vmem>>, vector<1x1x128x128xf32>
    %72 = vector.shape_cast %71 : vector<1x1x128x128xf32> to vector<128x128xf32>
    %cst_64 = arith.constant dense<0.000000e+00> : vector<400x128xf32>
    %73 = tpu.matmul %70, %72, %cst_64 {dimension_numbers = #tpu.dot_dimension_numbers<[1], [0], [0], [1], [0, 0, 1, 1], [], []>} : vector<400x128xf32>, vector<128x128xf32>, vector<400x128xf32> -> vector<400x128xf32>
    %c0_65 = arith.constant 0 : index
    %c0_66 = arith.constant 0 : index
    %74 = vector.load %arg7[%c0_65, %c0_66] : memref<400x128xf32, #tpu.memory_space<vmem>>, vector<400x128xf32>
    %75 = arith.addf %74, %73 : vector<400x128xf32>
    %c0_67 = arith.constant 0 : index
    %c0_68 = arith.constant 0 : index
    %76 = vector.load %arg7[%c0_67, %c0_68] : memref<400x128xf32, #tpu.memory_space<vmem>>, vector<400x128xf32>
    tpu.vector_store %arg7[%c0_67, %c0_68], %75 {strides = array<i32>} : memref<400x128xf32, #tpu.memory_space<vmem>>, vector<400x128xf32>,
    %c17 = arith.constant 17 : index
    %c0_69 = arith.constant 0 : index
    %77 = vector.load %arg8[%c17, %c0_69] : memref<432x128xf32, #tpu.memory_space<vmem>>, vector<400x128xf32>
    %c0_70 = arith.constant 0 : index
    %c5_71 = arith.constant 5 : index
    %c0_72 = arith.constant 0 : index
    %c0_73 = arith.constant 0 : index
    %78 = vector.load %arg5[%c0_70, %c5_71, %c0_72, %c0_73] : memref<1x9x128x128xf32, #tpu.memory_space<vmem>>, vector<1x1x128x128xf32>
    %79 = vector.shape_cast %78 : vector<1x1x128x128xf32> to vector<128x128xf32>
    %cst_74 = arith.constant dense<0.000000e+00> : vector<400x128xf32>
    %80 = tpu.matmul %77, %79, %cst_74 {dimension_numbers = #tpu.dot_dimension_numbers<[1], [0], [0], [1], [0, 0, 1, 1], [], []>} : vector<400x128xf32>, vector<128x128xf32>, vector<400x128xf32> -> vector<400x128xf32>
    %c0_75 = arith.constant 0 : index
    %c0_76 = arith.constant 0 : index
    %81 = vector.load %arg7[%c0_75, %c0_76] : memref<400x128xf32, #tpu.memory_space<vmem>>, vector<400x128xf32>
    %82 = arith.addf %81, %80 : vector<400x128xf32>
    %c0_77 = arith.constant 0 : index
    %c0_78 = arith.constant 0 : index
    %83 = vector.load %arg7[%c0_77, %c0_78] : memref<400x128xf32, #tpu.memory_space<vmem>>, vector<400x128xf32>
    tpu.vector_store %arg7[%c0_77, %c0_78], %82 {strides = array<i32>} : memref<400x128xf32, #tpu.memory_space<vmem>>, vector<400x128xf32>,
    %c25 = arith.constant 25 : index
    %c0_79 = arith.constant 0 : index
    %84 = vector.load %arg8[%c25, %c0_79] : memref<432x128xf32, #tpu.memory_space<vmem>>, vector<400x128xf32>
    %c0_80 = arith.constant 0 : index
    %c6_81 = arith.constant 6 : index
    %c0_82 = arith.constant 0 : index
    %c0_83 = arith.constant 0 : index
    %85 = vector.load %arg5[%c0_80, %c6_81, %c0_82, %c0_83] : memref<1x9x128x128xf32, #tpu.memory_space<vmem>>, vector<1x1x128x128xf32>
    %86 = vector.shape_cast %85 : vector<1x1x128x128xf32> to vector<128x128xf32>
    %cst_84 = arith.constant dense<0.000000e+00> : vector<400x128xf32>
    %87 = tpu.matmul %84, %86, %cst_84 {dimension_numbers = #tpu.dot_dimension_numbers<[1], [0], [0], [1], [0, 0, 1, 1], [], []>} : vector<400x128xf32>, vector<128x128xf32>, vector<400x128xf32> -> vector<400x128xf32>
    %c0_85 = arith.constant 0 : index
    %c0_86 = arith.constant 0 : index
    %88 = vector.load %arg7[%c0_85, %c0_86] : memref<400x128xf32, #tpu.memory_space<vmem>>, vector<400x128xf32>
    %89 = arith.addf %88, %87 : vector<400x128xf32>
    %c0_87 = arith.constant 0 : index
    %c0_88 = arith.constant 0 : index
    %90 = vector.load %arg7[%c0_87, %c0_88] : memref<400x128xf32, #tpu.memory_space<vmem>>, vector<400x128xf32>
    tpu.vector_store %arg7[%c0_87, %c0_88], %89 {strides = array<i32>} : memref<400x128xf32, #tpu.memory_space<vmem>>, vector<400x128xf32>,
    %c26 = arith.constant 26 : index
    %c0_89 = arith.constant 0 : index
    %91 = vector.load %arg8[%c26, %c0_89] : memref<432x128xf32, #tpu.memory_space<vmem>>, vector<400x128xf32>
    %c0_90 = arith.constant 0 : index
    %c7_91 = arith.constant 7 : index
    %c0_92 = arith.constant 0 : index
    %c0_93 = arith.constant 0 : index
    %92 = vector.load %arg5[%c0_90, %c7_91, %c0_92, %c0_93] : memref<1x9x128x128xf32, #tpu.memory_space<vmem>>, vector<1x1x128x128xf32>
    %93 = vector.shape_cast %92 : vector<1x1x128x128xf32> to vector<128x128xf32>
    %cst_94 = arith.constant dense<0.000000e+00> : vector<400x128xf32>
    %94 = tpu.matmul %91, %93, %cst_94 {dimension_numbers = #tpu.dot_dimension_numbers<[1], [0], [0], [1], [0, 0, 1, 1], [], []>} : vector<400x128xf32>, vector<128x128xf32>, vector<400x128xf32> -> vector<400x128xf32>
    %c0_95 = arith.constant 0 : index
    %c0_96 = arith.constant 0 : index
    %95 = vector.load %arg7[%c0_95, %c0_96] : memref<400x128xf32, #tpu.memory_space<vmem>>, vector<400x128xf32>
    %96 = arith.addf %95, %94 : vector<400x128xf32>
    %c0_97 = arith.constant 0 : index
    %c0_98 = arith.constant 0 : index
    %97 = vector.load %arg7[%c0_97, %c0_98] : memref<400x128xf32, #tpu.memory_space<vmem>>, vector<400x128xf32>
    tpu.vector_store %arg7[%c0_97, %c0_98], %96 {strides = array<i32>} : memref<400x128xf32, #tpu.memory_space<vmem>>, vector<400x128xf32>,
    %c27 = arith.constant 27 : index
    %c0_99 = arith.constant 0 : index
    %98 = vector.load %arg8[%c27, %c0_99] : memref<432x128xf32, #tpu.memory_space<vmem>>, vector<400x128xf32>
    %c0_100 = arith.constant 0 : index
    %c8 = arith.constant 8 : index
    %c0_101 = arith.constant 0 : index
    %c0_102 = arith.constant 0 : index
    %99 = vector.load %arg5[%c0_100, %c8, %c0_101, %c0_102] : memref<1x9x128x128xf32, #tpu.memory_space<vmem>>, vector<1x1x128x128xf32>
    %100 = vector.shape_cast %99 : vector<1x1x128x128xf32> to vector<128x128xf32>
    %cst_103 = arith.constant dense<0.000000e+00> : vector<400x128xf32>
    %101 = tpu.matmul %98, %100, %cst_103 {dimension_numbers = #tpu.dot_dimension_numbers<[1], [0], [0], [1], [0, 0, 1, 1], [], []>} : vector<400x128xf32>, vector<128x128xf32>, vector<400x128xf32> -> vector<400x128xf32>
    %c0_104 = arith.constant 0 : index
    %c0_105 = arith.constant 0 : index
    %102 = vector.load %arg7[%c0_104, %c0_105] : memref<400x128xf32, #tpu.memory_space<vmem>>, vector<400x128xf32>
    %103 = arith.addf %102, %101 : vector<400x128xf32>
    %c0_106 = arith.constant 0 : index
    %c0_107 = arith.constant 0 : index
    %104 = vector.load %arg2[%c0_106, %c0_107] : memref<400x1xf32, #tpu.memory_space<vmem>>, vector<400x1xf32>
    %105 = vector.broadcast %104 : vector<400x1xf32> to vector<400x128xf32>
    %106 = arith.mulf %103, %105 : vector<400x128xf32>
    %c0_108 = arith.constant 0 : index
    %c0_109 = arith.constant 0 : index
    %107 = vector.load %arg7[%c0_108, %c0_109] : memref<400x128xf32, #tpu.memory_space<vmem>>, vector<400x128xf32>
    tpu.vector_store %arg7[%c0_108, %c0_109], %106 {strides = array<i32>} : memref<400x128xf32, #tpu.memory_space<vmem>>, vector<400x128xf32>,
    return
  }
  func.func @transform_0(%arg0: i32) -> (i32, i32) {
    %c0_i32 = arith.constant 0 : i32
    %c0_i32_0 = arith.constant 0 : i32
    %c0_i32_1 = arith.constant 0 : i32
    return %c0_i32, %c0_i32_0 : i32, i32
  }
  func.func @transform_1(%arg0: i32) -> (i32, i32) {
    %c0_i32 = arith.constant 0 : i32
    %c0_i32_0 = arith.constant 0 : i32
    %c0_i32_1 = arith.constant 0 : i32
    return %c0_i32, %c0_i32_0 : i32, i32
  }
  func.func @transform_2(%arg0: i32) -> (i32, i32, i32) {
    %c0_i32 = arith.constant 0 : i32
    %c0_i32_0 = arith.constant 0 : i32
    %c0_i32_1 = arith.constant 0 : i32
    return %arg0, %c0_i32, %c0_i32_0 : i32, i32, i32
  }
  func.func @transform_3(%arg0: i32) -> (i32, i32, i32) {
    %c0_i32 = arith.constant 0 : i32
    %c0_i32_0 = arith.constant 0 : i32
    %c0_i32_1 = arith.constant 0 : i32
    return %arg0, %c0_i32, %c0_i32_0 : i32, i32, i32
  }
  func.func @transform_4(%arg0: i32) -> (i32, i32, i32, i32) {
    %c0_i32 = arith.constant 0 : i32
    %c0_i32_0 = arith.constant 0 : i32
    %c0_i32_1 = arith.constant 0 : i32
    %c0_i32_2 = arith.constant 0 : i32
    return %arg0, %c0_i32, %c0_i32_0, %c0_i32_1 : i32, i32, i32, i32
  }
  func.func @transform_5(%arg0: i32) -> (i32, i32, i32) {
    %c0_i32 = arith.constant 0 : i32
    %c0_i32_0 = arith.constant 0 : i32
    %c0_i32_1 = arith.constant 0 : i32
    return %arg0, %c0_i32, %c0_i32_0 : i32, i32, i32
  }
  func.func @transform_6(%arg0: i32) -> (i32, i32) {
    %c0_i32 = arith.constant 0 : i32
    %c0_i32_0 = arith.constant 0 : i32
    %c0_i32_1 = arith.constant 0 : i32
    return %c0_i32, %c0_i32_0 : i32, i32
  }
}

</mosaic_0001>

<bundles_post_ra>
// kernel: dense_block_forward.1
= control target key start
LH: loop header
LB: loop body
LE: loop exit
PB: predicated region body
PF: predicated region fallthrough
CT: control target
= control target key end

     0   :  { %s8226_s21 = smov 0   ;;  %s11390_s0 = inlined_call_operand.vmem [shape: f32[400,128], index: 0, kind: input, shape index: {}, may-alias: {0,6}]   ;;  %s11391_s1 = inlined_call_operand.vmem [shape: f32[400,1], index: 1, kind: input, shape index: {}]   ;;  %s11392_s2 = inlined_call_operand.vmem [shape: f32[2,1,128], index: 2, kind: input, shape index: {}]   ;;  %s11393_s3 = inlined_call_operand.vmem [shape: f32[2,1,128], index: 3, kind: input, shape index: {}]   ;;  %s11394_s4 = inlined_call_operand.vmem [shape: f32[2,9,128,128], index: 4, kind: input, shape index: {}]   ;;  %s11395_s5 = inlined_call_operand.vmem [shape: f32[2,1,128], index: 5, kind: input, shape index: {}]   ;;  %s11396_s6 = inlined_call_operand.vmem [shape: f32[400,128], index: 6, kind: output, shape index: {}, may-alias: {0,6}]  }
   0x1 LB: > { %s6420_s22 = sadd.s32 4294967295, %s8187_s21   ;;  %p6423_p0 = scmp.ge.s32.totalorder %s8187_s21, 1  ;;  %s8187_s21 = sphi %s8226_s21, %s16_s21  }
   0x2   : > { %p231_p1 = scmp.lt.s32.totalorder %s8187_s21, 3 }
   0x4   : > { %p232_p2 = pnand %p6423_p0, %p231_p1 }
   0x6   : > { %235 = sbr.rel (%p232_p2) target bundleno = 1040 (0x410), region = 44 }
   0xb   : > { %p265_p3 = scmp.lt.s32.totalorder %s6420_s22, 1  ;;  %p6425_p4 = scmp.ne.s32.totalorder %s6420_s22, 0 }
   0xd   : > { %s8234_s23 = scalar_select %p265_p3, %s6420_s22, 1 }
   0xe   : > { %282 = sbr.rel (%p6425_p4) target bundleno = 192 (0xc0), region = 48 }
   0xf   : > { %s267_s26 = scalar_lea.vmem %s11392_s2, %s8234_s23  ;;  %s270_s29 = scalar_lea.vmem %s11393_s3, %s8234_s23 }
  0x10   : > { %s8146_s30 = smul.u32 1152, %s8234_s23  ;;  %s8249_s9 = scalar_lea.vmem %s11395_s5, %s8234_s23 }
  0x12   : > { %s8254_s12 = scalar_lea.vmem %s11394_s4, %s8146_s30 }
  0x13   : > { %v337_v0 = vld [vmem:[%s11390_s0] sm:$0xff]  ;;  %v338_v1 = vld [vmem:[%s11390_s0 + $0x8] sm:$0xff]  ;;  %v339_v2 = vld [vmem:[%s11390_s0 + $0x10] sm:$0xff]  ;;  %v8189_v3 = vmov 0.0  }
  0x14   : > { %283 = vst [vmem:[#allocation2] sm:$0xff] %v8189_v3  ;;  %284 = vst [vmem:[#allocation2 + $0x8] sm:$0xff] %v8189_v3 }
  0x15   : > { %285 = vst [vmem:[#allocation2 + $0x10] sm:$0xff] %v8189_v3  ;;  %286 = vst [vmem:[#allocation2 + $0x18] sm:$0xff] %v8189_v3 }
  0x16   : > { %287 = vst [vmem:[#allocation2 + $0x20] sm:$0xff] %v8189_v3  ;;  %288 = vst [vmem:[#allocation2 + $0x28] sm:$0xff] %v8189_v3 }
  0x17   : > { %289 = vst [vmem:[#allocation2 + $0x30] sm:$0xff] %v8189_v3  ;;  %290 = vst [vmem:[#allocation2 + $0x38] sm:$0xff] %v8189_v3 }
  0x18   : > { %291 = vst [vmem:[#allocation2 + $0x40] sm:$0xff] %v8189_v3  ;;  %292 = vst [vmem:[#allocation2 + $0x48] sm:$0xff] %v8189_v3 }
  0x19   : > { %293 = vst [vmem:[#allocation2 + $0x50] sm:$0xff] %v8189_v3  ;;  %294 = vst [vmem:[#allocation2 + $0x58] sm:$0xff] %v8189_v3 }
  0x1a   : > { %295 = vst [vmem:[#allocation2 + $0x60] sm:$0xff] %v8189_v3  ;;  %296 = vst [vmem:[#allocation2 + $0x68] sm:$0xff] %v8189_v3 }
  0x1b   : > { %297 = vst [vmem:[#allocation2 + $0x70] sm:$0xff] %v8189_v3  ;;  %298 = vst [vmem:[#allocation2 + $0x78] sm:$0xff] %v8189_v3 }
  0x1c   : > { %299 = vst [vmem:[#allocation2 + $0x80] sm:$0xff] %v8189_v3  ;;  %300 = vst [vmem:[#allocation2 + $0x88] sm:$0xff] %v8189_v3 }
  0x1d   : > { %301 = vst [vmem:[#allocation2 + $0x90] sm:$0xff] %v8189_v3  ;;  %302 = vst [vmem:[#allocation2 + $0x98] sm:$0xff] %v8189_v3 }
  0x1e   : > { %303 = vst [vmem:[#allocation2 + $0xa0] sm:$0xff] %v8189_v3  ;;  %304 = vst [vmem:[#allocation2 + $0xa8] sm:$0xff] %v8189_v3 }
  0x1f   : > { %305 = vst [vmem:[#allocation2 + $0xb0] sm:$0xff] %v8189_v3  ;;  %306 = vst [vmem:[#allocation2 + $0xb8] sm:$0xff] %v8189_v3 }
  0x20   : > { %307 = vst [vmem:[#allocation2 + $0xc0] sm:$0xff] %v8189_v3  ;;  %308 = vst [vmem:[#allocation2 + $0xc8] sm:$0xff] %v8189_v3 }
  0x21   : > { %309 = vst [vmem:[#allocation2 + $0xd0] sm:$0xff] %v8189_v3  ;;  %310 = vst [vmem:[#allocation2 + $0xd8] sm:$0xff] %v8189_v3 }
  0x22   : > { %311 = vst [vmem:[#allocation2 + $0xe0] sm:$0xff] %v8189_v3  ;;  %312 = vst [vmem:[#allocation2 + $0xe8] sm:$0xff] %v8189_v3 }
  0x23   : > { %313 = vst [vmem:[#allocation2 + $0xf0] sm:$0xff] %v8189_v3  ;;  %314 = vst [vmem:[#allocation2 + $0xf8] sm:$0xff] %v8189_v3 }
  0x24   : > { %315 = vst [vmem:[#allocation2 + $0x100] sm:$0xff] %v8189_v3  ;;  %316 = vst [vmem:[#allocation2 + $0x108] sm:$0xff] %v8189_v3 }
  0x25   : > { %317 = vst [vmem:[#allocation2 + $0x110] sm:$0xff] %v8189_v3  ;;  %318 = vst [vmem:[#allocation2 + $0x118] sm:$0xff] %v8189_v3 }
  0x26   : > { %319 = vst [vmem:[#allocation2 + $0x120] sm:$0xff] %v8189_v3  ;;  %320 = vst [vmem:[#allocation2 + $0x128] sm:$0xff] %v8189_v3 }
  0x27   : > { %321 = vst [vmem:[#allocation2 + $0x130] sm:$0xff] %v8189_v3  ;;  %322 = vst [vmem:[#allocation2 + $0x138] sm:$0xff] %v8189_v3 }
  0x28   : > { %323 = vst [vmem:[#allocation2 + $0x140] sm:$0xff] %v8189_v3  ;;  %324 = vst [vmem:[#allocation2 + $0x148] sm:$0xff] %v8189_v3 }
  0x29   : > { %325 = vst [vmem:[#allocation2 + $0x150] sm:$0xff] %v8189_v3  ;;  %326 = vst [vmem:[#allocation2 + $0x158] sm:$0xff] %v8189_v3 }
  0x2a   : > { %327 = vst [vmem:[#allocation2 + $0x160] sm:$0xff] %v8189_v3  ;;  %328 = vst [vmem:[#allocation2 + $0x168] sm:$0xff] %v8189_v3 }
  0x2b   : > { %329 = vst [vmem:[#allocation2 + $0x170] sm:$0xff] %v8189_v3  ;;  %330 = vst [vmem:[#allocation2 + $0x178] sm:$0xff] %v8189_v3 }
  0x2c   : > { %331 = vst [vmem:[#allocation2 + $0x180] sm:$0xff] %v8189_v3  ;;  %332 = vst [vmem:[#allocation2 + $0x188] sm:$0xff] %v8189_v3 }
  0x2d   : > { %333 = vst [vmem:[#allocation2 + $0x190] sm:$0xff] %v8189_v3  ;;  %334 = vst [vmem:[#allocation2 + $0x198] sm:$0xff] %v8189_v3 }
  0x2e   : > { %335 = vst [vmem:[#allocation2 + $0x1a0] sm:$0xff] %v8189_v3  ;;  %336 = vst [vmem:[#allocation2 + $0x1a8] sm:$0xff] %v8189_v3 }
  0x2f   : > { %387 = vst [vmem:[%s11396_s6] sm:$0xff] %v337_v0  ;;  %388 = vst [vmem:[%s11396_s6 + $0x8] sm:$0xff] %v338_v1 }
  0x30   : > { %389 = vst [vmem:[%s11396_s6 + $0x10] sm:$0xff] %v339_v2 }
  0x37   : > { %v340_v4 = vld [vmem:[%s11390_s0 + $0x18] sm:$0xff]  ;;  %v341_v5 = vld [vmem:[%s11390_s0 + $0x20] sm:$0xff]  ;;  %v342_v6 = vld [vmem:[%s11390_s0 + $0x28] sm:$0xff] }
  0x38   : > { %390 = vst [vmem:[%s11396_s6 + $0x18] sm:$0xff] %v340_v4  ;;  %391 = vst [vmem:[%s11396_s6 + $0x20] sm:$0xff] %v341_v5 }
  0x39   : > { %392 = vst [vmem:[%s11396_s6 + $0x28] sm:$0xff] %v342_v6 }
  0x40   : > { %v343_v7 = vld [vmem:[%s11390_s0 + $0x30] sm:$0xff]  ;;  %v344_v8 = vld [vmem:[%s11390_s0 + $0x38] sm:$0xff]  ;;  %v345_v9 = vld [vmem:[%s11390_s0 + $0x40] sm:$0xff] }
  0x41   : > { %393 = vst [vmem:[%s11396_s6 + $0x30] sm:$0xff] %v343_v7  ;;  %394 = vst [vmem:[%s11396_s6 + $0x38] sm:$0xff] %v344_v8 }
  0x42   : > { %395 = vst [vmem:[%s11396_s6 + $0x40] sm:$0xff] %v345_v9 }
  0x49   : > { %v346_v10 = vld [vmem:[%s11390_s0 + $0x48] sm:$0xff]  ;;  %v347_v11 = vld [vmem:[%s11390_s0 + $0x50] sm:$0xff]  ;;  %v348_v12 = vld [vmem:[%s11390_s0 + $0x58] sm:$0xff] }
  0x4a   : > { %396 = vst [vmem:[%s11396_s6 + $0x48] sm:$0xff] %v346_v10  ;;  %397 = vst [vmem:[%s11396_s6 + $0x50] sm:$0xff] %v347_v11 }
  0x4b   : > { %398 = vst [vmem:[%s11396_s6 + $0x58] sm:$0xff] %v348_v12 }
  0x52   : > { %v349_v13 = vld [vmem:[%s11390_s0 + $0x60] sm:$0xff]  ;;  %v350_v14 = vld [vmem:[%s11390_s0 + $0x68] sm:$0xff]  ;;  %v351_v15 = vld [vmem:[%s11390_s0 + $0x70] sm:$0xff] }
  0x53   : > { %399 = vst [vmem:[%s11396_s6 + $0x60] sm:$0xff] %v349_v13  ;;  %400 = vst [vmem:[%s11396_s6 + $0x68] sm:$0xff] %v350_v14 }
  0x54   : > { %401 = vst [vmem:[%s11396_s6 + $0x70] sm:$0xff] %v351_v15 }
  0x5b   : > { %v352_v16 = vld [vmem:[%s11390_s0 + $0x78] sm:$0xff]  ;;  %v353_v17 = vld [vmem:[%s11390_s0 + $0x80] sm:$0xff]  ;;  %v354_v18 = vld [vmem:[%s11390_s0 + $0x88] sm:$0xff] }
  0x5c   : > { %402 = vst [vmem:[%s11396_s6 + $0x78] sm:$0xff] %v352_v16  ;;  %403 = vst [vmem:[%s11396_s6 + $0x80] sm:$0xff] %v353_v17 }
  0x5d   : > { %404 = vst [vmem:[%s11396_s6 + $0x88] sm:$0xff] %v354_v18 }
  0x64   : > { %v355_v19 = vld [vmem:[%s11390_s0 + $0x90] sm:$0xff]  ;;  %v356_v20 = vld [vmem:[%s11390_s0 + $0x98] sm:$0xff]  ;;  %v357_v21 = vld [vmem:[%s11390_s0 + $0xa0] sm:$0xff] }
  0x65   : > { %405 = vst [vmem:[%s11396_s6 + $0x90] sm:$0xff] %v355_v19  ;;  %406 = vst [vmem:[%s11396_s6 + $0x98] sm:$0xff] %v356_v20 }
  0x66   : > { %407 = vst [vmem:[%s11396_s6 + $0xa0] sm:$0xff] %v357_v21 }
  0x6d   : > { %v358_v22 = vld [vmem:[%s11390_s0 + $0xa8] sm:$0xff]  ;;  %v359_v23 = vld [vmem:[%s11390_s0 + $0xb0] sm:$0xff]  ;;  %v360_v24 = vld [vmem:[%s11390_s0 + $0xb8] sm:$0xff] }
  0x6e   : > { %408 = vst [vmem:[%s11396_s6 + $0xa8] sm:$0xff] %v358_v22  ;;  %409 = vst [vmem:[%s11396_s6 + $0xb0] sm:$0xff] %v359_v23 }
  0x6f   : > { %410 = vst [vmem:[%s11396_s6 + $0xb8] sm:$0xff] %v360_v24 }
  0x76   : > { %v361_v25 = vld [vmem:[%s11390_s0 + $0xc0] sm:$0xff]  ;;  %v362_v26 = vld [vmem:[%s11390_s0 + $0xc8] sm:$0xff]  ;;  %v363_v27 = vld [vmem:[%s11390_s0 + $0xd0] sm:$0xff] }
  0x77   : > { %411 = vst [vmem:[%s11396_s6 + $0xc0] sm:$0xff] %v361_v25  ;;  %412 = vst [vmem:[%s11396_s6 + $0xc8] sm:$0xff] %v362_v26 }
  0x78   : > { %413 = vst [vmem:[%s11396_s6 + $0xd0] sm:$0xff] %v363_v27 }
  0x7f   : > { %v364_v28 = vld [vmem:[%s11390_s0 + $0xd8] sm:$0xff]  ;;  %v365_v29 = vld [vmem:[%s11390_s0 + $0xe0] sm:$0xff]  ;;  %v366_v30 = vld [vmem:[%s11390_s0 + $0xe8] sm:$0xff] }
  0x80   : > { %414 = vst [vmem:[%s11396_s6 + $0xd8] sm:$0xff] %v364_v28  ;;  %415 = vst [vmem:[%s11396_s6 + $0xe0] sm:$0xff] %v365_v29 }
  0x81   : > { %416 = vst [vmem:[%s11396_s6 + $0xe8] sm:$0xff] %v366_v30 }
  0x88   : > { %v367_v31 = vld [vmem:[%s11390_s0 + $0xf0] sm:$0xff]  ;;  %v368_v32 = vld [vmem:[%s11390_s0 + $0xf8] sm:$0xff]  ;;  %v369_v33 = vld [vmem:[%s11390_s0 + $0x100] sm:$0xff] }
  0x89   : > { %417 = vst [vmem:[%s11396_s6 + $0xf0] sm:$0xff] %v367_v31  ;;  %418 = vst [vmem:[%s11396_s6 + $0xf8] sm:$0xff] %v368_v32 }
  0x8a   : > { %419 = vst [vmem:[%s11396_s6 + $0x100] sm:$0xff] %v369_v33 }
  0x91   : > { %v370_v34 = vld [vmem:[%s11390_s0 + $0x108] sm:$0xff]  ;;  %v371_v35 = vld [vmem:[%s11390_s0 + $0x110] sm:$0xff]  ;;  %v372_v36 = vld [vmem:[%s11390_s0 + $0x118] sm:$0xff] }
  0x92   : > { %420 = vst [vmem:[%s11396_s6 + $0x108] sm:$0xff] %v370_v34  ;;  %421 = vst [vmem:[%s11396_s6 + $0x110] sm:$0xff] %v371_v35 }
  0x93   : > { %422 = vst [vmem:[%s11396_s6 + $0x118] sm:$0xff] %v372_v36 }
  0x9a   : > { %v373_v37 = vld [vmem:[%s11390_s0 + $0x120] sm:$0xff]  ;;  %v374_v38 = vld [vmem:[%s11390_s0 + $0x128] sm:$0xff]  ;;  %v375_v39 = vld [vmem:[%s11390_s0 + $0x130] sm:$0xff] }
  0x9b   : > { %423 = vst [vmem:[%s11396_s6 + $0x120] sm:$0xff] %v373_v37  ;;  %424 = vst [vmem:[%s11396_s6 + $0x128] sm:$0xff] %v374_v38 }
  0x9c   : > { %425 = vst [vmem:[%s11396_s6 + $0x130] sm:$0xff] %v375_v39 }
  0xa3   : > { %v376_v40 = vld [vmem:[%s11390_s0 + $0x138] sm:$0xff]  ;;  %v377_v41 = vld [vmem:[%s11390_s0 + $0x140] sm:$0xff]  ;;  %v378_v42 = vld [vmem:[%s11390_s0 + $0x148] sm:$0xff] }
  0xa4   : > { %426 = vst [vmem:[%s11396_s6 + $0x138] sm:$0xff] %v376_v40  ;;  %427 = vst [vmem:[%s11396_s6 + $0x140] sm:$0xff] %v377_v41 }
  0xa5   : > { %428 = vst [vmem:[%s11396_s6 + $0x148] sm:$0xff] %v378_v42 }
  0xac   : > { %v379_v43 = vld [vmem:[%s11390_s0 + $0x150] sm:$0xff]  ;;  %v380_v44 = vld [vmem:[%s11390_s0 + $0x158] sm:$0xff]  ;;  %v381_v45 = vld [vmem:[%s11390_s0 + $0x160] sm:$0xff] }
  0xad   : > { %429 = vst [vmem:[%s11396_s6 + $0x150] sm:$0xff] %v379_v43  ;;  %430 = vst [vmem:[%s11396_s6 + $0x158] sm:$0xff] %v380_v44 }
  0xae   : > { %431 = vst [vmem:[%s11396_s6 + $0x160] sm:$0xff] %v381_v45 }
  0xb5   : > { %v382_v46 = vld [vmem:[%s11390_s0 + $0x168] sm:$0xff]  ;;  %v383_v47 = vld [vmem:[%s11390_s0 + $0x170] sm:$0xff]  ;;  %v384_v48 = vld [vmem:[%s11390_s0 + $0x178] sm:$0xff] }
  0xb6   : > { %432 = vst [vmem:[%s11396_s6 + $0x168] sm:$0xff] %v382_v46  ;;  %433 = vst [vmem:[%s11396_s6 + $0x170] sm:$0xff] %v383_v47 }
  0xb7   : > { %434 = vst [vmem:[%s11396_s6 + $0x178] sm:$0xff] %v384_v48 }
  0xbe   : > { %v385_v49 = vld [vmem:[%s11390_s0 + $0x180] sm:$0xff]  ;;  %v386_v50 = vld [vmem:[%s11390_s0 + $0x188] sm:$0xff] }
  0xbf   : > { %435 = vst [vmem:[%s11396_s6 + $0x180] sm:$0xff] %v385_v49  ;;  %436 = vst [vmem:[%s11396_s6 + $0x188] sm:$0xff] %v386_v50 }
  0xc0 PF: > { %v685_v51 = vld [vmem:[%s11391_s1 + $0xd0] sm:$0xff]  ;;  %v683_v52 = vld [vmem:[%s11391_s1 + $0xc0] sm:$0xff]  ;;  %v8190_v53 = vmov 0   ;;  %v686_v54 = vld [vmem:[%s11391_s1 + $0xd8] sm:$0xff] }
  0xc1   : > { %8158 = vset.pattern.permute.xlu1 %v8190_v53  ;;  %8157 = vset.pattern.permute.xlu0 %v8190_v53  ;;  %v684_v55 = vld [vmem:[%s11391_s1 + $0xc8] sm:$0xff]  ;;  %v687_v56 = vld [vmem:[%s11391_s1 + $0xe0] sm:$0xff]  ;;  %v689_v59 = vld [vmem:[%s11391_s1 + $0xf0] sm:$0xff] }
  0xc2   : > { %1003 = vperm.xlu1 %8158, %v685_v51   ;;  %993 = vperm.xlu0 %8157, %v683_v52   ;;  %v8574_v57 = vld [vmem:[%s11391_s1] sm:$0xff]  ;;  %v688_v58 = vld [vmem:[%s11391_s1 + $0xe8] sm:$0xff]  ;;  %v8591_v61 = vld [vmem:[%s11391_s1 + $0x10] sm:$0xff] }
  0xc3   : > { %v8586_v60 = vld [vmem:[%s11391_s1 + $0x8] sm:$0xff]  ;;  %v1286_v62 = vld [vmem:[%s8254_s12 + $0x78] sm:$0xff]  ;;  %v8597_v63 = vld [vmem:[%s11396_s6] sm:$0xff] }
  0xc4   : > { %7151 = vmatprep.subr.mxu0 %v1286_v62  ;;  %v8602_v0 = vld [vmem:[%s11396_s6 + $0x8] sm:$0xff]  ;;  %v8607_v1 = vld [vmem:[%s11396_s6 + $0x10] sm:$0xff]  ;;  %8114 = vmatprep.subr.mxu1 %v1286_v62  ;;  %v542_v3 = vmul.f32 %v8597_v63, %v8597_v63  ;;  %v690_v5 = vld [vmem:[%s11391_s1 + $0xf8] sm:$0xff] }
  0xc5   : > { %v487_v2 = vadd.f32 %v8602_v0, %v8597_v63  ;;  %v543_v4 = vmul.f32 %v8602_v0, %v8602_v0  ;;  %v691_v6 = vld [vmem:[%s11391_s1 + $0x100] sm:$0xff]  ;;  %v8626_v7 = vld [vmem:[%s11396_s6 + $0x18] sm:$0xff]  ;;  %7152 = vmatpush3.msra.mxu0 %v1286_v62  ;;  %8130 = vmatpush3.msra.mxu1 %v1286_v62  ;;  %v544_v10 = vmul.f32 %v8607_v1, %v8607_v1  ;;  %v442_v15 = vld [vmem:[%s11396_s6 + $0x28] sm:$0xff] }
  0xc6   : > { %1008 = vperm.xlu1 %8158, %v686_v54   ;;  %998 = vperm.xlu0 %8157, %v684_v55   ;;  %v8632_v9 = vld [vmem:[%s11396_s6 + $0x20] sm:$0xff]  ;;  %v8640_v13 = vld [vmem:[%s11391_s1 + $0x18] sm:$0xff]  ;;  %v443_v17 = vld [vmem:[%s11396_s6 + $0x30] sm:$0xff]  ;;  %v545_v18 = vmul.f32 %v8626_v7, %v8626_v7  ;;  %v547_v32 = vmul.f32 %v442_v15, %v442_v15 }
  0xc7   : > { %v488_v8 = vadd.f32 %v487_v2, %v8607_v1  ;;  %v592_v11 = vadd.f32 %v543_v4, %v542_v3  ;;  %v8645_v14 = vld [vmem:[%s11391_s1 + $0x20] sm:$0xff]  ;;  %v692_v21 = vld [vmem:[%s11391_s1 + $0x108] sm:$0xff]  ;;  %v693_v22 = vld [vmem:[%s11391_s1 + $0x110] sm:$0xff]  ;;  %v546_v26 = vmul.f32 %v8632_v9, %v8632_v9  ;;  %v548_v35 = vmul.f32 %v443_v17, %v443_v17 }
  0xc8   : > { %v444_v23 = vld [vmem:[%s11396_s6 + $0x38] sm:$0xff]  ;;  %v445_v25 = vld [vmem:[%s11396_s6 + $0x40] sm:$0xff]  ;;  %v8675_v29 = vld [vmem:[%s11391_s1 + $0x28] sm:$0xff] }
  0xc9   : > { %v489_v12 = vadd.f32 %v488_v8, %v8626_v7  ;;  %v593_v19 = vadd.f32 %v592_v11, %v544_v10  ;;  %v8680_v30 = vld [vmem:[%s11391_s1 + $0x30] sm:$0xff]  ;;  %v446_v31 = vld [vmem:[%s11396_s6 + $0x48] sm:$0xff]  ;;  %v694_v40 = vld [vmem:[%s11391_s1 + $0x118] sm:$0xff]  ;;  %v549_v43 = vmul.f32 %v444_v23, %v444_v23  ;;  %v550_v47 = vmul.f32 %v445_v25, %v445_v25 }
  0xca   : > { %1013 = vperm.xlu0 %8157, %v687_v56   ;;  %873 = vperm.xlu1 %8158, %v8574_v57   ;;  %v447_v34 = vld [vmem:[%s11396_s6 + $0x50] sm:$0xff]  ;;  %v1284_v39 = vld [vmem:[%s8254_s12 + $0x68] sm:$0xff]  ;;  %v695_v41 = vld [vmem:[%s11391_s1 + $0x120] sm:$0xff]  ;;  %v551_v54 = vmul.f32 %v446_v31, %v446_v31 }
  0xcb   : > { %v490_v16 = vadd.f32 %v489_v12, %v8632_v9  ;;  %v594_v27 = vadd.f32 %v593_v19, %v545_v18  ;;  %v1285_v38 = vld [vmem:[%s8254_s12 + $0x70] sm:$0xff]  ;;  %v448_v42 = vld [vmem:[%s11396_s6 + $0x58] sm:$0xff]  ;;  %v449_v46 = vld [vmem:[%s11396_s6 + $0x60] sm:$0xff]  ;;  %v552_v62 = vmul.f32 %v447_v34, %v447_v34 }
  0xcc   : > { %7153 = vmatprep.subr.mxu0 %v1285_v38  ;;  %8115 = vmatprep.subr.mxu1 %v1285_v38  ;;  %v1283_v49 = vld [vmem:[%s8254_s12 + $0x60] sm:$0xff]  ;;  %v8708_v51 = vld [vmem:[%s11391_s1 + $0x38] sm:$0xff]  ;;  %v450_v53 = vld [vmem:[%s11396_s6 + $0x68] sm:$0xff]  ;;  %v553_v10 = vmul.f32 %v448_v42, %v448_v42 }
  0xcd   : > { %v491_v20 = vadd.f32 %v490_v16, %v442_v15  ;;  %v595_v36 = vadd.f32 %v594_v27, %v546_v26  ;;  %7154 = vmatpush3.msra.mxu0 %v1285_v38  ;;  %8131 = vmatpush3.msra.mxu1 %v1285_v38  ;;  %v8713_v52 = vld [vmem:[%s11391_s1 + $0x40] sm:$0xff]  ;;  %v1281_v4 = vld [vmem:[%s8254_s12 + $0x50] sm:$0xff]  ;;  %v452_v8 = vld [vmem:[%s11396_s6 + $0x78] sm:$0xff]  ;;  %v554_v16 = vmul.f32 %v449_v46, %v449_v46 }
  0xce   : > { %1018 = vperm.xlu0 %8157, %v688_v58   ;;  %1023 = vperm.xlu1 %8158, %v689_v59   ;;  %v1282_v58 = vld [vmem:[%s8254_s12 + $0x58] sm:$0xff]  ;;  %v451_v59 = vld [vmem:[%s11396_s6 + $0x70] sm:$0xff]  ;;  %v453_v15 = vld [vmem:[%s11396_s6 + $0x80] sm:$0xff] }
  0xcf   : > { %v492_v24 = vadd.f32 %v491_v20, %v443_v17  ;;  %v596_v44 = vadd.f32 %v595_v36, %v547_v32  ;;  %7155 = vmatprep.subr.mxu0 %v1284_v39  ;;  %8116 = vmatprep.subr.mxu1 %v1284_v39  ;;  %v1280_v18 = vld [vmem:[%s8254_s12 + $0x48] sm:$0xff]  ;;  %v1279_v26 = vld [vmem:[%s8254_s12 + $0x40] sm:$0xff]  ;;  %v455_v27 = vld [vmem:[%s11396_s6 + $0x90] sm:$0xff] }
  0xd0   : > { %7156 = vmatpush3.msra.mxu0 %v1284_v39  ;;  %8132 = vmatpush3.msra.mxu1 %v1284_v39  ;;  %v8741_v20 = vld [vmem:[%s11391_s1 + $0x48] sm:$0xff]  ;;  %v456_v36 = vld [vmem:[%s11396_s6 + $0x98] sm:$0xff] }
  0xd1   : > { %v493_v28 = vadd.f32 %v492_v24, %v444_v23  ;;  %v597_v48 = vadd.f32 %v596_v44, %v548_v35  ;;  %7157 = vmatprep.subr.mxu0 %v1283_v49  ;;  %8117 = vmatprep.subr.mxu1 %v1283_v49  ;;  %v555_v23 = vmul.f32 %v450_v53, %v450_v53  ;;  %v699_v35 = vld [vmem:[%s11391_s1 + $0x140] sm:$0xff] }
  0xd2   : > { %878 = vperm.xlu0 %8157, %v8586_v60   ;;  %883 = vperm.xlu1 %8158, %v8591_v61  }
  0xd3   : > { %v494_v33 = vadd.f32 %v493_v28, %v445_v25  ;;  %v598_v55 = vadd.f32 %v597_v48, %v549_v43  ;;  %7158 = vmatpush3.msra.mxu0 %v1283_v49  ;;  %8133 = vmatpush3.msra.mxu1 %v1283_v49  ;;  %v556_v28 = vmul.f32 %v451_v59, %v451_v59  ;;  %v1277_v43 = vld [vmem:[%s8254_s12 + $0x30] sm:$0xff] }
  0xd4   : > { %7159 = vmatprep.subr.mxu0 %v1282_v58  ;;  %8118 = vmatprep.subr.mxu1 %v1282_v58 }
  0xd5   : > { %v495_v37 = vadd.f32 %v494_v33, %v446_v31  ;;  %v599_v2 = vadd.f32 %v598_v55, %v550_v47  ;;  %7160 = vmatpush3.msra.mxu0 %v1282_v58  ;;  %8134 = vmatpush3.msra.mxu1 %v1282_v58  ;;  %v1278_v33 = vld [vmem:[%s8254_s12 + $0x38] sm:$0xff]  ;;  %v458_v47 = vld [vmem:[%s11396_s6 + $0xa8] sm:$0xff]  ;;  %v560_v55 = vmul.f32 %v455_v27, %v455_v27 }
  0xd6   : > { %1028 = vperm.xlu0 %8157, %v690_v5   ;;  %1033 = vperm.xlu1 %8158, %v691_v6   ;;  %v696_v5 = vld [vmem:[%s11391_s1 + $0x128] sm:$0xff]  ;;  %v697_v6 = vld [vmem:[%s11391_s1 + $0x130] sm:$0xff] }
  0xd7   : > { %v496_v45 = vadd.f32 %v495_v37, %v447_v34  ;;  %v600_v11 = vadd.f32 %v599_v2, %v551_v54  ;;  %7161 = vmatprep.subr.mxu0 %v1281_v4  ;;  %8119 = vmatprep.subr.mxu1 %v1281_v4  ;;  %v698_v34 = vld [vmem:[%s11391_s1 + $0x138] sm:$0xff]  ;;  %v557_v37 = vmul.f32 %v452_v8, %v452_v8  ;;  %v459_v54 = vld [vmem:[%s11396_s6 + $0xb0] sm:$0xff] }
  0xd8   : > { %7162 = vmatpush3.msra.mxu0 %v1281_v4  ;;  %8135 = vmatpush3.msra.mxu1 %v1281_v4  ;;  %v701_v2 = vld [vmem:[%s11391_s1 + $0x150] sm:$0xff]  ;;  %v561_v4 = vmul.f32 %v456_v36, %v456_v36 }
  0xd9   : > { %v497_v50 = vadd.f32 %v496_v45, %v448_v42  ;;  %v601_v17 = vadd.f32 %v600_v11, %v552_v62  ;;  %7163 = vmatprep.subr.mxu0 %v1280_v18  ;;  %8120 = vmatprep.subr.mxu1 %v1280_v18  ;;  %v8774_v45 = vld [vmem:[%s11391_s1 + $0x58] sm:$0xff]  ;;  %v700_v62 = vld [vmem:[%s11391_s1 + $0x148] sm:$0xff] }
  0xda   : > { %888 = vperm.xlu0 %8157, %v8640_v13   ;;  %893 = vperm.xlu1 %8158, %v8645_v14  }
  0xdb   : > { %v498_v56 = vadd.f32 %v497_v50, %v449_v46  ;;  %v602_v24 = vadd.f32 %v601_v17, %v553_v10  ;;  %7164 = vmatpush3.msra.mxu0 %v1280_v18  ;;  %8136 = vmatpush3.msra.mxu1 %v1280_v18  ;;  %v8779_v46 = vld [vmem:[%s11391_s1 + $0x60] sm:$0xff]  ;;  %v8814_v17 = vld [vmem:[%s11391_s1 + $0x70] sm:$0xff]  ;;  %v8819_v18 = vld [vmem:[%s11396_s6 + $0xc8] sm:$0xff] }
  0xdc   : > { %7165 = vmatprep.subr.mxu0 %v1279_v26  ;;  %8121 = vmatprep.subr.mxu1 %v1279_v26 }
  0xdd   : > { %v499_v3 = vadd.f32 %v498_v56, %v450_v53  ;;  %v603_v31 = vadd.f32 %v602_v24, %v554_v16  ;;  %7166 = vmatpush3.msra.mxu0 %v1279_v26  ;;  %8137 = vmatpush3.msra.mxu1 %v1279_v26  ;;  %v1276_v53 = vld [vmem:[%s8254_s12 + $0x28] sm:$0xff]  ;;  %v1273_v24 = vld [vmem:[%s8254_s12 + $0x10] sm:$0xff]  ;;  %v564_v26 = vmul.f32 %v459_v54, %v459_v54 }
  0xde   : > { %1038 = vperm.xlu0 %8157, %v692_v21   ;;  %1043 = vperm.xlu1 %8158, %v693_v22   ;;  %v8746_v21 = vld [vmem:[%s11391_s1 + $0x50] sm:$0xff]  ;;  %v454_v22 = vld [vmem:[%s11396_s6 + $0x88] sm:$0xff] }
  0xdf   : > { %v500_v12 = vadd.f32 %v499_v3, %v451_v59  ;;  %v604_v38 = vadd.f32 %v603_v31, %v555_v23  ;;  %7167 = vmatprep.subr.mxu0 %v1278_v33  ;;  %8122 = vmatprep.subr.mxu1 %v1278_v33  ;;  %v559_v48 = vmul.f32 %v454_v22, %v454_v22  ;;  %v1275_v59 = vld [vmem:[%s8254_s12 + $0x20] sm:$0xff]  ;;  %v460_v3 = vld [vmem:[%s11396_s6 + $0xb8] sm:$0xff]  ;;  %v8809_v16 = vld [vmem:[%s11391_s1 + $0x68] sm:$0xff] }
  0xe0   : > { %7168 = vmatpush3.msra.mxu0 %v1278_v33  ;;  %8138 = vmatpush3.msra.mxu1 %v1278_v33  ;;  %v1272_v31 = vld [vmem:[%s8254_s12 + $0x8] sm:$0xff]  ;;  %v703_v33 = vld [vmem:[%s11391_s1 + $0x160] sm:$0xff] }
  0xe1   : > { %v501_v19 = vadd.f32 %v500_v12, %v452_v8  ;;  %v605_v42 = vadd.f32 %v604_v38, %v556_v28  ;;  %7169 = vmatprep.subr.mxu0 %v1277_v43  ;;  %8123 = vmatprep.subr.mxu1 %v1277_v43  ;;  %v8803_v8 = vld [vmem:[%s11396_s6 + $0xc0] sm:$0xff]  ;;  %v1274_v12 = vld [vmem:[%s8254_s12 + $0x18] sm:$0xff] }
  0xe2   : > { %898 = vperm.xlu0 %8157, %v8675_v29   ;;  %903 = vperm.xlu1 %8158, %v8680_v30   ;;  %v8847_v38 = vld [vmem:[%s11396_s6 + $0xe0] sm:$0xff] }
  0xe3   : > { %v502_v25 = vadd.f32 %v501_v19, %v453_v15  ;;  %v606_v49 = vadd.f32 %v605_v42, %v557_v37  ;;  %7170 = vmatpush3.msra.mxu0 %v1277_v43  ;;  %8139 = vmatpush3.msra.mxu1 %v1277_v43  ;;  %v563_v19 = vmul.f32 %v458_v47, %v458_v47  ;;  %v1221_v43 = vld [vmem:[#allocation2 + $0x5] sm:$0xff] }
  0xe4   : > { %7171 = vmatprep.subr.mxu0 %v1276_v53  ;;  %8124 = vmatprep.subr.mxu1 %v1276_v53 }
  0xe5   : > { %v503_v32 = vadd.f32 %v502_v25, %v454_v22  ;;  %7172 = vmatpush3.msra.mxu0 %v1276_v53  ;;  %8140 = vmatpush3.msra.mxu1 %v1276_v53  ;;  %v8826_v25 = vld [vmem:[%s11396_s6 + $0xd0] sm:$0xff] }
  0xe6   : > { %1048 = vperm.xlu0 %8157, %v694_v40   ;;  %1053 = vperm.xlu1 %8158, %v695_v41   ;;  %v457_v40 = vld [vmem:[%s11396_s6 + $0xa0] sm:$0xff]  ;;  %v558_v41 = vmul.f32 %v453_v15, %v453_v15 }
  0xe7   : > { %v504_v39 = vadd.f32 %v503_v32, %v455_v27  ;;  %v562_v10 = vmul.f32 %v457_v40, %v457_v40  ;;  %7173 = vmatprep.subr.mxu0 %v1275_v59  ;;  %8125 = vmatprep.subr.mxu1 %v1275_v59  ;;  %v702_v32 = vld [vmem:[%s11391_s1 + $0x158] sm:$0xff] }
  0xe8   : > { %v607_v56 = vadd.f32 %v606_v49, %v558_v41  ;;  %7174 = vmatpush3.msra.mxu0 %v1275_v59  ;;  %8141 = vmatpush3.msra.mxu1 %v1275_v59  ;;  %v1271_v41 = vld [vmem:[%s8254_s12] sm:$0xff]  ;;  %v567_v49 = vmul.f32 %v8819_v18, %v8819_v18 }
  0xe9   : > { %v505_v44 = vadd.f32 %v504_v39, %v456_v36  ;;  %7175 = vmatprep.subr.mxu0 %v1274_v12  ;;  %8126 = vmatprep.subr.mxu1 %v1274_v12  ;;  %v566_v39 = vmul.f32 %v8803_v8, %v8803_v8 }
  0xea   : > { %908 = vperm.xlu0 %8157, %v8708_v51   ;;  %913 = vperm.xlu1 %8158, %v8713_v52  }
  0xeb   : > { %v506_v50 = vadd.f32 %v505_v44, %v457_v40  ;;  %7176 = vmatpush3.msra.mxu0 %v1274_v12  ;;  %8142 = vmatpush3.msra.mxu1 %v1274_v12  ;;  %v8856_v44 = vld [vmem:[%s11391_s1 + $0x78] sm:$0xff] }
  0xec   : > { %7177 = vmatprep.subr.mxu0 %v1273_v24  ;;  %8127 = vmatprep.subr.mxu1 %v1273_v24 }
  0xed   : > { %v507_v58 = vadd.f32 %v506_v50, %v458_v47  ;;  %7178 = vmatpush3.msra.mxu0 %v1273_v24  ;;  %8143 = vmatpush3.msra.mxu1 %v1273_v24  ;;  %v8861_v47 = vld [vmem:[%s11391_s1 + $0x80] sm:$0xff]  ;;  %v8923_v24 = vld [vmem:[%s11396_s6 + $0x108] sm:$0xff] }
  0xee   : > { %1058 = vperm.xlu0 %8157, %v696_v5   ;;  %1063 = vperm.xlu1 %8158, %v697_v6   ;;  %v608_v5 = vadd.f32 %v607_v56, %v559_v48  ;;  %v8866_v48 = vld [vmem:[%s11396_s6 + $0xe8] sm:$0xff] }
  0xef   : > { %v508_v6 = vadd.f32 %v507_v58, %v459_v54  ;;  %7179 = vmatprep.subr.mxu0 %v1272_v31  ;;  %8128 = vmatprep.subr.mxu1 %v1272_v31  ;;  %v8874_v54 = vld [vmem:[%s11396_s6 + $0xf0] sm:$0xff]  ;;  %v8879_v58 = vld [vmem:[%s8254_s12 + $0xf8] sm:$0xff] }
  0xf0   : > { %v609_v11 = vadd.f32 %v608_v5, %v560_v55  ;;  %7180 = vmatpush3.msra.mxu0 %v1272_v31  ;;  %8144 = vmatpush3.msra.mxu1 %v1272_v31  ;;  %v568_v55 = vmul.f32 %v8826_v25, %v8826_v25  ;;  %v8932_v31 = vld [vmem:[%s11396_s6 + $0x110] sm:$0xff] }
  0xf1   : > { %v509_v15 = vadd.f32 %v508_v6, %v460_v3  ;;  %7181 = vmatprep.subr.mxu0 %v1271_v41  ;;  %8129 = vmatprep.subr.mxu1 %v1271_v41 }
  0xf2   : > { %918 = vperm.xlu0 %8157, %v8741_v20   ;;  %923 = vperm.xlu1 %8158, %v8746_v21   ;;  %v610_v22 = vadd.f32 %v609_v11, %v561_v4  ;;  %v570_v11 = vmul.f32 %v8847_v38, %v8847_v38 }
  0xf3   : > { %v510_v23 = vadd.f32 %v509_v15, %v8803_v8  ;;  %7182 = vmatpush3.msra.mxu0 %v1271_v41  ;;  %7183 = vmatprep.mubr.f32.mxu0 %v1221_v43  ;;  %v8956_v43 = vld [vmem:[%s11396_s6 + $0x120] sm:$0xff] }
  0xf4   : > { %v611_v27 = vadd.f32 %v610_v22, %v562_v10  ;;  %8145 = vmatpush3.msra.mxu1 %v1271_v41  ;;  %v8902_v10 = vld [vmem:[%s11396_s6 + $0x100] sm:$0xff]  ;;  %v8913_v22 = vld [vmem:[%s11391_s1 + $0x88] sm:$0xff] }
  0xf5   : > { %v511_v28 = vadd.f32 %v510_v23, %v8819_v18  ;;  %7258 = vmatprep.subr.mxu1 %v8879_v58  ;;  %v8918_v23 = vld [vmem:[%s11391_s1 + $0x90] sm:$0xff] }
  0xf6   : > { %1068 = vperm.xlu0 %8157, %v698_v34   ;;  %1073 = vperm.xlu1 %8158, %v699_v35   ;;  %v8841_v34 = vld [vmem:[%s11396_s6 + $0xd8] sm:$0xff]  ;;  %v565_v35 = vmul.f32 %v460_v3, %v460_v3  ;;  %v612_v36 = vadd.f32 %v611_v27, %v563_v19 }
  0xf7   : > { %v512_v37 = vadd.f32 %v511_v28, %v8826_v25  ;;  %v8893_v3 = vld [vmem:[%s11396_s6 + $0xf8] sm:$0xff]  ;;  %v569_v4 = vmul.f32 %v8841_v34, %v8841_v34 }
  0xf8   : > { %v613_v40 = vadd.f32 %v612_v36, %v564_v26  ;;  %v8908_v19 = vld [vmem:[%s8254_s12 + $0x178] sm:$0xff]  ;;  %v571_v26 = vmul.f32 %v8866_v48, %v8866_v48 }
  0xf9   : > { %v513_v42 = vadd.f32 %v512_v37, %v8841_v34  ;;  %7365 = vmatprep.subr.mxu0 %v8908_v19  ;;  %v706_v36 = vld [vmem:[%s11391_s1 + $0x178] sm:$0xff]  ;;  %v707_v37 = vld [vmem:[%s11391_s1 + $0x180] sm:$0xff] }
  0xfa   : > { %928 = vperm.xlu0 %8157, %v8774_v45   ;;  %933 = vperm.xlu1 %8158, %v8779_v46   ;;  %v614_v50 = vadd.f32 %v613_v40, %v565_v35  ;;  %v573_v40 = vmul.f32 %v8893_v3, %v8893_v3 }
  0xfb   : > { %v514_v53 = vadd.f32 %v513_v42, %v8847_v38 }
  0xfc   : > { %v615_v56 = vadd.f32 %v614_v50, %v566_v39  ;;  %v8948_v39 = vld [vmem:[%s11396_s6 + $0x118] sm:$0xff] }
  0xfd   : > { %v515_v59 = vadd.f32 %v514_v53, %v8866_v48 }
  0xfe   : > { %1078 = vperm.xlu0 %8157, %v700_v62   ;;  %1083 = vperm.xlu1 %8158, %v701_v2   ;;  %v704_v62 = vld [vmem:[%s11391_s1 + $0x168] sm:$0xff]  ;;  %v705_v2 = vld [vmem:[%s11391_s1 + $0x170] sm:$0xff]  ;;  %v616_v5 = vadd.f32 %v615_v56, %v567_v49  ;;  %v574_v49 = vmul.f32 %v8902_v10, %v8902_v10  ;;  %v8969_v56 = vld [vmem:[%s11391_s1 + $0xa0] sm:$0xff] }
  0xff   : > { %v516_v6 = vadd.f32 %v515_v59, %v8874_v54  ;;  %v8974_v59 = vld [vmem:[%s11396_s6 + $0x128] sm:$0xff] }
 0x100   : > { %v617_v12 = vadd.f32 %v616_v5, %v568_v55  ;;  %v8964_v55 = vld [vmem:[%s11391_s1 + $0x98] sm:$0xff]  ;;  %v8982_v5 = vld [vmem:[%s11396_s6 + $0x130] sm:$0xff] }
 0x101   : > { %v517_v15 = vadd.f32 %v516_v6, %v8893_v3  ;;  %v576_v6 = vmul.f32 %v8932_v31, %v8932_v31 }
 0x102   : > { %938 = vperm.xlu0 %8157, %v8809_v16   ;;  %943 = vperm.xlu1 %8158, %v8814_v17   ;;  %v618_v27 = vadd.f32 %v617_v12, %v569_v4 }
 0x103   : > { %v518_v28 = vadd.f32 %v517_v15, %v8902_v10  ;;  %v8992_v15 = vld [vmem:[%s11391_s1 + $0xa8] sm:$0xff] }
 0x105   : > { %v519_v35 = vadd.f32 %v518_v28, %v8923_v24  ;;  %v577_v28 = vmul.f32 %v8948_v39, %v8948_v39 }
 0x106   : > { %1088 = vperm.xlu0 %8157, %v702_v32   ;;  %1093 = vperm.xlu1 %8158, %v703_v33   ;;  %v572_v32 = vmul.f32 %v8874_v54, %v8874_v54  ;;  %v619_v33 = vadd.f32 %v618_v27, %v570_v11  ;;  %v9002_v27 = vld [vmem:[%s11396_s6 + $0x138] sm:$0xff] }
 0x107   : > { %v520_v42 = vadd.f32 %v519_v35, %v8932_v31  ;;  %v9010_v35 = vld [vmem:[%s11396_s6 + $0x140] sm:$0xff] }
 0x108   : > { %v620_v41 = vadd.f32 %v619_v33, %v571_v26  ;;  %v8997_v26 = vld [vmem:[%s11391_s1 + $0xb0] sm:$0xff] }
 0x109   : > { %v521_v53 = vadd.f32 %v520_v42, %v8948_v39  ;;  %v708_v42 = vld [vmem:[%s11391_s1 + $0x188] sm:$0xff] }
 0x10a   : > { %948 = vperm.xlu0 %8157, %v8856_v44   ;;  %953 = vperm.xlu1 %8158, %v8861_v47   ;;  %v621_v50 = vadd.f32 %v620_v41, %v572_v32  ;;  %v9020_v41 = vld [vmem:[%s11391_s1 + $0xb8] sm:$0xff] }
 0x10b   : > { %v522_v4 = vadd.f32 %v521_v53, %v8956_v43 }
 0x10d   : > { %v523_v12 = vadd.f32 %v522_v4, %v8974_v59  ;;  %v580_v4 = vmul.f32 %v8982_v5, %v8982_v5 }
 0x10e   : > { %1098 = vperm.xlu0 %8157, %v704_v62   ;;  %1103 = vperm.xlu1 %8158, %v705_v2   ;;  %v575_v62 = vmul.f32 %v8923_v24, %v8923_v24  ;;  %v622_v2 = vadd.f32 %v621_v50, %v573_v40  ;;  %v579_v50 = vmul.f32 %v8974_v59, %v8974_v59 }
 0x10f   : > { %v524_v33 = vadd.f32 %v523_v12, %v8982_v5  ;;  %v9045_v12 = vld [vmem:[%s11396_s6 + $0x158] sm:$0xff] }
 0x110   : > { %v623_v11 = vadd.f32 %v622_v2, %v574_v49  ;;  %v9028_v49 = vld [vmem:[%s11396_s6 + $0x148] sm:$0xff]  ;;  %v9036_v2 = vld [vmem:[%s11396_s6 + $0x150] sm:$0xff]  ;;  %11406 = vst [vmem:[#allocation4_spill] sm:$0xff] %v9045_v12 }
 0x111   : > { %v525_v40 = vadd.f32 %v524_v33, %v9002_v27  ;;  %11405 = vst [vmem:[#allocation3_spill] sm:$0xff] %v9036_v2 }
 0x112   : > { %958 = vperm.xlu0 %8157, %v8913_v22   ;;  %963 = vperm.xlu1 %8158, %v8918_v23   ;;  %v624_v32 = vadd.f32 %v623_v11, %v575_v62 }
 0x113   : > { %v526_v62 = vadd.f32 %v525_v40, %v9010_v35 }
 0x115   : > { %v527_v11 = vadd.f32 %v526_v62, %v9028_v49 }
 0x116   : > { %1108 = vperm.xlu0 %8157, %v706_v36   ;;  %1113 = vperm.xlu1 %8158, %v707_v37   ;;  %v578_v36 = vmul.f32 %v8956_v43, %v8956_v43  ;;  %v625_v37 = vadd.f32 %v624_v32, %v576_v6 }
 0x117   : > { %v528_v33 = vadd.f32 %v527_v11, %v9036_v2 }
 0x118   : > { %v626_v53 = vadd.f32 %v625_v37, %v577_v28  ;;  %v581_v28 = vmul.f32 %v9002_v27, %v9002_v27  ;;  %v582_v37 = vmul.f32 %v9010_v35, %v9010_v35 }
 0x11a   : > { %968 = vperm.xlu0 %8157, %v8964_v55   ;;  %973 = vperm.xlu1 %8158, %v8969_v56   ;;  %v627_v6 = vadd.f32 %v626_v53, %v578_v36  ;;  %v9053_v36 = vld [vmem:[%s11396_s6 + $0x160] sm:$0xff]  ;;  %v583_v53 = vmul.f32 %v9028_v49, %v9028_v49 }
 0x11b   : > { %11407 = vst [vmem:[#allocation5_spill] sm:$0xff] %v9053_v36 }
 0x11c   : > { %v628_v32 = vadd.f32 %v627_v6, %v579_v50  ;;  %v9063_v50 = vld [vmem:[%s11396_s6 + $0x168] sm:$0xff] }
 0x11d   : > { %11408 = vst [vmem:[#allocation6_spill] sm:$0xff] %v9063_v50 }
 0x11e   : > { %978 = vperm.xlu0 %8157, %v8992_v15   ;;  %983 = vperm.xlu1 %8158, %v8997_v26   ;;  %v629_v40 = vadd.f32 %v628_v32, %v580_v4  ;;  %v9071_v4 = vld [vmem:[%s11396_s6 + $0x170] sm:$0xff]  ;;  %v585_v32 = vmul.f32 %v9045_v12, %v9045_v12 }
 0x11f   : > { %11409 = vst [vmem:[#allocation7_spill] sm:$0xff] %v9071_v4 }
 0x120   : > { %v630_v62 = vadd.f32 %v629_v40, %v581_v28  ;;  %v9081_v28 = vld [vmem:[%s11396_s6 + $0x178] sm:$0xff] }
 0x121   : > { %11410 = vst [vmem:[#allocation8_spill] sm:$0xff] %v9081_v28 }
 0x122   : > { %988 = vperm.xlu0 %8157, %v9020_v41   ;;  %1118 = vperm.xlu1 %8158, %v708_v42   ;;  %v529_v42 = vadd.f32 %v528_v33, %v9045_v12 }
 0x124   : > { %v530_v6 = vadd.f32 %v529_v42, %v9053_v36 }
 0x126   : > { %6017 = vperm.xlu0 %8157, %v8574_v57   ;;  %6022 = vperm.xlu1 %8158, %v8586_v60   ;;  %v584_v57 = vmul.f32 %v9036_v2, %v9036_v2  ;;  %v631_v60 = vadd.f32 %v630_v62, %v582_v37  ;;  %v531_v11 = vadd.f32 %v530_v6, %v9063_v50  ;;  %v9089_v37 = vld [vmem:[%s11396_s6 + $0x180] sm:$0xff] }
 0x127   : > { %11411 = vst [vmem:[#allocation9_spill] sm:$0xff] %v9089_v37  ;;  %v587_v62 = vmul.f32 %v9063_v50, %v9063_v50 }
 0x128   : > { %v632_v33 = vadd.f32 %v631_v60, %v583_v53  ;;  %v532_v40 = vadd.f32 %v531_v11, %v9071_v4  ;;  %v9099_v53 = vld [vmem:[%s11396_s6 + $0x188] sm:$0xff] }
 0x129   : > { %11412 = vst [vmem:[#allocation10_spill] sm:$0xff] %v9099_v53 }
 0x12a   : > { %6027 = vperm.xlu0 %8157, %v8591_v61   ;;  %6032 = vperm.xlu1 %8158, %v8640_v13   ;;  %v586_v61 = vmul.f32 %v9053_v36, %v9053_v36  ;;  %v633_v13 = vadd.f32 %v632_v33, %v584_v57  ;;  %v533_v42 = vadd.f32 %v532_v40, %v9081_v28 }
 0x12b   : > { %v588_v57 = vmul.f32 %v9071_v4, %v9071_v4 }
 0x12c   : > { %v634_v6 = vadd.f32 %v633_v13, %v585_v32  ;;  %v534_v60 = vadd.f32 %v533_v42, %v9089_v37  ;;  %v590_v32 = vmul.f32 %v9089_v37, %v9089_v37 }
 0x12e   : > { %6037 = vperm.xlu0 %8157, %v8645_v14   ;;  %6042 = vperm.xlu1 %8158, %v8675_v29   ;;  %v635_v11 = vadd.f32 %v634_v6, %v586_v61  ;;  %v535_v14 = vadd.f32 %v534_v60, %v9099_v53  ;;  %v589_v29 = vmul.f32 %v9081_v28, %v9081_v28 }
 0x130   : > { %v636_v33 = vadd.f32 %v635_v11, %v587_v62  ;;  %v536_v40 = vrot.slane %v535_v14, 4 }
 0x132   : > { %6047 = vperm.xlu0 %8157, %v8680_v30   ;;  %6052 = vperm.xlu1 %8158, %v8708_v51   ;;  %v637_v13 = vadd.f32 %v636_v33, %v588_v57  ;;  %v537_v61 = vadd.f32 %v536_v40, %v535_v14  ;;  %v591_v30 = vmul.f32 %v9099_v53, %v9099_v53 }
 0x134   : > { %v638_v51 = vadd.f32 %v637_v13, %v589_v29  ;;  %v538_v42 = vrot.slane %v537_v61, 2 }
 0x136   : > { %6057 = vperm.xlu0 %8157, %v8713_v52   ;;  %6062 = vperm.xlu1 %8158, %v8741_v20   ;;  %v639_v6 = vadd.f32 %v638_v51, %v590_v32  ;;  %v539_v62 = vadd.f32 %v538_v42, %v537_v61 }
 0x138   : > { %v640_v60 = vadd.f32 %v639_v6, %v591_v30  ;;  %v540_v11 = vrot.slane %v539_v62, 1 }
 0x13a   : > { %6067 = vperm.xlu0 %8157, %v8746_v21   ;;  %6072 = vperm.xlu1 %8158, %v8774_v45   ;;  %v641_v57 = vrot.slane %v640_v60, 4  ;;  %v541_v20 = vadd.f32 %v540_v11, %v539_v62 }
 0x13c   : > { %v642_v14 = vadd.f32 %v641_v57, %v640_v60  ;;  %v647_v40 = vmul.f32 0.00390625, %v541_v20 }
 0x13d   : > { %v9119_v37 = vpop.permute.xlu1 %1003  ;;  %v9121_v52 = vpop.permute.xlu0 %993 }
 0x13e   : > { %6077 = vperm.xlu0 %8157, %v8779_v46   ;;  %6082 = vperm.xlu1 %8158, %v8809_v16   ;;  %v643_v29 = vrot.slane %v642_v14, 2  ;;  %v649_v16 = vmul.f32 %v647_v40, %v647_v40 }
 0x140   : > { %v644_v45 = vadd.f32 %v643_v29, %v642_v14  ;;  %v5993_v29 = vld [vmem:[%s11391_s1 + $0xe0] sm:$0xff] }
 0x141   : > { %v9125_v33 = vpop.permute.xlu1 %1008  ;;  %v9127_v21 = vpop.permute.xlu0 %998 }
 0x142   : > { %6087 = vperm.xlu0 %8157, %v8814_v17   ;;  %6092 = vperm.xlu1 %8158, %v8856_v44   ;;  %v645_v32 = vrot.slane %v644_v45, 1 }
 0x144   : > { %v646_v46 = vadd.f32 %v645_v32, %v644_v45  ;;  %v5994_v45 = vld [vmem:[%s11391_s1 + $0xe8] sm:$0xff]  ;;  %v652_v32 = vld [vmem:[%s267_s26] sm:$0x1] }
 0x145   : > { %v9131_v13 = vpop.permute.xlu0 %1013  ;;  %v9133_v61 = vpop.permute.xlu1 %873 }
 0x146   : > { %6097 = vperm.xlu0 %8157, %v8861_v47   ;;  %6102 = vperm.xlu1 %8158, %v8913_v22   ;;  %v648_v30 = vmul.f32 0.00390625, %v646_v46 }
 0x148   : > { %v650_v17 = vsub.f32 %v648_v30, %v649_v16 }
 0x149   : > { %v9137_v51 = vpop.permute.xlu0 %1018  ;;  %v9139_v42 = vpop.permute.xlu1 %1023 }
 0x14a   : > { %6107 = vperm.xlu0 %8157, %v8918_v23   ;;  %6112 = vperm.xlu1 %8158, %v8964_v55   ;;  %v651_v44 = vmax.f32 %v650_v17, 0.0  ;;  %v5989_v23 = vld [vmem:[%s11391_s1 + $0xc0] sm:$0xff]  ;;  %v5990_v55 = vld [vmem:[%s11391_s1 + $0xc8] sm:$0xff] }
 0x14c   : > { %v653_v47 = vadd.f32 1e-05, %v651_v44 }
 0x14d   : > { %v9143_v6 = vpop.permute.xlu0 %878  ;;  %v9145_v62 = vpop.permute.xlu1 %883 }
 0x14e   : > { %6117 = vperm.xlu0 %8157, %v8969_v56   ;;  %6122 = vperm.xlu1 %8158, %v8992_v15   ;;  %8159 = vrsqrt.f32 %v653_v47  ;;  %v710_v56 = vlaneseq  ;;  %v5995_v47 = vld [vmem:[%s11391_s1 + $0xf0] sm:$0xff] }
 0x150   : > { %v711_v57 = vshrl.u32 %v710_v56, 7 }
 0x151   : > { %v9149_v22 = vpop.permute.xlu0 %1028  ;;  %v9151_v60 = vpop.permute.xlu1 %1033 }
 0x152   : > { %6127 = vperm.xlu0 %8157, %v8997_v26   ;;  %6132 = vperm.xlu1 %8158, %v9020_v41   ;;  %v5991_v26 = vld [vmem:[%s11391_s1 + $0xd0] sm:$0xff]  ;;  %v5992_v41 = vld [vmem:[%s11391_s1 + $0xd8] sm:$0xff]  ;;  %v712_v46 = vsub.s32 0, %v711_v57 }
 0x155   : > { %v9161_v15 = vpop.permute.xlu0 %888  ;;  %v9163_v11 = vpop.permute.xlu1 %893 }
 0x156   : > { %6137 = vperm.xlu0 %8157, %v5989_v23   ;;  %6142 = vperm.xlu1 %8158, %v5990_v55   ;;  %v5996_v23 = vld [vmem:[%s11391_s1 + $0xf8] sm:$0xff]  ;;  %v656_v55 = vld [vmem:[%s270_s29] sm:$0x1] }
 0x159   : > { %v9171_v20 = vpop.permute.xlu0 %1038  ;;  %v9173_v14 = vpop.permute.xlu1 %1043 }
 0x15a   : > { %6147 = vperm.xlu0 %8157, %v5991_v26   ;;  %6152 = vperm.xlu1 %8158, %v5992_v41  }
 0x15b   : > { %v8160_v17 = vpop.eup %8159 }
 0x15c   : > { %v655_v44 = vmul.f32 %v8160_v17, %v652_v32 }
 0x15d   : > { %v9186_v16 = vpop.permute.xlu0 %898  ;;  %v9188_v30 = vpop.permute.xlu1 %903 }
 0x15e   : > { %6157 = vperm.xlu0 %8157, %v5993_v29   ;;  %6162 = vperm.xlu1 %8158, %v5994_v45   ;;  %v657_v56 = vmul.f32 %v655_v44, %v647_v40  ;;  %v9201_v26 = vrot.slane %v655_v44, %v712_v46  ;;  %v5997_v40 = vld [vmem:[%s11391_s1 + $0x100] sm:$0xff] }
 0x160   : > { %v658_v29 = vsub.f32 %v656_v55, %v657_v56  ;;  %v741_v45 = vmul.f32 %v9201_v26, %v8826_v25  ;;  %v739_v32 = vmul.f32 %v9201_v26, %v8803_v8  ;;  %v742_v17 = vmul.f32 %v9201_v26, %v8841_v34  ;;  %v5998_v8 = vld [vmem:[%s11391_s1 + $0x108] sm:$0xff] }
 0x161   : > { %v9203_v41 = vpop.permute.xlu0 %1048  ;;  %v9205_v57 = vpop.permute.xlu1 %1053  ;;  %v740_v44 = vmul.f32 %v9201_v26, %v8819_v18  ;;  %v744_v25 = vmul.f32 %v9201_v26, %v8866_v48  ;;  %v745_v55 = vmul.f32 %v9201_v26, %v8874_v54  ;;  %v716_v18 = vmul.f32 %v9201_v26, %v8602_v0 }
 0x162   : > { %6167 = vperm.xlu0 %8157, %v5995_v47   ;;  %6172 = vperm.xlu1 %8158, %v5996_v23   ;;  %v743_v47 = vmul.f32 %v9201_v26, %v8847_v38  ;;  %v715_v23 = vmul.f32 %v9201_v26, %v8597_v63  ;;  %v9227_v34 = vrot.slane %v658_v29, %v712_v46 }
 0x163   : > { %v717_v38 = vmul.f32 %v9201_v26, %v8607_v1  ;;  %v746_v48 = vmul.f32 %v9201_v26, %v8893_v3  ;;  %v747_v46 = vmul.f32 %v9201_v26, %v8902_v10  ;;  %v718_v29 = vmul.f32 %v9201_v26, %v8626_v7  ;;  %v5999_v3 = vld [vmem:[%s11391_s1 + $0x110] sm:$0xff] }
 0x164   : > { %v719_v54 = vmul.f32 %v9201_v26, %v8632_v9  ;;  %v797_v0 = vadd.f32 %v9227_v34, %v741_v45  ;;  %v795_v1 = vadd.f32 %v9227_v34, %v739_v32  ;;  %v798_v53 = vadd.f32 %v9227_v34, %v742_v17  ;;  %v6000_v45 = vld [vmem:[%s11391_s1 + $0x118] sm:$0xff] }
 0x165   : > { %v9235_v56 = vpop.permute.xlu0 %908  ;;  %v9237_v63 = vpop.permute.xlu1 %913  ;;  %v796_v28 = vadd.f32 %v9227_v34, %v740_v44  ;;  %v799_v10 = vadd.f32 %v9227_v34, %v743_v47  ;;  %v771_v7 = vadd.f32 %v9227_v34, %v715_v23  ;;  %v800_v9 = vadd.f32 %v9227_v34, %v744_v25 }
 0x166   : > { %6177 = vperm.xlu0 %8157, %v5997_v40   ;;  %6182 = vperm.xlu1 %8158, %v5998_v8   ;;  %v801_v40 = vadd.f32 %v9227_v34, %v745_v55  ;;  %v847_v32 = vmax.f32 %v797_v0, 0.0  ;;  %v845_v17 = vmax.f32 %v795_v1, 0.0  ;;  %v848_v44 = vmax.f32 %v798_v53, 0.0 }
 0x167   : > { %v846_v8 = vmax.f32 %v796_v28, 0.0  ;;  %v849_v36 = vmax.f32 %v799_v10, 0.0  ;;  %v821_v47 = vmax.f32 %v771_v7, 0.0  ;;  %v850_v12 = vmax.f32 %v800_v9, 0.0  ;;  %v6001_v28 = vld [vmem:[%s11391_s1 + $0x120] sm:$0xff]  ;;  %v6003_v7 = vld [vmem:[%s11391_s1 + $0x130] sm:$0xff] }
 0x168   : > { %v851_v23 = vmax.f32 %v801_v40, 0.0  ;;  %v1147_v25 = vmul.f32 %v9119_v37, %v847_v32  ;;  %v1145_v55 = vmul.f32 %v9121_v52, %v845_v17  ;;  %v1148_v2 = vmul.f32 %v9125_v33, %v848_v44  ;;  %v6002_v37 = vld [vmem:[%s11391_s1 + $0x128] sm:$0xff] }
 0x169   : > { %v9261_v4 = vpop.permute.xlu0 %1058  ;;  %v9263_v50 = vpop.permute.xlu1 %1063  ;;  %v1146_v0 = vmul.f32 %v9127_v21, %v846_v8  ;;  %v1149_v53 = vmul.f32 %v9131_v13, %v849_v36  ;;  %v1121_v1 = vmul.f32 %v9133_v61, %v821_v47  ;;  %v1150_v10 = vmul.f32 %v9137_v51, %v850_v12 }
 0x16a   : > { %6187 = vperm.xlu0 %8157, %v5999_v3   ;;  %6192 = vperm.xlu1 %8158, %v6000_v45   ;;  %v1151_v3 = vmul.f32 %v9139_v42, %v851_v23  ;;  %1197 = vst [vmem:[#allocation2 + $0xe0] sm:$0xff] %v1147_v25  ;;  %1195 = vst [vmem:[#allocation2 + $0xd0] sm:$0xff] %v1145_v55  ;;  %v772_v52 = vadd.f32 %v9227_v34, %v716_v18 }
 0x16b   : > { %1198 = vst [vmem:[#allocation2 + $0xe8] sm:$0xff] %v1148_v2  ;;  %1196 = vst [vmem:[#allocation2 + $0xd8] sm:$0xff] %v1146_v0  ;;  %v773_v33 = vadd.f32 %v9227_v34, %v717_v38  ;;  %v802_v36 = vadd.f32 %v9227_v34, %v746_v48  ;;  %v803_v21 = vadd.f32 %v9227_v34, %v747_v46 }
 0x16c   : > { %1199 = vst [vmem:[#allocation2 + $0xf0] sm:$0xff] %v1149_v53  ;;  %1171 = vst [vmem:[#allocation2 + $0x10] sm:$0xff] %v1121_v1  ;;  %v774_v61 = vadd.f32 %v9227_v34, %v718_v29  ;;  %v775_v2 = vadd.f32 %v9227_v34, %v719_v54  ;;  %v748_v51 = vmul.f32 %v9201_v26, %v8923_v24  ;;  %v822_v18 = vmax.f32 %v772_v52, 0.0  ;;  %v6004_v24 = vld [vmem:[%s11391_s1 + $0x138] sm:$0xff] }
 0x16d   : > { %v9283_v13 = vpop.permute.xlu0 %918  ;;  %v9285_v12 = vpop.permute.xlu1 %923  ;;  %1200 = vst [vmem:[#allocation2 + $0xf8] sm:$0xff] %v1150_v10  ;;  %1201 = vst [vmem:[#allocation2 + $0x100] sm:$0xff] %v1151_v3  ;;  %v749_v42 = vmul.f32 %v9201_v26, %v8932_v31  ;;  %v823_v38 = vmax.f32 %v773_v33, 0.0  ;;  %v852_v48 = vmax.f32 %v802_v36, 0.0  ;;  %v853_v46 = vmax.f32 %v803_v21, 0.0  ;;  %v8163_v10 = vld [vmem:[%s11396_s6 + $0x38] sm:$0xff] }
 0x16e   : > { %6197 = vperm.xlu0 %8157, %v6001_v28   ;;  %6202 = vperm.xlu1 %8158, %v6002_v37   ;;  %v824_v9 = vmax.f32 %v774_v61, 0.0  ;;  %v825_v29 = vmax.f32 %v775_v2, 0.0  ;;  %v804_v54 = vadd.f32 %v9227_v34, %v748_v51  ;;  %v1122_v31 = vmul.f32 %v9143_v6, %v822_v18  ;;  %v8161_v6 = vld [vmem:[%s11396_s6 + $0x28] sm:$0xff]  ;;  %v6441_v61 = vld [vmem:[%s8254_s12 + $0xf0] sm:$0xff]  ;;  %v6005_v2 = vld [vmem:[%s11391_s1 + $0x140] sm:$0xff] }
 0x16f   : > { %v805_v40 = vadd.f32 %v9227_v34, %v749_v42  ;;  %v1123_v45 = vmul.f32 %v9145_v62, %v823_v38  ;;  %v1152_v32 = vmul.f32 %v9149_v22, %v852_v48  ;;  %v1153_v17 = vmul.f32 %v9151_v60, %v853_v46  ;;  %v8162_v22 = vld [vmem:[%s11396_s6 + $0x30] sm:$0xff]  ;;  %v6006_v48 = vld [vmem:[%s11391_s1 + $0x148] sm:$0xff] }
 0x170   : > { %v1124_v47 = vmul.f32 %v9161_v15, %v824_v9  ;;  %v1125_v23 = vmul.f32 %v9163_v11, %v825_v29  ;;  %v854_v25 = vmax.f32 %v804_v54, 0.0  ;;  %1172 = vst [vmem:[#allocation2 + $0x18] sm:$0xff] %v1122_v31  ;;  %v720_v62 = vmul.f32 %v8161_v6, %v9201_v26 }
 0x171   : > { %v9305_v44 = vpop.permute.xlu0 %1068  ;;  %v9307_v8 = vpop.permute.xlu1 %1073  ;;  %v855_v55 = vmax.f32 %v805_v40, 0.0  ;;  %1173 = vst [vmem:[#allocation2 + $0x20] sm:$0xff] %v1123_v45  ;;  %1202 = vst [vmem:[#allocation2 + $0x108] sm:$0xff] %v1152_v32  ;;  %v721_v60 = vmul.f32 %v8162_v22, %v9201_v26  ;;  %v750_v15 = vmul.f32 %v9201_v26, %v8948_v39  ;;  %v751_v11 = vmul.f32 %v9201_v26, %v8956_v43  ;;  %v8164_v39 = vld [vmem:[%s11396_s6 + $0x40] sm:$0xff]  ;;  %v6440_v22 = vld [vmem:[%s8254_s12 + $0xe8] sm:$0xff] }
 0x172   : > { %6207 = vperm.xlu0 %8157, %v6003_v7   ;;  %1203 = vst [vmem:[#allocation2 + $0x110] sm:$0xff] %v1153_v17  ;;  %6212 = vperm.xlu1 %8158, %v6004_v24   ;;  %1174 = vst [vmem:[#allocation2 + $0x28] sm:$0xff] %v1124_v47  ;;  %v1154_v0 = vmul.f32 %v9171_v20, %v854_v25  ;;  %v1247_v53 = vld [vmem:[#allocation2 + $0xd5] sm:$0xff]  ;;  %v1248_v1 = vld [vmem:[#allocation2 + $0xdd] sm:$0xff]  ;;  %v722_v3 = vmul.f32 %v8163_v10, %v9201_v26 }
 0x173   : > { %1175 = vst [vmem:[#allocation2 + $0x30] sm:$0xff] %v1125_v23  ;;  %v1155_v28 = vmul.f32 %v9173_v14, %v855_v55  ;;  %v723_v43 = vmul.f32 %v8164_v39, %v9201_v26  ;;  %v776_v37 = vadd.f32 %v9227_v34, %v720_v62  ;;  %v777_v20 = vadd.f32 %v9227_v34, %v721_v60  ;;  %v1222_v52 = vld [vmem:[#allocation2 + $0xd] sm:$0xff]  ;;  %v1249_v51 = vld [vmem:[#allocation2 + $0xe5] sm:$0xff] }
 0x174   : > { %7222 = vmatprep.mubr.f32.mxu1 %v1247_v53  ;;  %v806_v14 = vadd.f32 %v9227_v34, %v750_v15  ;;  %v807_v33 = vadd.f32 %v9227_v34, %v751_v11  ;;  %1204 = vst [vmem:[#allocation2 + $0x118] sm:$0xff] %v1154_v0  ;;  %7184 = vmatmul.mubr.f32.vlgmr.msra.gmra.mxu0 %v1222_v52  ;;  %v1250_v47 = vld [vmem:[#allocation2 + $0xed] sm:$0xff]  ;;  %v1251_v55 = vld [vmem:[#allocation2 + $0xf5] sm:$0xff] }
 0x175   : > { %v9337_v36 = vpop.permute.xlu0 %928  ;;  %v9339_v21 = vpop.permute.xlu1 %933  ;;  %1205 = vst [vmem:[#allocation2 + $0x120] sm:$0xff] %v1155_v28  ;;  %7223 = vmatmul.mubr.f32.vlgmr.msra.gmra.mxu1 %v1248_v1  ;;  %v778_v42 = vadd.f32 %v9227_v34, %v722_v3  ;;  %v779_v18 = vadd.f32 %v9227_v34, %v723_v43  ;;  %v752_v38 = vmul.f32 %v9201_v26, %v8974_v59  ;;  %v826_v46 = vmax.f32 %v776_v37, 0.0  ;;  %v8167_v28 = vld [vmem:[%s11396_s6 + $0x58] sm:$0xff]  ;;  %v6007_v39 = vld [vmem:[%s11391_s1 + $0x150] sm:$0xff] }
 0x176   : > { %v827_v7 = vmax.f32 %v777_v20, 0.0  ;;  %7225 = vmatprep.mubr.f32.mxu1 %v1249_v51  ;;  %v856_v9 = vmax.f32 %v806_v14, 0.0  ;;  %v857_v29 = vmax.f32 %v807_v33, 0.0  ;;  %7259 = vmatpush3.msra.mxu1 %v8879_v58  ;;  %v753_v31 = vmul.f32 %v9201_v26, %v8982_v5 }
 0x177   : > { %v828_v54 = vmax.f32 %v778_v42, 0.0  ;;  %v829_v40 = vmax.f32 %v779_v18, 0.0  ;;  %v808_v24 = vadd.f32 %v9227_v34, %v752_v38  ;;  %7260 = vmatprep.subr.mxu1 %v6441_v61  ;;  %6217 = vperm.xlu0 %8157, %v6005_v2   ;;  %v1126_v59 = vmul.f32 %v9186_v16, %v826_v46  ;;  %v1223_v25 = vld [vmem:[#allocation2 + $0x15] sm:$0xff]  ;;  %v6439_v2 = vld [vmem:[%s8254_s12 + $0xe0] sm:$0xff] }
 0x178   : > { %v1127_v45 = vmul.f32 %v9188_v30, %v827_v7  ;;  %v1156_v32 = vmul.f32 %v9203_v41, %v856_v9  ;;  %v1157_v17 = vmul.f32 %v9205_v57, %v857_v29  ;;  %6222 = vperm.xlu1 %8158, %v6006_v48   ;;  %v809_v30 = vadd.f32 %v9227_v34, %v753_v31  ;;  %v1224_v41 = vld [vmem:[#allocation2 + $0x1d] sm:$0xff]  ;;  %v8165_v57 = vld [vmem:[%s11396_s6 + $0x48] sm:$0xff]  ;;  %v11413_v9 = vld [vmem:[#allocation3_spill] sm:$0xff] }
 0x179   : > { %v9360_v58 = vpop.permute.xlu0 %1078  ;;  %v9362_v23 = vpop.permute.xlu1 %1083  ;;  %7226 = vmatmul.mubr.f32.gmra.mxu1 %v1250_v47  ;;  %v1128_v5 = vmul.f32 %v9235_v56, %v828_v54  ;;  %v1129_v6 = vmul.f32 %v9237_v63, %v829_v40  ;;  %v858_v16 = vmax.f32 %v808_v24, 0.0  ;;  %7366 = vmatpush3.msra.mxu0 %v8908_v19  ;;  %1176 = vst [vmem:[#allocation2 + $0x38] sm:$0xff] %v1126_v59  ;;  %v8166_v63 = vld [vmem:[%s11396_s6 + $0x50] sm:$0xff]  ;;  %v1225_v60 = vld [vmem:[#allocation2 + $0x25] sm:$0xff] }
 0x17a   : > { %1177 = vst [vmem:[#allocation2 + $0x40] sm:$0xff] %v1127_v45  ;;  %7186 = vmatprep.mubr.f32.mxu0 %v1223_v25  ;;  %1206 = vst [vmem:[#allocation2 + $0x128] sm:$0xff] %v1156_v32  ;;  %7228 = vmatprep.mubr.f32.mxu1 %v1251_v55  ;;  %v724_v56 = vmul.f32 %v8165_v57, %v9201_v26  ;;  %v725_v62 = vmul.f32 %v8166_v63, %v9201_v26  ;;  %v859_v11 = vmax.f32 %v809_v30, 0.0  ;;  %v1253_v20 = vld [vmem:[#allocation2 + $0x105] sm:$0xff]  ;;  %v1226_v51 = vld [vmem:[#allocation2 + $0x2d] sm:$0xff] }
 0x17b   : > { %1207 = vst [vmem:[#allocation2 + $0x130] sm:$0xff] %v1157_v17  ;;  %v754_v19 = vmul.f32 %v9201_v26, %v9002_v27  ;;  %7187 = vmatmul.mubr.f32.gmra.mxu0 %v1224_v41  ;;  %1178 = vst [vmem:[#allocation2 + $0x48] sm:$0xff] %v1128_v5  ;;  %v1158_v15 = vmul.f32 %v9261_v4, %v858_v16  ;;  %v755_v0 = vmul.f32 %v9201_v26, %v9010_v35  ;;  %v1252_v27 = vld [vmem:[#allocation2 + $0xfd] sm:$0xff]  ;;  %v1254_v54 = vld [vmem:[#allocation2 + $0x10d] sm:$0xff] }
 0x17c   : > { %1179 = vst [vmem:[#allocation2 + $0x50] sm:$0xff] %v1129_v6  ;;  %v726_v53 = vmul.f32 %v8167_v28, %v9201_v26  ;;  %7261 = vmatpush3.msra.mxu1 %v6441_v61  ;;  %7189 = vmatprep.mubr.f32.mxu0 %v1225_v60  ;;  %v780_v1 = vadd.f32 %v9227_v34, %v724_v56  ;;  %v8168_v35 = vld [vmem:[%s11396_s6 + $0x60] sm:$0xff]  ;;  %v6008_v61 = vld [vmem:[%s11391_s1 + $0x158] sm:$0xff]  ;;  %v6457_v45 = vld [vmem:[%s8254_s12 + $0x170] sm:$0xff] }
 0x17d   : > { %v781_v10 = vadd.f32 %v9227_v34, %v725_v62  ;;  %v810_v4 = vadd.f32 %v9227_v34, %v754_v19  ;;  %v727_v3 = vmul.f32 %v8168_v35, %v9201_v26  ;;  %v9396_v43 = vpop.permute.xlu0 %938  ;;  %v9398_v37 = vpop.permute.xlu1 %943  ;;  %7229 = vmatmul.mubr.f32.gmra.mxu1 %v1252_v27  ;;  %1208 = vst [vmem:[#allocation2 + $0x138] sm:$0xff] %v1158_v15  ;;  %v1255_v25 = vld [vmem:[#allocation2 + $0x115] sm:$0xff]  ;;  %v8169_v16 = vld [vmem:[%s11396_s6 + $0x68] sm:$0xff]  ;;  %v11415_v62 = vld [vmem:[#allocation5_spill] sm:$0xff] }
 0x17e   : > { %v1159_v52 = vmul.f32 %v9263_v50, %v859_v11  ;;  %v811_v14 = vadd.f32 %v9227_v34, %v755_v0  ;;  %v782_v33 = vadd.f32 %v9227_v34, %v726_v53  ;;  %7262 = vmatprep.subr.mxu1 %v6440_v22  ;;  %7231 = vmatprep.mubr.f32.mxu1 %v1253_v20  ;;  %v830_v42 = vmax.f32 %v780_v1, 0.0  ;;  %v11414_v56 = vld [vmem:[#allocation4_spill] sm:$0xff]  ;;  %v6010_v0 = vld [vmem:[%s11391_s1 + $0x168] sm:$0xff] }
 0x17f   : > { %v831_v18 = vmax.f32 %v781_v10, 0.0  ;;  %v860_v38 = vmax.f32 %v810_v4, 0.0  ;;  %v783_v48 = vadd.f32 %v9227_v34, %v727_v3  ;;  %7263 = vmatpush3.msra.mxu1 %v6440_v22  ;;  %7190 = vmatmul.mubr.f32.gmra.mxu0 %v1226_v51  ;;  %v756_v7 = vmul.f32 %v9201_v26, %v9028_v49  ;;  %v1256_v22 = vld [vmem:[#allocation2 + $0x11d] sm:$0xff] }
 0x180   : > { %1209 = vst [vmem:[#allocation2 + $0x140] sm:$0xff] %v1159_v52  ;;  %v861_v50 = vmax.f32 %v811_v14, 0.0  ;;  %v832_v46 = vmax.f32 %v782_v33, 0.0  ;;  %v757_v29 = vmul.f32 %v9201_v26, %v11413_v9  ;;  %6227 = vperm.xlu0 %8157, %v6007_v39   ;;  %v1130_v40 = vmul.f32 %v9283_v13, %v830_v42  ;;  %6232 = vperm.xlu1 %8158, %v6008_v61   ;;  %v1227_v49 = vld [vmem:[#allocation2 + $0x35] sm:$0xff]  ;;  %v6456_v39 = vld [vmem:[%s8254_s12 + $0x168] sm:$0xff] }
 0x181   : > { %v1131_v24 = vmul.f32 %v9285_v12, %v831_v18  ;;  %v1160_v31 = vmul.f32 %v9305_v44, %v860_v38  ;;  %v833_v59 = vmax.f32 %v783_v48, 0.0  ;;  %7264 = vmatprep.subr.mxu1 %v6439_v2  ;;  %v9416_v32 = vpop.permute.xlu0 %1088  ;;  %v9418_v17 = vpop.permute.xlu1 %1093  ;;  %v1228_v47 = vld [vmem:[#allocation2 + $0x3d] sm:$0xff]  ;;  %7232 = vmatmul.mubr.f32.gmra.mxu1 %v1254_v54  ;;  %v812_v12 = vadd.f32 %v9227_v34, %v756_v7  ;;  %v1257_v10 = vld [vmem:[#allocation2 + $0x125] sm:$0xff]  ;;  %v11417_v38 = vld [vmem:[#allocation7_spill] sm:$0xff] }
 0x182   : > { %v1161_v55 = vmul.f32 %v9307_v8, %v861_v50  ;;  %v1132_v13 = vmul.f32 %v9337_v36, %v832_v46  ;;  %v813_v44 = vadd.f32 %v9227_v34, %v757_v29  ;;  %7192 = vmatprep.mubr.f32.mxu0 %v1227_v49  ;;  %7234 = vmatprep.mubr.f32.mxu1 %v1255_v25  ;;  %v1229_v5 = vld [vmem:[#allocation2 + $0x45] sm:$0xff]  ;;  %v8170_v36 = vld [vmem:[%s11396_s6 + $0x70] sm:$0xff]  ;;  %v8171_v53 = vld [vmem:[%s11396_s6 + $0x78] sm:$0xff] }
 0x183   : > { %1180 = vst [vmem:[#allocation2 + $0x58] sm:$0xff] %v1130_v40  ;;  %1181 = vst [vmem:[#allocation2 + $0x60] sm:$0xff] %v1131_v24  ;;  %v1133_v6 = vmul.f32 %v9339_v21, %v833_v59  ;;  %v728_v8 = vmul.f32 %v8169_v16, %v9201_v26  ;;  %v729_v30 = vmul.f32 %v8170_v36, %v9201_v26  ;;  %7193 = vmatmul.mubr.f32.gmra.mxu0 %v1228_v47  ;;  %v6009_v21 = vld [vmem:[%s11391_s1 + $0x160] sm:$0xff]  ;;  %v1230_v60 = vld [vmem:[#allocation2 + $0x4d] sm:$0xff] }
 0x184   : > { %1210 = vst [vmem:[#allocation2 + $0x148] sm:$0xff] %v1160_v31  ;;  %1211 = vst [vmem:[#allocation2 + $0x150] sm:$0xff] %v1161_v55  ;;  %v862_v41 = vmax.f32 %v812_v12, 0.0  ;;  %v863_v57 = vmax.f32 %v813_v44, 0.0  ;;  %7265 = vmatpush3.msra.mxu1 %v6439_v2  ;;  %v758_v63 = vmul.f32 %v9201_v26, %v11414_v56  ;;  %v759_v19 = vmul.f32 %v9201_v26, %v11415_v62  ;;  %v6438_v3 = vld [vmem:[%s8254_s12 + $0xd8] sm:$0xff]  ;;  %v11416_v42 = vld [vmem:[#allocation6_spill] sm:$0xff] }
 0x185   : > { %1182 = vst [vmem:[#allocation2 + $0x68] sm:$0xff] %v1132_v13  ;;  %7195 = vmatprep.mubr.f32.mxu0 %v1229_v5  ;;  %1183 = vst [vmem:[#allocation2 + $0x70] sm:$0xff] %v1133_v6  ;;  %7367 = vmatprep.subr.mxu0 %v6457_v45  ;;  %v784_v15 = vadd.f32 %v9227_v34, %v728_v8  ;;  %v785_v11 = vadd.f32 %v9227_v34, %v729_v30  ;;  %v949_v28 = vpop.permute.xlu0 %948  ;;  %v9449_v1 = vpop.permute.xlu1 %953  ;;  %v1259_v2 = vld [vmem:[#allocation2 + $0x135] sm:$0xff]  ;;  %v1258_v50 = vld [vmem:[#allocation2 + $0x12d] sm:$0xff] }
 0x186   : > { %v730_v27 = vmul.f32 %v8171_v53, %v9201_v26  ;;  %7235 = vmatmul.mubr.f32.gmra.mxu1 %v1256_v22  ;;  %v1162_v4 = vmul.f32 %v9360_v58, %v862_v41  ;;  %v1163_v35 = vmul.f32 %v9362_v23, %v863_v57  ;;  %7368 = vmatpush3.msra.mxu0 %v6457_v45  ;;  %v8172_v23 = vld [vmem:[%s11396_s6 + $0x80] sm:$0xff]  ;;  %v6437_v45 = vld [vmem:[%s8254_s12 + $0xd0] sm:$0xff]  ;;  %v6012_v12 = vld [vmem:[%s11391_s1 + $0x178] sm:$0xff] }
 0x187   : > { %v814_v20 = vadd.f32 %v9227_v34, %v758_v63  ;;  %7237 = vmatprep.mubr.f32.mxu1 %v1257_v10  ;;  %v834_v52 = vmax.f32 %v784_v15, 0.0  ;;  %v835_v14 = vmax.f32 %v785_v11, 0.0  ;;  %6237 = vperm.xlu0 %8157, %v6009_v21   ;;  %v815_v33 = vadd.f32 %v9227_v34, %v759_v19  ;;  %v6011_v25 = vld [vmem:[%s11391_s1 + $0x170] sm:$0xff]  ;;  %v1260_v36 = vld [vmem:[#allocation2 + $0x13d] sm:$0xff]  ;;  %v6436_v11 = vld [vmem:[%s8254_s12 + $0xc8] sm:$0xff] }
 0x188   : > { %v786_v61 = vadd.f32 %v9227_v34, %v730_v27  ;;  %7196 = vmatmul.mubr.f32.gmra.mxu0 %v1230_v60  ;;  %1212 = vst [vmem:[#allocation2 + $0x158] sm:$0xff] %v1162_v4  ;;  %1213 = vst [vmem:[#allocation2 + $0x160] sm:$0xff] %v1163_v35  ;;  %6242 = vperm.xlu1 %8158, %v6010_v0   ;;  %v731_v51 = vmul.f32 %v8172_v23, %v9201_v26  ;;  %v8174_v16 = vld [vmem:[%s11396_s6 + $0x90] sm:$0xff]  ;;  %v11418_v56 = vld [vmem:[#allocation8_spill] sm:$0xff] }
 0x189   : > { %v864_v58 = vmax.f32 %v814_v20, 0.0  ;;  %v760_v18 = vmul.f32 %v9201_v26, %v11416_v42  ;;  %v761_v48 = vmul.f32 %v9201_v26, %v11417_v38  ;;  %v1134_v46 = vmul.f32 %v9396_v43, %v834_v52  ;;  %7266 = vmatprep.subr.mxu1 %v6438_v3  ;;  %7369 = vmatprep.subr.mxu0 %v6456_v39  ;;  %v1099_v54 = vpop.permute.xlu0 %1098  ;;  %v1104_v40 = vpop.permute.xlu1 %1103  ;;  %v11419_v62 = vld [vmem:[#allocation9_spill] sm:$0xff]  ;;  %v8175_v22 = vld [vmem:[%s11396_s6 + $0x98] sm:$0xff]  ;;  %v8177_v42 = vld [vmem:[%s11396_s6 + $0xa8] sm:$0xff] }
 0x18a   : > { %v1135_v7 = vmul.f32 %v9398_v37, %v835_v14  ;;  %v865_v9 = vmax.f32 %v815_v33, 0.0  ;;  %v836_v29 = vmax.f32 %v786_v61, 0.0  ;;  %7238 = vmatmul.mubr.f32.gmra.mxu1 %v1258_v50  ;;  %v1231_v24 = vld [vmem:[#allocation2 + $0x55] sm:$0xff]  ;;  %v1232_v31 = vld [vmem:[#allocation2 + $0x5d] sm:$0xff]  ;;  %7370 = vmatpush3.msra.mxu0 %v6456_v39  ;;  %v787_v49 = vadd.f32 %v9227_v34, %v731_v51  ;;  %v6014_v50 = vld [vmem:[%s11391_s1 + $0x188] sm:$0xff] }
 0x18b   : > { %v1164_v59 = vmul.f32 %v9416_v32, %v864_v58  ;;  %v816_v47 = vadd.f32 %v9227_v34, %v760_v18  ;;  %7240 = vmatprep.mubr.f32.mxu1 %v1259_v2  ;;  %7198 = vmatprep.mubr.f32.mxu0 %v1231_v24  ;;  %1184 = vst [vmem:[#allocation2 + $0x78] sm:$0xff] %v1134_v46  ;;  %v1261_v32 = vld [vmem:[#allocation2 + $0x145] sm:$0xff]  ;;  %v1262_v27 = vld [vmem:[#allocation2 + $0x14d] sm:$0xff]  ;;  %v6454_v33 = vld [vmem:[%s8254_s12 + $0x158] sm:$0xff] }
 0x18c   : > { %1185 = vst [vmem:[#allocation2 + $0x80] sm:$0xff] %v1135_v7  ;;  %v1233_v43 = vld [vmem:[#allocation2 + $0x65] sm:$0xff]  ;;  %v1165_v37 = vmul.f32 %v9418_v17, %v865_v9  ;;  %v1136_v55 = vmul.f32 %v949_v28, %v836_v29  ;;  %v817_v13 = vadd.f32 %v9227_v34, %v761_v48  ;;  %7199 = vmatmul.mubr.f32.gmra.mxu0 %v1232_v31  ;;  %v837_v44 = vmax.f32 %v787_v49, 0.0  ;;  %v1234_v30 = vld [vmem:[#allocation2 + $0x6d] sm:$0xff] }
 0x18d   : > { %7267 = vmatpush3.msra.mxu1 %v6438_v3  ;;  %1214 = vst [vmem:[#allocation2 + $0x168] sm:$0xff] %v1164_v59  ;;  %v866_v5 = vmax.f32 %v816_v47, 0.0  ;;  %v8173_v17 = vld [vmem:[%s11396_s6 + $0x88] sm:$0xff]  ;;  %v733_v8 = vmul.f32 %v8174_v16, %v9201_v26  ;;  %7201 = vmatprep.mubr.f32.mxu0 %v1233_v43  ;;  %v959_v57 = vpop.permute.xlu0 %958  ;;  %v964_v21 = vpop.permute.xlu1 %963  ;;  %v762_v63 = vmul.f32 %v9201_v26, %v11418_v56  ;;  %v6455_v15 = vld [vmem:[%s8254_s12 + $0x160] sm:$0xff]  ;;  %v8178_v38 = vld [vmem:[%s11396_s6 + $0xb0] sm:$0xff] }
 0x18e   : > { %v732_v6 = vmul.f32 %v8173_v17, %v9201_v26  ;;  %1215 = vst [vmem:[#allocation2 + $0x170] sm:$0xff] %v1165_v37  ;;  %7268 = vmatprep.subr.mxu1 %v6437_v45  ;;  %1186 = vst [vmem:[#allocation2 + $0x88] sm:$0xff] %v1136_v55  ;;  %v867_v41 = vmax.f32 %v817_v13, 0.0  ;;  %v763_v19 = vmul.f32 %v9201_v26, %v11419_v62  ;;  %7241 = vmatmul.mubr.f32.gmra.mxu1 %v1260_v36  ;;  %v8176_v52 = vld [vmem:[%s11396_s6 + $0xa0] sm:$0xff]  ;;  %v8179_v37 = vld [vmem:[%s11396_s6 + $0xb8] sm:$0xff] }
 0x18f   : > { %v734_v60 = vmul.f32 %v8175_v22, %v9201_v26  ;;  %6247 = vperm.xlu0 %8157, %v6011_v25   ;;  %v1137_v0 = vmul.f32 %v9449_v1, %v837_v44  ;;  %v1166_v28 = vmul.f32 %v1099_v54, %v866_v5  ;;  %7243 = vmatprep.mubr.f32.mxu1 %v1261_v32  ;;  %v1263_v3 = vld [vmem:[#allocation2 + $0x155] sm:$0xff]  ;;  %v6013_v61 = vld [vmem:[%s11391_s1 + $0x180] sm:$0xff]  ;;  %v11420_v5 = vld [vmem:[#allocation10_spill] sm:$0xff] }
 0x190   : > { %v788_v53 = vadd.f32 %v9227_v34, %v732_v6  ;;  %6252 = vperm.xlu1 %8158, %v6012_v12   ;;  %v1167_v10 = vmul.f32 %v1104_v40, %v867_v41  ;;  %v789_v4 = vadd.f32 %v9227_v34, %v733_v8  ;;  %v818_v35 = vadd.f32 %v9227_v34, %v762_v63  ;;  %v1264_v54 = vld [vmem:[#allocation2 + $0x15d] sm:$0xff]  ;;  %v6453_v13 = vld [vmem:[%s8254_s12 + $0x150] sm:$0xff] }
 0x191   : > { %7202 = vmatmul.mubr.f32.gmra.mxu0 %v1234_v30  ;;  %7269 = vmatpush3.msra.mxu1 %v6437_v45  ;;  %1187 = vst [vmem:[#allocation2 + $0x90] sm:$0xff] %v1137_v0  ;;  %1216 = vst [vmem:[#allocation2 + $0x178] sm:$0xff] %v1166_v28  ;;  %v819_v1 = vadd.f32 %v9227_v34, %v763_v19  ;;  %v790_v20 = vadd.f32 %v9227_v34, %v734_v60  ;;  %v1109_v58 = vpop.permute.xlu0 %1108  ;;  %v1114_v51 = vpop.permute.xlu1 %1113  ;;  %v6435_v40 = vld [vmem:[%s8254_s12 + $0xc0] sm:$0xff]  ;;  %v6434_v6 = vld [vmem:[%s8254_s12 + $0xb8] sm:$0xff] }
 0x192   : > { %v838_v39 = vmax.f32 %v788_v53, 0.0  ;;  %v735_v14 = vmul.f32 %v8176_v52, %v9201_v26  ;;  %7371 = vmatprep.subr.mxu0 %v6455_v15  ;;  %7270 = vmatprep.subr.mxu1 %v6436_v11  ;;  %1217 = vst [vmem:[#allocation2 + $0x180] sm:$0xff] %v1167_v10  ;;  %v839_v2 = vmax.f32 %v789_v4, 0.0  ;;  %v868_v23 = vmax.f32 %v818_v35, 0.0  ;;  %v1235_v45 = vld [vmem:[#allocation2 + $0x75] sm:$0xff]  ;;  %v6451_v19 = vld [vmem:[%s8254_s12 + $0x140] sm:$0xff] }
 0x193   : > { %v736_v18 = vmul.f32 %v8177_v42, %v9201_v26  ;;  %v737_v48 = vmul.f32 %v8178_v38, %v9201_v26  ;;  %7244 = vmatmul.mubr.f32.gmra.mxu1 %v1262_v27  ;;  %7372 = vmatpush3.msra.mxu0 %v6455_v15  ;;  %v869_v7 = vmax.f32 %v819_v1, 0.0  ;;  %v840_v9 = vmax.f32 %v790_v20, 0.0  ;;  %v1236_v55 = vld [vmem:[#allocation2 + $0x7d] sm:$0xff]  ;;  %v6433_v56 = vld [vmem:[%s8254_s12 + $0xb0] sm:$0xff]  ;;  %v6432_v0 = vld [vmem:[%s8254_s12 + $0xa8] sm:$0xff] }
 0x194   : > { %v1138_v46 = vmul.f32 %v959_v57, %v838_v39  ;;  %v791_v29 = vadd.f32 %v9227_v34, %v735_v14  ;;  %7246 = vmatprep.mubr.f32.mxu1 %v1263_v3  ;;  %7271 = vmatpush3.msra.mxu1 %v6436_v11  ;;  %v1139_v24 = vmul.f32 %v964_v21, %v839_v2  ;;  %v1265_v41 = vld [vmem:[#allocation2 + $0x165] sm:$0xff]  ;;  %v6450_v53 = vld [vmem:[%s8254_s12 + $0x138] sm:$0xff]  ;;  %v6449_v52 = vld [vmem:[%s8254_s12 + $0x130] sm:$0xff] }
 0x195   : > { %v1168_v31 = vmul.f32 %v1109_v58, %v868_v23  ;;  %v792_v59 = vadd.f32 %v9227_v34, %v736_v18  ;;  %7373 = vmatprep.subr.mxu0 %v6454_v33  ;;  %6257 = vperm.xlu0 %8157, %v6013_v61   ;;  %v1169_v49 = vmul.f32 %v1114_v51, %v869_v7  ;;  %v969_v32 = vpop.permute.xlu0 %968  ;;  %v974_v12 = vpop.permute.xlu1 %973  ;;  %v6452_v21 = vld [vmem:[%s8254_s12 + $0x148] sm:$0xff]  ;;  %v6431_v4 = vld [vmem:[%s8254_s12 + $0xa0] sm:$0xff]  ;;  %v6430_v20 = vld [vmem:[%s8254_s12 + $0x98] sm:$0xff] }
 0x196   : > { %1188 = vst [vmem:[#allocation2 + $0x98] sm:$0xff] %v1138_v46  ;;  %v841_v47 = vmax.f32 %v791_v29, 0.0  ;;  %v793_v43 = vadd.f32 %v9227_v34, %v737_v48  ;;  %v738_v25 = vmul.f32 %v8179_v37, %v9201_v26  ;;  %6262 = vperm.xlu1 %8158, %v6014_v50   ;;  %7374 = vmatpush3.msra.mxu0 %v6454_v33  ;;  %1189 = vst [vmem:[#allocation2 + $0xa0] sm:$0xff] %v1139_v24  ;;  %v1237_v11 = vld [vmem:[#allocation2 + $0x85] sm:$0xff]  ;;  %v6429_v61 = vld [vmem:[%s8254_s12 + $0x90] sm:$0xff] }
 0x197   : > { %1218 = vst [vmem:[#allocation2 + $0x188] sm:$0xff] %v1168_v31  ;;  %v842_v44 = vmax.f32 %v792_v59, 0.0  ;;  %v764_v17 = vmul.f32 %v9201_v26, %v11420_v5  ;;  %7247 = vmatmul.mubr.f32.gmra.mxu1 %v1264_v54  ;;  %7272 = vmatprep.subr.mxu1 %v6435_v40  ;;  %1219 = vst [vmem:[#allocation2 + $0x190] sm:$0xff] %v1169_v49  ;;  %v1140_v16 = vmul.f32 %v969_v32, %v840_v9  ;;  %v1266_v26 = vld [vmem:[#allocation2 + $0x16d] sm:$0xff]  ;;  %v6447_v51 = vld [vmem:[%s8254_s12 + $0x120] sm:$0xff] }
 0x198   : > { %v1141_v8 = vmul.f32 %v974_v12, %v841_v47  ;;  %v843_v36 = vmax.f32 %v793_v43, 0.0  ;;  %v794_v30 = vadd.f32 %v9227_v34, %v738_v25  ;;  %7204 = vmatprep.mubr.f32.mxu0 %v1235_v45  ;;  %7273 = vmatpush3.msra.mxu1 %v6435_v40  ;;  %v1238_v28 = vld [vmem:[#allocation2 + $0x8d] sm:$0xff]  ;;  %v1267_v39 = vld [vmem:[#allocation2 + $0x175] sm:$0xff]  ;;  %v6427_v38 = vld [vmem:[%s8254_s12 + $0x80] sm:$0xff] }
 0x199   : > { %v820_v57 = vadd.f32 %v9227_v34, %v764_v17  ;;  %7205 = vmatmul.mubr.f32.gmra.mxu0 %v1236_v55  ;;  %7375 = vmatprep.subr.mxu0 %v6453_v13  ;;  %1190 = vst [vmem:[#allocation2 + $0xa8] sm:$0xff] %v1140_v16  ;;  %v979_v63 = vpop.permute.xlu0 %978  ;;  %v984_v62 = vpop.permute.xlu1 %983  ;;  %v1268_v1 = vld [vmem:[#allocation2 + $0x17d] sm:$0xff]  ;;  %v6448_v2 = vld [vmem:[%s8254_s12 + $0x128] sm:$0xff]  ;;  %v6445_v29 = vld [vmem:[%s8254_s12 + $0x110] sm:$0xff] }
 0x19a   : > { %1191 = vst [vmem:[#allocation2 + $0xb0] sm:$0xff] %v1141_v8  ;;  %7274 = vmatprep.subr.mxu1 %v6434_v6  ;;  %7376 = vmatpush3.msra.mxu0 %v6453_v13  ;;  %v1142_v22 = vmul.f32 %v979_v63, %v842_v44  ;;  %v1143_v60 = vmul.f32 %v984_v62, %v843_v36  ;;  %v844_v15 = vmax.f32 %v794_v30, 0.0  ;;  %v6428_v23 = vld [vmem:[%s8254_s12 + $0x88] sm:$0xff]  ;;  %v6446_v18 = vld [vmem:[%s8254_s12 + $0x118] sm:$0xff]  ;;  %v6473_v47 = vld [vmem:[%s8254_s12 + $0x1f0] sm:$0xff] }
 0x19b   : > { %7275 = vmatpush3.msra.mxu1 %v6434_v6  ;;  %7249 = vmatprep.mubr.f32.mxu1 %v1265_v41  ;;  %v870_v34 = vmax.f32 %v820_v57, 0.0  ;;  %v1759_v50 = vld [vmem:[#allocation2 + $0x6] sm:$0xff]  ;;  %v1760_v7 = vld [vmem:[#allocation2 + $0xe] sm:$0xff]  ;;  %v6474_v9 = vld [vmem:[%s8254_s12 + $0x1f8] sm:$0xff] }
 0x19c   : > { %7377 = vmatprep.subr.mxu0 %v6452_v21  ;;  %7250 = vmatmul.mubr.f32.gmra.mxu1 %v1266_v26  ;;  %1192 = vst [vmem:[#allocation2 + $0xb8] sm:$0xff] %v1142_v22  ;;  %1193 = vst [vmem:[#allocation2 + $0xc0] sm:$0xff] %v1143_v60  ;;  %v1761_v54 = vld [vmem:[#allocation2 + $0x16] sm:$0xff]  ;;  %v1762_v31 = vld [vmem:[#allocation2 + $0x1e] sm:$0xff] }
 0x19d   : > { %7276 = vmatprep.subr.mxu1 %v6433_v56  ;;  %7378 = vmatpush3.msra.mxu0 %v6452_v21  ;;  %v989_v27 = vpop.permute.xlu0 %988  ;;  %v1119_v10 = vpop.permute.xlu1 %1118  ;;  %v1239_v14 = vld [vmem:[#allocation2 + $0x95] sm:$0xff]  ;;  %v1240_v33 = vld [vmem:[#allocation2 + $0x9d] sm:$0xff]  ;;  %v6444_v59 = vld [vmem:[%s8254_s12 + $0x108] sm:$0xff] }
 0x19e   : > { %7277 = vmatpush3.msra.mxu1 %v6433_v56  ;;  %7379 = vmatprep.subr.mxu0 %v6451_v19  ;;  %v1144_v35 = vmul.f32 %v989_v27, %v844_v15  ;;  %v1170_v3 = vmul.f32 %v1119_v10, %v870_v34  ;;  %v1269_v58 = vld [vmem:[#allocation2 + $0x185] sm:$0xff]  ;;  %v1270_v42 = vld [vmem:[#allocation2 + $0x18d] sm:$0xff]  ;;  %v1765_v55 = vld [vmem:[#allocation2 + $0x36] sm:$0xff] }
 0x19f   : > { %7207 = vmatprep.mubr.f32.mxu0 %v1237_v11  ;;  %7278 = vmatprep.subr.mxu1 %v6432_v0  ;;  %v1763_v49 = vld [vmem:[#allocation2 + $0x26] sm:$0xff]  ;;  %v1764_v25 = vld [vmem:[#allocation2 + $0x2e] sm:$0xff]  ;;  %v6490_v32 = vld [vmem:[%s8254_s12 + $0x278] sm:$0xff] }
 0x1a0   : > { %7380 = vmatpush3.msra.mxu0 %v6451_v19  ;;  %7279 = vmatpush3.msra.mxu1 %v6432_v0  ;;  %1194 = vst [vmem:[#allocation2 + $0xc8] sm:$0xff] %v1144_v35  ;;  %1220 = vst [vmem:[#allocation2 + $0x198] sm:$0xff] %v1170_v3  ;;  %v1241_v48 = vld [vmem:[#allocation2 + $0xa5] sm:$0xff]  ;;  %v9558_v5 = vld [vmem:[#allocation2 + $0xf] sm:$0xff] }
 0x1a1   : > { %7208 = vmatmul.mubr.f32.gmra.mxu0 %v1238_v28  ;;  %7381 = vmatprep.subr.mxu0 %v6450_v53  ;;  %v1242_v46 = vld [vmem:[#allocation2 + $0xad] sm:$0xff]  ;;  %v6443_v43 = vld [vmem:[%s8254_s12 + $0x100] sm:$0xff]  ;;  %v9562_v16 = vld [vmem:[#allocation2 + $0x17] sm:$0xff] }
 0x1a2   : > { %7280 = vmatprep.subr.mxu1 %v6431_v4  ;;  %7382 = vmatpush3.msra.mxu0 %v6450_v53  ;;  %v2291_v13 = vld [vmem:[#allocation2 + $0x7] sm:$0xff]  ;;  %v1766_v44 = vld [vmem:[#allocation2 + $0x3e] sm:$0xff]  ;;  %v6489_v6 = vld [vmem:[%s8254_s12 + $0x270] sm:$0xff] }
 0x1a3   : > { %7252 = vmatprep.mubr.f32.mxu1 %v1267_v39  ;;  %7281 = vmatpush3.msra.mxu1 %v6431_v4  ;;  %v1243_v40 = vld [vmem:[#allocation2 + $0xb5] sm:$0xff]  ;;  %v1244_v24 = vld [vmem:[#allocation2 + $0xbd] sm:$0xff]  ;;  %v6472_v12 = vld [vmem:[%s8254_s12 + $0x1e8] sm:$0xff] }
 0x1a4   : > { %7253 = vmatmul.mubr.f32.gmra.mxu1 %v1268_v1  ;;  %7282 = vmatprep.subr.mxu1 %v6430_v20  ;;  %v1767_v17 = vld [vmem:[#allocation2 + $0x46] sm:$0xff]  ;;  %v1768_v8 = vld [vmem:[#allocation2 + $0x4e] sm:$0xff]  ;;  %v1769_v41 = vld [vmem:[#allocation2 + $0x56] sm:$0xff] }
 0x1a5   : > { %7383 = vmatprep.subr.mxu0 %v6449_v52  ;;  %7283 = vmatpush3.msra.mxu1 %v6430_v20  ;;  %v6471_v36 = vld [vmem:[%s8254_s12 + $0x1e0] sm:$0xff]  ;;  %v6488_v57 = vld [vmem:[%s8254_s12 + $0x268] sm:$0xff]  ;;  %v6470_v56 = vld [vmem:[%s8254_s12 + $0x1d8] sm:$0xff] }
 0x1a6   : > { %7384 = vmatpush3.msra.mxu0 %v6449_v52  ;;  %7210 = vmatprep.mubr.f32.mxu0 %v1239_v14  ;;  %v9566_v30 = vld [vmem:[#allocation2 + $0x1f] sm:$0xff]  ;;  %v9570_v21 = vld [vmem:[#allocation2 + $0x27] sm:$0xff]  ;;  %v9574_v63 = vld [vmem:[#allocation2 + $0x2f] sm:$0xff] }
 0x1a7   : > { %7211 = vmatmul.mubr.f32.gmra.mxu0 %v1240_v33  ;;  %7284 = vmatprep.subr.mxu1 %v6429_v61  ;;  %v1245_v45 = vld [vmem:[#allocation2 + $0xc5] sm:$0xff]  ;;  %v1246_v37 = vld [vmem:[#allocation2 + $0xcd] sm:$0xff]  ;;  %v9578_v22 = vld [vmem:[#allocation2 + $0x37] sm:$0xff] }
 0x1a8   : > { %7385 = vmatprep.subr.mxu0 %v6448_v2  ;;  %7285 = vmatpush3.msra.mxu1 %v6429_v61  ;;  %v1770_v26 = vld [vmem:[#allocation2 + $0x5e] sm:$0xff]  ;;  %v1771_v62 = vld [vmem:[#allocation2 + $0x66] sm:$0xff]  ;;  %v1772_v60 = vld [vmem:[#allocation2 + $0x6e] sm:$0xff] }
 0x1a9   : > { %7386 = vmatpush3.msra.mxu0 %v6448_v2  ;;  %7255 = vmatprep.mubr.f32.mxu1 %v1269_v58  ;;  %v6487_v19 = vld [vmem:[%s8254_s12 + $0x260] sm:$0xff]  ;;  %v6469_v15 = vld [vmem:[%s8254_s12 + $0x1d0] sm:$0xff]  ;;  %v6486_v0 = vld [vmem:[%s8254_s12 + $0x258] sm:$0xff] }
 0x1aa   : > { %7286 = vmatprep.subr.mxu1 %v6428_v23  ;;  %7387 = vmatprep.subr.mxu0 %v6447_v51  ;;  %v9582_v34 = vld [vmem:[#allocation2 + $0x3f] sm:$0xff]  ;;  %v1773_v11 = vld [vmem:[#allocation2 + $0x76] sm:$0xff]  ;;  %v9586_v28 = vld [vmem:[#allocation2 + $0x47] sm:$0xff] }
 0x1ab   : > { %7256 = vmatmul.mubr.f32.gmra.mxu1 %v1270_v42  ;;  %7388 = vmatpush3.msra.mxu0 %v6447_v51  ;;  %v1774_v53 = vld [vmem:[#allocation2 + $0x7e] sm:$0xff]  ;;  %v6468_v27 = vld [vmem:[%s8254_s12 + $0x1c8] sm:$0xff]  ;;  %v6485_v35 = vld [vmem:[%s8254_s12 + $0x250] sm:$0xff] }
 0x1ac   : > { %7287 = vmatpush3.msra.mxu1 %v6428_v23  ;;  %7389 = vmatprep.subr.mxu0 %v6446_v18  ;;  %v9590_v10 = vld [vmem:[#allocation2 + $0x4f] sm:$0xff]  ;;  %v1775_v4 = vld [vmem:[#allocation2 + $0x86] sm:$0xff]  ;;  %v9594_v3 = vld [vmem:[#allocation2 + $0x57] sm:$0xff] }
 0x1ad   : > { %7288 = vmatprep.subr.mxu1 %v6427_v38  ;;  %7213 = vmatprep.mubr.f32.mxu0 %v1241_v48  ;;  %v1776_v39 = vld [vmem:[#allocation2 + $0x8e] sm:$0xff]  ;;  %v6467_v1 = vld [vmem:[%s8254_s12 + $0x1c0] sm:$0xff]  ;;  %v1777_v52 = vld [vmem:[#allocation2 + $0x96] sm:$0xff] }
 0x1ae   : > { %7289 = vmatpush3.msra.mxu1 %v6427_v38  ;;  %7290 = vmatprep.mubr.f32.mxu1 %v1759_v50  ;;  %v9598_v20 = vld [vmem:[#allocation2 + $0x5f] sm:$0xff]  ;;  %v6484_v14 = vld [vmem:[%s8254_s12 + $0x248] sm:$0xff]  ;;  %v9610_v42 = vld [vmem:[#allocation2 + $0x77] sm:$0xff] }
 0x1af   : > { %7390 = vmatpush3.msra.mxu0 %v6446_v18  ;;  %7291 = vmatmul.mubr.f32.vlgmr.msra.gmra.mxu1 %v1760_v7  ;;  %v9602_v33 = vld [vmem:[#allocation2 + $0x67] sm:$0xff]  ;;  %v1778_v61 = vld [vmem:[#allocation2 + $0x9e] sm:$0xff]  ;;  %v9606_v58 = vld [vmem:[#allocation2 + $0x6f] sm:$0xff] }
 0x1b0   : > { %7214 = vmatmul.mubr.f32.gmra.mxu0 %v1242_v46  ;;  %7293 = vmatprep.mubr.f32.mxu1 %v1761_v54  ;;  %v6466_v2 = vld [vmem:[%s8254_s12 + $0x1b8] sm:$0xff]  ;;  %v1779_v23 = vld [vmem:[#allocation2 + $0xa6] sm:$0xff]  ;;  %v1780_v18 = vld [vmem:[#allocation2 + $0xae] sm:$0xff] }
 0x1b1   : > { %7472 = vmatprep.subr.mxu1 %v6474_v9  ;;  %7391 = vmatprep.subr.mxu0 %v6445_v29  ;;  %v6483_v51 = vld [vmem:[%s8254_s12 + $0x240] sm:$0xff]  ;;  %v6465_v38 = vld [vmem:[%s8254_s12 + $0x1b0] sm:$0xff]  ;;  %v6482_v46 = vld [vmem:[%s8254_s12 + $0x238] sm:$0xff] }
 0x1b2   : > { %7473 = vmatpush3.msra.mxu1 %v6474_v9  ;;  %7216 = vmatprep.mubr.f32.mxu0 %v1243_v40  ;;  %v9614_v48 = vld [vmem:[#allocation2 + $0x7f] sm:$0xff]  ;;  %v1781_v50 = vld [vmem:[#allocation2 + $0xb6] sm:$0xff]  ;;  %v9618_v7 = vld [vmem:[#allocation2 + $0x87] sm:$0xff] }
 0x1b3   : > { %7392 = vmatpush3.msra.mxu0 %v6445_v29  ;;  %7294 = vmatmul.mubr.f32.gmra.mxu1 %v1762_v31  ;;  %v1782_v9 = vld [vmem:[#allocation2 + $0xbe] sm:$0xff]  ;;  %v6464_v29 = vld [vmem:[%s8254_s12 + $0x1a8] sm:$0xff] }
 0x1b4   : > { %7217 = vmatmul.mubr.f32.gmra.mxu0 %v1244_v24  ;;  %7296 = vmatprep.mubr.f32.mxu1 %v1763_v49  ;;  %v9622_v54 = vld [vmem:[#allocation2 + $0x8f] sm:$0xff]  ;;  %v1783_v40 = vld [vmem:[#allocation2 + $0xc6] sm:$0xff]  ;;  %v9626_v31 = vld [vmem:[#allocation2 + $0x97] sm:$0xff] }
 0x1b5   : > { %7393 = vmatprep.subr.mxu0 %v6444_v59  ;;  %7219 = vmatprep.mubr.f32.mxu0 %v1245_v45  ;;  %v6481_v24 = vld [vmem:[%s8254_s12 + $0x230] sm:$0xff]  ;;  %v6463_v45 = vld [vmem:[%s8254_s12 + $0x1a0] sm:$0xff] }
 0x1b6   : > { %7394 = vmatpush3.msra.mxu0 %v6444_v59  ;;  %7474 = vmatprep.subr.mxu1 %v6473_v47  ;;  %v1784_v59 = vld [vmem:[#allocation2 + $0xce] sm:$0xff]  ;;  %v9630_v49 = vld [vmem:[#allocation2 + $0x9f] sm:$0xff] }
 0x1b7   : > { %7297 = vmatmul.mubr.f32.gmra.mxu1 %v1764_v25  ;;  %7395 = vmatprep.subr.mxu0 %v6443_v43  ;;  %v1786_v25 = vld [vmem:[#allocation2 + $0xde] sm:$0xff] }
 0x1b8   : > { %7220 = vmatmul.mubr.f32.gmra.mxu0 %v1246_v37  ;;  %7299 = vmatprep.mubr.f32.mxu1 %v1765_v55  ;;  %v9634_v37 = vld [vmem:[#allocation2 + $0xa7] sm:$0xff]  ;;  %v6462_v55 = vld [vmem:[%s8254_s12 + $0x198] sm:$0xff] }
 0x1b9   : > { %7396 = vmatpush3.msra.mxu0 %v6443_v43  ;;  %7475 = vmatpush3.msra.mxu1 %v6473_v47  ;;  %v1785_v47 = vld [vmem:[#allocation2 + $0xd6] sm:$0xff]  ;;  %v6480_v43 = vld [vmem:[%s8254_s12 + $0x228] sm:$0xff] }
 0x1ba   : > { %7397 = vmatprep.mubr.f32.mxu0 %v2291_v13  ;;  %7579 = vmatprep.subr.mxu0 %v6490_v32  ;;  %v9638_v13 = vld [vmem:[#allocation2 + $0xaf] sm:$0xff] }
 0x1bb   : > { %7300 = vmatmul.mubr.f32.gmra.mxu1 %v1766_v44  ;;  %7476 = vmatprep.subr.mxu1 %v6472_v12  ;;  %v9642_v44 = vld [vmem:[#allocation2 + $0xb7] sm:$0xff] }
 0x1bc   : > { %7398 = vmatmul.mubr.f32.vlgmr.msra.gmra.mxu0 %v9558_v5  ;;  %7302 = vmatprep.mubr.f32.mxu1 %v1767_v17  ;;  %v1788_v17 = vld [vmem:[#allocation2 + $0xee] sm:$0xff] }
 0x1bd   : > { %7580 = vmatpush3.msra.mxu0 %v6490_v32  ;;  %7400 = vmatprep.mubr.f32.mxu0 %v9562_v16  ;;  %v1787_v32 = vld [vmem:[#allocation2 + $0xe6] sm:$0xff] }
 0x1be   : > { %7477 = vmatpush3.msra.mxu1 %v6472_v12  ;;  %7581 = vmatprep.subr.mxu0 %v6489_v6  ;;  %v6479_v12 = vld [vmem:[%s8254_s12 + $0x220] sm:$0xff] }
 0x1bf   : > { %7303 = vmatmul.mubr.f32.gmra.mxu1 %v1768_v8  ;;  %7582 = vmatpush3.msra.mxu0 %v6489_v6  ;;  %v6461_v6 = vld [vmem:[%s8254_s12 + $0x190] sm:$0xff]  ;;  %v9646_v8 = vld [vmem:[#allocation2 + $0xbf] sm:$0xff] }
 0x1c0   : > { %7401 = vmatmul.mubr.f32.gmra.mxu0 %v9566_v30  ;;  %7305 = vmatprep.mubr.f32.mxu1 %v1769_v41  ;;  %v6478_v41 = vld [vmem:[%s8254_s12 + $0x218] sm:$0xff] }
 0x1c1   : > { %7403 = vmatprep.mubr.f32.mxu0 %v9570_v21  ;;  %7478 = vmatprep.subr.mxu1 %v6471_v36 }
 0x1c2   : > { %7479 = vmatpush3.msra.mxu1 %v6471_v36  ;;  %7583 = vmatprep.subr.mxu0 %v6488_v57  ;;  %v1789_v36 = vld [vmem:[#allocation2 + $0xf6] sm:$0xff] }
 0x1c3   : > { %7306 = vmatmul.mubr.f32.gmra.mxu1 %v1770_v26  ;;  %7584 = vmatpush3.msra.mxu0 %v6488_v57  ;;  %v9650_v57 = vld [vmem:[#allocation2 + $0xc7] sm:$0xff]  ;;  %v1790_v26 = vld [vmem:[#allocation2 + $0xfe] sm:$0xff] }
 0x1c4   : > { %7404 = vmatmul.mubr.f32.gmra.mxu0 %v9574_v63  ;;  %7308 = vmatprep.mubr.f32.mxu1 %v1771_v62  ;;  %v9654_v62 = vld [vmem:[#allocation2 + $0xcf] sm:$0xff] }
 0x1c5   : > { %7406 = vmatprep.mubr.f32.mxu0 %v9578_v22  ;;  %7480 = vmatprep.subr.mxu1 %v6470_v56 }
 0x1c6   : > { %7481 = vmatpush3.msra.mxu1 %v6470_v56  ;;  %7585 = vmatprep.subr.mxu0 %v6487_v19  ;;  %v6460_v56 = vld [vmem:[%s8254_s12 + $0x188] sm:$0xff] }
 0x1c7   : > { %7309 = vmatmul.mubr.f32.gmra.mxu1 %v1772_v60  ;;  %7586 = vmatpush3.msra.mxu0 %v6487_v19  ;;  %v1791_v19 = vld [vmem:[#allocation2 + $0x106] sm:$0xff]  ;;  %v6477_v60 = vld [vmem:[%s8254_s12 + $0x210] sm:$0xff] }
 0x1c8   : > { %7407 = vmatmul.mubr.f32.gmra.mxu0 %v9582_v34  ;;  %7311 = vmatprep.mubr.f32.mxu1 %v1773_v11  ;;  %v1792_v11 = vld [vmem:[#allocation2 + $0x10e] sm:$0xff] }
 0x1c9   : > { %7409 = vmatprep.mubr.f32.mxu0 %v9586_v28  ;;  %7482 = vmatprep.subr.mxu1 %v6469_v15 }
 0x1ca   : > { %7483 = vmatpush3.msra.mxu1 %v6469_v15  ;;  %7587 = vmatprep.subr.mxu0 %v6486_v0  ;;  %v9658_v15 = vld [vmem:[#allocation2 + $0xd7] sm:$0xff] }
 0x1cb   : > { %7312 = vmatmul.mubr.f32.gmra.mxu1 %v1774_v53  ;;  %7588 = vmatpush3.msra.mxu0 %v6486_v0  ;;  %v6459_v0 = vld [vmem:[%s8254_s12 + $0x180] sm:$0xff] }
 0x1cc   : > { %7410 = vmatmul.mubr.f32.gmra.mxu0 %v9590_v10  ;;  %7314 = vmatprep.mubr.f32.mxu1 %v1775_v4  ;;  %v9662_v53 = vld [vmem:[#allocation2 + $0xdf] sm:$0xff]  ;;  %v6476_v4 = vld [vmem:[%s8254_s12 + $0x208] sm:$0xff] }
 0x1cd   : > { %7412 = vmatprep.mubr.f32.mxu0 %v9594_v3  ;;  %7484 = vmatprep.subr.mxu1 %v6468_v27 }
 0x1ce   : > { %7485 = vmatpush3.msra.mxu1 %v6468_v27  ;;  %7589 = vmatprep.subr.mxu0 %v6485_v35  ;;  %v1793_v27 = vld [vmem:[#allocation2 + $0x116] sm:$0xff] }
 0x1cf   : > { %7315 = vmatmul.mubr.f32.gmra.mxu1 %v1776_v39  ;;  %7590 = vmatpush3.msra.mxu0 %v6485_v35  ;;  %v9666_v35 = vld [vmem:[#allocation2 + $0xe7] sm:$0xff]  ;;  %v1794_v39 = vld [vmem:[#allocation2 + $0x11e] sm:$0xff] }
 0x1d0   : > { %7413 = vmatmul.mubr.f32.gmra.mxu0 %v9598_v20  ;;  %7317 = vmatprep.mubr.f32.mxu1 %v1777_v52  ;;  %v9672_v52 = vld [vmem:[#allocation2 + $0xef] sm:$0xff] }
 0x1d1   : > { %7415 = vmatprep.mubr.f32.mxu0 %v9602_v33  ;;  %7486 = vmatprep.subr.mxu1 %v6467_v1 }
 0x1d2   : > { %7487 = vmatpush3.msra.mxu1 %v6467_v1  ;;  %7591 = vmatprep.subr.mxu0 %v6484_v14  ;;  %v9670_v1 = vld [vmem:[%s8254_s12 + $0x2f8] sm:$0xff] }
 0x1d3   : > { %7318 = vmatmul.mubr.f32.gmra.mxu1 %v1778_v61  ;;  %7592 = vmatpush3.msra.mxu0 %v6484_v14  ;;  %v1795_v14 = vld [vmem:[#allocation2 + $0x126] sm:$0xff] }
 0x1d4   : > { %7416 = vmatmul.mubr.f32.gmra.mxu0 %v9606_v58  ;;  %7320 = vmatprep.mubr.f32.mxu1 %v1779_v23  ;;  %v6475_v61 = vld [vmem:[%s8254_s12 + $0x200] sm:$0xff]  ;;  %v1796_v23 = vld [vmem:[#allocation2 + $0x12e] sm:$0xff] }
 0x1d5   : > { %7418 = vmatprep.mubr.f32.mxu0 %v9610_v42  ;;  %7488 = vmatprep.subr.mxu1 %v6466_v2 }
 0x1d6   : > { %7489 = vmatpush3.msra.mxu1 %v6466_v2  ;;  %7593 = vmatprep.subr.mxu0 %v6483_v51  ;;  %v9676_v2 = vld [vmem:[#allocation2 + $0xf7] sm:$0xff] }
 0x1d7   : > { %7321 = vmatmul.mubr.f32.gmra.mxu1 %v1780_v18  ;;  %7594 = vmatpush3.msra.mxu0 %v6483_v51  ;;  %v9681_v51 = vld [vmem:[%s8254_s12 + $0x378] sm:$0xff] }
 0x1d8   : > { %7419 = vmatmul.mubr.f32.gmra.mxu0 %v9614_v48  ;;  %7323 = vmatprep.mubr.f32.mxu1 %v1781_v50  ;;  %v9683_v18 = vld [vmem:[#allocation2 + $0xff] sm:$0xff]  ;;  %v9686_v50 = vld [vmem:[#allocation2 + $0x107] sm:$0xff] }
 0x1d9   : > { %7421 = vmatprep.mubr.f32.mxu0 %v9618_v7  ;;  %7490 = vmatprep.subr.mxu1 %v6465_v38 }
 0x1da   : > { %7491 = vmatpush3.msra.mxu1 %v6465_v38  ;;  %7595 = vmatprep.subr.mxu0 %v6482_v46  ;;  %v1797_v38 = vld [vmem:[#allocation2 + $0x136] sm:$0xff] }
 0x1db   : > { %7324 = vmatmul.mubr.f32.gmra.mxu1 %v1782_v9  ;;  %7596 = vmatpush3.msra.mxu0 %v6482_v46  ;;  %v1798_v46 = vld [vmem:[#allocation2 + $0x13e] sm:$0xff]  ;;  %v9690_v9 = vld [vmem:[#allocation2 + $0x10f] sm:$0xff] }
 0x1dc   : > { %7422 = vmatmul.mubr.f32.gmra.mxu0 %v9622_v54  ;;  %7326 = vmatprep.mubr.f32.mxu1 %v1783_v40  ;;  %v9693_v40 = vld [vmem:[#allocation2 + $0x117] sm:$0xff] }
 0x1dd   : > { %7424 = vmatprep.mubr.f32.mxu0 %v9626_v31  ;;  %7492 = vmatprep.subr.mxu1 %v6464_v29 }
 0x1de   : > { %7493 = vmatpush3.msra.mxu1 %v6464_v29  ;;  %7597 = vmatprep.subr.mxu0 %v6481_v24  ;;  %v1799_v29 = vld [vmem:[#allocation2 + $0x146] sm:$0xff] }
 0x1df   : > { %7327 = vmatmul.mubr.f32.gmra.mxu1 %v1784_v59  ;;  %7598 = vmatpush3.msra.mxu0 %v6481_v24  ;;  %v1800_v24 = vld [vmem:[#allocation2 + $0x14e] sm:$0xff]  ;;  %v9696_v59 = vld [vmem:[#allocation2 + $0x11f] sm:$0xff] }
 0x1e0   : > { %7425 = vmatmul.mubr.f32.gmra.mxu0 %v9630_v49  ;;  %7329 = vmatprep.mubr.f32.mxu1 %v1785_v47  ;;  %v9699_v47 = vld [vmem:[#allocation2 + $0x127] sm:$0xff] }
 0x1e1   : > { %7427 = vmatprep.mubr.f32.mxu0 %v9634_v37  ;;  %7494 = vmatprep.subr.mxu1 %v6463_v45 }
 0x1e2   : > { %7495 = vmatpush3.msra.mxu1 %v6463_v45  ;;  %7599 = vmatprep.subr.mxu0 %v6480_v43  ;;  %v1801_v45 = vld [vmem:[#allocation2 + $0x156] sm:$0xff] }
 0x1e3   : > { %7330 = vmatmul.mubr.f32.gmra.mxu1 %v1786_v25  ;;  %7600 = vmatpush3.msra.mxu0 %v6480_v43  ;;  %v1802_v43 = vld [vmem:[#allocation2 + $0x15e] sm:$0xff]  ;;  %v9702_v25 = vld [vmem:[#allocation2 + $0x12f] sm:$0xff] }
 0x1e4   : > { %7428 = vmatmul.mubr.f32.gmra.mxu0 %v9638_v13  ;;  %7332 = vmatprep.mubr.f32.mxu1 %v1787_v32  ;;  %v9705_v32 = vld [vmem:[#allocation2 + $0x137] sm:$0xff] }
 0x1e5   : > { %7430 = vmatprep.mubr.f32.mxu0 %v9642_v44  ;;  %7496 = vmatprep.subr.mxu1 %v6462_v55 }
 0x1e6   : > { %7497 = vmatpush3.msra.mxu1 %v6462_v55  ;;  %7601 = vmatprep.subr.mxu0 %v6479_v12  ;;  %v1803_v55 = vld [vmem:[#allocation2 + $0x166] sm:$0xff] }
 0x1e7   : > { %7333 = vmatmul.mubr.f32.gmra.mxu1 %v1788_v17  ;;  %7602 = vmatpush3.msra.mxu0 %v6479_v12  ;;  %v1804_v12 = vld [vmem:[#allocation2 + $0x16e] sm:$0xff]  ;;  %v9708_v17 = vld [vmem:[#allocation2 + $0x13f] sm:$0xff] }
 0x1e8   : > { %7431 = vmatmul.mubr.f32.gmra.mxu0 %v9646_v8  ;;  %7335 = vmatprep.mubr.f32.mxu1 %v1789_v36  ;;  %v9711_v36 = vld [vmem:[#allocation2 + $0x147] sm:$0xff] }
 0x1e9   : > { %7433 = vmatprep.mubr.f32.mxu0 %v9650_v57  ;;  %7498 = vmatprep.subr.mxu1 %v6461_v6 }
 0x1ea   : > { %7499 = vmatpush3.msra.mxu1 %v6461_v6  ;;  %7603 = vmatprep.subr.mxu0 %v6478_v41  ;;  %v1805_v6 = vld [vmem:[#allocation2 + $0x176] sm:$0xff] }
 0x1eb   : > { %7336 = vmatmul.mubr.f32.gmra.mxu1 %v1790_v26  ;;  %7604 = vmatpush3.msra.mxu0 %v6478_v41  ;;  %v1806_v41 = vld [vmem:[#allocation2 + $0x17e] sm:$0xff]  ;;  %v9714_v26 = vld [vmem:[#allocation2 + $0x14f] sm:$0xff] }
 0x1ec   : > { %7434 = vmatmul.mubr.f32.gmra.mxu0 %v9654_v62  ;;  %7338 = vmatprep.mubr.f32.mxu1 %v1791_v19  ;;  %v9717_v19 = vld [vmem:[#allocation2 + $0x157] sm:$0xff] }
 0x1ed   : > { %7436 = vmatprep.mubr.f32.mxu0 %v9658_v15  ;;  %7500 = vmatprep.subr.mxu1 %v6460_v56 }
 0x1ee   : > { %7501 = vmatpush3.msra.mxu1 %v6460_v56  ;;  %7605 = vmatprep.subr.mxu0 %v6477_v60  ;;  %v1807_v56 = vld [vmem:[#allocation2 + $0x186] sm:$0xff] }
 0x1ef   : > { %7339 = vmatmul.mubr.f32.gmra.mxu1 %v1792_v11  ;;  %7606 = vmatpush3.msra.mxu0 %v6477_v60  ;;  %v1808_v60 = vld [vmem:[#allocation2 + $0x18e] sm:$0xff]  ;;  %v9720_v11 = vld [vmem:[#allocation2 + $0x15f] sm:$0xff] }
 0x1f0   : > { %7437 = vmatmul.mubr.f32.gmra.mxu0 %v9662_v53  ;;  %7341 = vmatprep.mubr.f32.mxu1 %v1793_v27  ;;  %v9727_v27 = vld [vmem:[#allocation2 + $0x16f] sm:$0xff] }
 0x1f1   : > { %7439 = vmatprep.mubr.f32.mxu0 %v9666_v35  ;;  %7502 = vmatprep.subr.mxu1 %v6459_v0 }
 0x1f2   : > { %7503 = vmatpush3.msra.mxu1 %v6459_v0  ;;  %7607 = vmatprep.subr.mxu0 %v6476_v4  ;;  %v9723_v0 = vld [vmem:[#allocation2 + $0x167] sm:$0xff] }
 0x1f3   : > { %7342 = vmatmul.mubr.f32.gmra.mxu1 %v1794_v39  ;;  %7608 = vmatpush3.msra.mxu0 %v6476_v4  ;;  %v6505_v4 = vld [vmem:[%s8254_s12 + $0x2f0] sm:$0xff] }
 0x1f4   : > { %7440 = vmatmul.mubr.f32.gmra.mxu0 %v9672_v52  ;;  %7344 = vmatprep.mubr.f32.mxu1 %v1795_v14  ;;  %v9732_v39 = vld [vmem:[#allocation2 + $0x177] sm:$0xff]  ;;  %v6504_v14 = vld [vmem:[%s8254_s12 + $0x2e8] sm:$0xff] }
 0x1f5   : > { %7442 = vmatprep.mubr.f32.mxu0 %v9676_v2  ;;  %7686 = vmatprep.subr.mxu1 %v9670_v1 }
 0x1f6   : > { %7609 = vmatprep.subr.mxu0 %v6475_v61 }
 0x1f7   : > { %7345 = vmatmul.mubr.f32.gmra.mxu1 %v1796_v23  ;;  %7610 = vmatpush3.msra.mxu0 %v6475_v61  ;;  %v6521_v61 = vld [vmem:[%s8254_s12 + $0x370] sm:$0xff]  ;;  %v3358_v23 = vld [vmem:[#allocation2 + $0x28] sm:$0xff] }
 0x1f8   : > { %7443 = vmatmul.mubr.f32.gmra.mxu0 %v9683_v18  ;;  %7347 = vmatprep.mubr.f32.mxu1 %v1797_v38  ;;  %v6502_v38 = vld [vmem:[%s8254_s12 + $0x2d8] sm:$0xff] }
 0x1f9   : > { %7445 = vmatprep.mubr.f32.mxu0 %v9686_v50  ;;  %7793 = vmatprep.subr.mxu0 %v9681_v51 }
 0x1fb   : > { %7348 = vmatmul.mubr.f32.gmra.mxu1 %v1798_v46  ;;  %v6519_v46 = vld [vmem:[%s8254_s12 + $0x360] sm:$0xff] }
 0x1fc   : > { %7446 = vmatmul.mubr.f32.gmra.mxu0 %v9690_v9  ;;  %7350 = vmatprep.mubr.f32.mxu1 %v1799_v29  ;;  %v6518_v29 = vld [vmem:[%s8254_s12 + $0x358] sm:$0xff] }
 0x1fd   : > { %7448 = vmatprep.mubr.f32.mxu0 %v9693_v40 }
 0x1ff   : > { %7351 = vmatmul.mubr.f32.gmra.mxu1 %v1800_v24  ;;  %v6500_v24 = vld [vmem:[%s8254_s12 + $0x2c8] sm:$0xff] }
 0x200   : > { %7449 = vmatmul.mubr.f32.gmra.mxu0 %v9696_v59  ;;  %7353 = vmatprep.mubr.f32.mxu1 %v1801_v45  ;;  %v6517_v45 = vld [vmem:[%s8254_s12 + $0x350] sm:$0xff] }
 0x201   : > { %7451 = vmatprep.mubr.f32.mxu0 %v9699_v47 }
 0x203   : > { %7354 = vmatmul.mubr.f32.gmra.mxu1 %v1802_v43  ;;  %v6499_v43 = vld [vmem:[%s8254_s12 + $0x2c0] sm:$0xff] }
 0x204   : > { %7452 = vmatmul.mubr.f32.gmra.mxu0 %v9702_v25  ;;  %7356 = vmatprep.mubr.f32.mxu1 %v1803_v55  ;;  %v6516_v55 = vld [vmem:[%s8254_s12 + $0x348] sm:$0xff] }
 0x205   : > { %7454 = vmatprep.mubr.f32.mxu0 %v9705_v32 }
 0x207   : > { %7357 = vmatmul.mubr.f32.gmra.mxu1 %v1804_v12  ;;  %v6498_v12 = vld [vmem:[%s8254_s12 + $0x2b8] sm:$0xff] }
 0x208   : > { %7455 = vmatmul.mubr.f32.gmra.mxu0 %v9708_v17  ;;  %7359 = vmatprep.mubr.f32.mxu1 %v1805_v6  ;;  %v6515_v6 = vld [vmem:[%s8254_s12 + $0x340] sm:$0xff] }
 0x209   : > { %7457 = vmatprep.mubr.f32.mxu0 %v9711_v36 }
 0x20b   : > { %7360 = vmatmul.mubr.f32.gmra.mxu1 %v1806_v41  ;;  %v9778_v41 = vld [vmem:[%s8249_s9] ss:$0 sm:$0xff] }
 0x20c   : > { %7458 = vmatmul.mubr.f32.gmra.mxu0 %v9714_v26  ;;  %7362 = vmatprep.mubr.f32.mxu1 %v1807_v56 }
 0x20d   : > { %7460 = vmatprep.mubr.f32.mxu0 %v9717_v19 }
 0x20f   : > { %7363 = vmatmul.mubr.f32.gmra.mxu1 %v1808_v60  ;;  %v3368_v60 = vld [vmem:[#allocation2 + $0x78] sm:$0xff] }
 0x210   : > { %7461 = vmatmul.mubr.f32.gmra.mxu0 %v9720_v11  ;;  %7504 = vmatprep.mubr.f32.mxu1 %v9558_v5  ;;  %v9737_v5 = vld [vmem:[#allocation2 + $0x17f] sm:$0xff] }
 0x211   : > { %7463 = vmatprep.mubr.f32.mxu0 %v9723_v0 }
 0x213   : > { %7505 = vmatmul.mubr.f32.vlgmr.msra.gmra.mxu1 %v9562_v16  ;;  %v9742_v16 = vld [vmem:[#allocation2 + $0x187] sm:$0xff] }
 0x214   : > { %7464 = vmatmul.mubr.f32.gmra.mxu0 %v9727_v27  ;;  %7507 = vmatprep.mubr.f32.mxu1 %v9566_v30  ;;  %v9746_v30 = vld [vmem:[#allocation2 + $0x18f] sm:$0xff] }
 0x215   : > { %7466 = vmatprep.mubr.f32.mxu0 %v9732_v39  ;;  %7687 = vmatpush3.msra.mxu1 %v9670_v1  ;;  %v6503_v1 = vld [vmem:[%s8254_s12 + $0x2e0] sm:$0xff] }
 0x216   : > { %7688 = vmatprep.subr.mxu1 %v6505_v4 }
 0x217   : > { %7508 = vmatmul.mubr.f32.gmra.mxu1 %v9570_v21  ;;  %v3355_v21 = vld [vmem:[#allocation2 + $0x10] sm:$0xff] }
 0x218   : > { %7467 = vmatmul.mubr.f32.gmra.mxu0 %v9737_v5  ;;  %7510 = vmatprep.mubr.f32.mxu1 %v9574_v63  ;;  %v3356_v63 = vld [vmem:[#allocation2 + $0x18] sm:$0xff] }
 0x219   : > { %7469 = vmatprep.mubr.f32.mxu0 %v9742_v16  ;;  %7689 = vmatpush3.msra.mxu1 %v6505_v4  ;;  %v3369_v4 = vld [vmem:[#allocation2 + $0x80] sm:$0xff] }
 0x21a   : > { %7690 = vmatprep.subr.mxu1 %v6504_v14 }
 0x21b   : > { %7511 = vmatmul.mubr.f32.gmra.mxu1 %v9578_v22  ;;  %v3357_v22 = vld [vmem:[#allocation2 + $0x20] sm:$0xff] }
 0x21c   : > { %7470 = vmatmul.mubr.f32.gmra.mxu0 %v9746_v30  ;;  %7513 = vmatprep.mubr.f32.mxu1 %v9582_v34  ;;  %v6520_v34 = vld [vmem:[%s8254_s12 + $0x368] sm:$0xff] }
 0x21d   : > { %7611 = vmatprep.mubr.f32.mxu0 %v3355_v21  ;;  %7691 = vmatpush3.msra.mxu1 %v6504_v14  ;;  %v6497_v14 = vld [vmem:[%s8254_s12 + $0x2b0] sm:$0xff] }
 0x21e   : > { %7692 = vmatprep.subr.mxu1 %v6503_v1 }
 0x21f   : > { %7514 = vmatmul.mubr.f32.gmra.mxu1 %v9586_v28  ;;  %v3359_v28 = vld [vmem:[#allocation2 + $0x30] sm:$0xff] }
 0x220   : > { %7612 = vmatmul.mubr.f32.vlgmr.msra.gmra.mxu0 %v3356_v63  ;;  %7516 = vmatprep.mubr.f32.mxu1 %v9590_v10  ;;  %v3360_v10 = vld [vmem:[#allocation2 + $0x38] sm:$0xff]  ;;  %v1635_v63 = vld [vmem:[%s11396_s6 + $0xd0] sm:$0xff] }
 0x221   : > { %7794 = vmatpush3.msra.mxu0 %v9681_v51  ;;  %7614 = vmatprep.mubr.f32.mxu0 %v3357_v22  ;;  %v6501_v51 = vld [vmem:[%s8254_s12 + $0x2d0] sm:$0xff]  ;;  %v3370_v22 = vld [vmem:[#allocation2 + $0x88] sm:$0xff] }
 0x222   : > { %7795 = vmatprep.subr.mxu0 %v6521_v61  ;;  %7693 = vmatpush3.msra.mxu1 %v6503_v1 }
 0x223   : > { %7517 = vmatmul.mubr.f32.gmra.mxu1 %v9594_v3  ;;  %7796 = vmatpush3.msra.mxu0 %v6521_v61  ;;  %v3361_v3 = vld [vmem:[#allocation2 + $0x40] sm:$0xff] }
 0x224   : > { %7615 = vmatmul.mubr.f32.gmra.mxu0 %v3358_v23  ;;  %7519 = vmatprep.mubr.f32.mxu1 %v9598_v20  ;;  %v3362_v20 = vld [vmem:[#allocation2 + $0x48] sm:$0xff]  ;;  %v6514_v23 = vld [vmem:[%s8254_s12 + $0x338] sm:$0xff] }
 0x225   : > { %7617 = vmatprep.mubr.f32.mxu0 %v3359_v28  ;;  %7797 = vmatprep.subr.mxu0 %v6520_v34 }
 0x226   : > { %7798 = vmatpush3.msra.mxu0 %v6520_v34  ;;  %7694 = vmatprep.subr.mxu1 %v6502_v38 }
 0x227   : > { %7520 = vmatmul.mubr.f32.gmra.mxu1 %v9602_v33  ;;  %7799 = vmatprep.subr.mxu0 %v6519_v46  ;;  %v3363_v33 = vld [vmem:[#allocation2 + $0x50] sm:$0xff] }
 0x228   : > { %7618 = vmatmul.mubr.f32.gmra.mxu0 %v3360_v10  ;;  %7522 = vmatprep.mubr.f32.mxu1 %v9606_v58  ;;  %v3364_v58 = vld [vmem:[#allocation2 + $0x58] sm:$0xff]  ;;  %v3371_v10 = vld [vmem:[#allocation2 + $0x90] sm:$0xff] }
 0x229   : > { %7620 = vmatprep.mubr.f32.mxu0 %v3361_v3  ;;  %7695 = vmatpush3.msra.mxu1 %v6502_v38  ;;  %v6496_v38 = vld [vmem:[%s8254_s12 + $0x2a8] sm:$0xff] }
 0x22a   : > { %7800 = vmatpush3.msra.mxu0 %v6519_v46  ;;  %7696 = vmatprep.subr.mxu1 %v6501_v51 }
 0x22b   : > { %7523 = vmatmul.mubr.f32.gmra.mxu1 %v9610_v42  ;;  %7801 = vmatprep.subr.mxu0 %v6518_v29  ;;  %v3365_v42 = vld [vmem:[#allocation2 + $0x60] sm:$0xff] }
 0x22c   : > { %7621 = vmatmul.mubr.f32.gmra.mxu0 %v3362_v20  ;;  %7525 = vmatprep.mubr.f32.mxu1 %v9614_v48  ;;  %v3366_v48 = vld [vmem:[#allocation2 + $0x68] sm:$0xff] }
 0x22d   : > { %7623 = vmatprep.mubr.f32.mxu0 %v3363_v33  ;;  %7697 = vmatpush3.msra.mxu1 %v6501_v51  ;;  %v1640_v33 = vld [vmem:[%s11396_s6 + $0xf8] sm:$0xff] }
 0x22e   : > { %7802 = vmatpush3.msra.mxu0 %v6518_v29  ;;  %7698 = vmatprep.subr.mxu1 %v6500_v24 }
 0x22f   : > { %7526 = vmatmul.mubr.f32.gmra.mxu1 %v9618_v7  ;;  %7803 = vmatprep.subr.mxu0 %v6517_v45  ;;  %v3367_v7 = vld [vmem:[#allocation2 + $0x70] sm:$0xff] }
 0x230   : > { %7624 = vmatmul.mubr.f32.gmra.mxu0 %v3364_v58  ;;  %7528 = vmatprep.mubr.f32.mxu1 %v9622_v54 }
 0x231   : > { %7626 = vmatprep.mubr.f32.mxu0 %v3365_v42  ;;  %7699 = vmatpush3.msra.mxu1 %v6500_v24  ;;  %v3373_v42 = vld [vmem:[#allocation2 + $0xa0] sm:$0xff] }
 0x232   : > { %7804 = vmatpush3.msra.mxu0 %v6517_v45  ;;  %7700 = vmatprep.subr.mxu1 %v6499_v43  ;;  %v3372_v45 = vld [vmem:[#allocation2 + $0x98] sm:$0xff] }
 0x233   : > { %7529 = vmatmul.mubr.f32.gmra.mxu1 %v9626_v31  ;;  %7805 = vmatprep.subr.mxu0 %v6516_v55  ;;  %v1636_v31 = vld [vmem:[%s11396_s6 + $0xd8] sm:$0xff] }
 0x234   : > { %7627 = vmatmul.mubr.f32.gmra.mxu0 %v3366_v48  ;;  %7531 = vmatprep.mubr.f32.mxu1 %v9630_v49  ;;  %v9780_v54 = vpop.f32.mrf.mxu0 }
 0x235   : > { %7629 = vmatprep.mubr.f32.mxu0 %v3367_v7  ;;  %7701 = vmatpush3.msra.mxu1 %v6499_v43  ;;  %v7224_v56 = vpop.f32.mrf.mxu1  ;;  %v1639_v7 = vld [vmem:[%s11396_s6 + $0xf0] sm:$0xff] }
 0x236   : > { %7806 = vmatpush3.msra.mxu0 %v6516_v55  ;;  %7702 = vmatprep.subr.mxu1 %v6498_v12  ;;  %v1496_v49 = vadd.f32 %v7224_v56, %v9778_v41  ;;  %v9789_v1 = vpop.f32.mrf.mxu0  ;;  %v6513_v55 = vld [vmem:[%s8254_s12 + $0x330] sm:$0xff] }
 0x237   : > { %7532 = vmatmul.mubr.f32.gmra.mxu1 %v9634_v37  ;;  %7807 = vmatprep.subr.mxu0 %v6515_v6  ;;  %v1490_v21 = vpop.f32.mrf.mxu1 }
 0x238   : > { %7630 = vmatmul.mubr.f32.gmra.mxu0 %v3368_v60  ;;  %7534 = vmatprep.mubr.f32.mxu1 %v9638_v13  ;;  %v1686_v37 = vadd.f32 %v1636_v31, %v1496_v49  ;;  %v1491_v61 = vadd.f32 %v9778_v41, %v1490_v21  ;;  %v1638_v13 = vld [vmem:[%s11396_s6 + $0xe8] sm:$0xff]  ;;  %v6495_v21 = vld [vmem:[%s8254_s12 + $0x2a0] sm:$0xff] }
 0x239   : > { %7632 = vmatprep.mubr.f32.mxu0 %v3369_v4  ;;  %7703 = vmatpush3.msra.mxu1 %v6498_v12  ;;  %v7227_v34 = vpop.f32.mrf.mxu1  ;;  %v1642_v60 = vld [vmem:[%s11396_s6 + $0x108] sm:$0xff] }
 0x23a   : > { %7808 = vmatpush3.msra.mxu0 %v6515_v6  ;;  %7704 = vmatprep.subr.mxu1 %v6497_v14  ;;  %1736 = vst [vmem:[%s11396_s6 + $0xd8] sm:$0xff] %v1686_v37  ;;  %v1685_v28 = vadd.f32 %v1635_v63, %v1491_v61  ;;  %v1506_v46 = vadd.f32 %v7227_v34, %v9778_v41  ;;  %v1641_v37 = vld [vmem:[%s11396_s6 + $0x100] sm:$0xff] }
 0x23b   : > { %7535 = vmatmul.mubr.f32.gmra.mxu1 %v9642_v44  ;;  %v9806_v51 = vpop.f32.mrf.mxu0  ;;  %v1500_v3 = vpop.f32.mrf.mxu1  ;;  %v1637_v44 = vld [vmem:[%s11396_s6 + $0xe0] sm:$0xff]  ;;  %7809 = vmatprep.subr.mxu0 %v6514_v23 }
 0x23c   : > { %7633 = vmatmul.mubr.f32.gmra.mxu0 %v3370_v22  ;;  %7537 = vmatprep.mubr.f32.mxu1 %v9646_v8  ;;  %1735 = vst [vmem:[%s11396_s6 + $0xd0] sm:$0xff] %v1685_v28  ;;  %v1688_v29 = vadd.f32 %v1638_v13, %v1506_v46  ;;  %v1501_v20 = vadd.f32 %v9778_v41, %v1500_v3  ;;  %v1644_v13 = vld [vmem:[%s11396_s6 + $0x118] sm:$0xff]  ;;  %v3377_v28 = vld [vmem:[#allocation2 + $0xc0] sm:$0xff]  ;;  %v6512_v46 = vld [vmem:[%s8254_s12 + $0x328] sm:$0xff] }
 0x23d   : > { %7635 = vmatprep.mubr.f32.mxu0 %v3371_v10  ;;  %7705 = vmatpush3.msra.mxu1 %v6497_v14  ;;  %v9815_v8 = vpop.f32.mrf.mxu0  ;;  %v7230_v24 = vpop.f32.mrf.mxu1  ;;  %v3375_v14 = vld [vmem:[#allocation2 + $0xb0] sm:$0xff] }
 0x23e   : > { %7706 = vmatprep.subr.mxu1 %v6496_v38  ;;  %7810 = vmatpush3.msra.mxu0 %v6514_v23  ;;  %1738 = vst [vmem:[%s11396_s6 + $0xe8] sm:$0xff] %v1688_v29  ;;  %v1687_v58 = vadd.f32 %v1637_v44, %v1501_v20  ;;  %v1516_v43 = vadd.f32 %v7230_v24, %v9778_v41  ;;  %v1643_v3 = vld [vmem:[%s11396_s6 + $0x110] sm:$0xff]  ;;  %v1646_v24 = vld [vmem:[%s11396_s6 + $0x128] sm:$0xff] }
 0x23f   : > { %7538 = vmatmul.mubr.f32.gmra.mxu1 %v9650_v57  ;;  %v9826_v48 = vpop.f32.mrf.mxu0  ;;  %v1510_v12 = vpop.f32.mrf.mxu1  ;;  %7811 = vmatprep.subr.mxu0 %v6513_v55 }
 0x240   : > { %7636 = vmatmul.mubr.f32.gmra.mxu0 %v3372_v45  ;;  %7540 = vmatprep.mubr.f32.mxu1 %v9654_v62  ;;  %1737 = vst [vmem:[%s11396_s6 + $0xe0] sm:$0xff] %v1687_v58  ;;  %v1690_v57 = vadd.f32 %v1640_v33, %v1516_v43  ;;  %v1511_v6 = vadd.f32 %v9778_v41, %v1510_v12  ;;  %v3374_v62 = vld [vmem:[#allocation2 + $0xa8] sm:$0xff]  ;;  %v3379_v43 = vld [vmem:[#allocation2 + $0xd0] sm:$0xff]  ;;  %v1645_v12 = vld [vmem:[%s11396_s6 + $0x120] sm:$0xff] }
 0x241   : > { %7638 = vmatprep.mubr.f32.mxu0 %v3373_v42  ;;  %7707 = vmatpush3.msra.mxu1 %v6496_v38  ;;  %v9836_v56 = vpop.f32.mrf.mxu0  ;;  %v7233_v31 = vpop.f32.mrf.mxu1  ;;  %v6494_v42 = vld [vmem:[%s8254_s12 + $0x298] sm:$0xff] }
 0x242   : > { %1740 = vst [vmem:[%s11396_s6 + $0xf8] sm:$0xff] %v1690_v57  ;;  %v1689_v49 = vadd.f32 %v1639_v7, %v1511_v6  ;;  %v1526_v4 = vadd.f32 %v7233_v31, %v9778_v41  ;;  %7812 = vmatpush3.msra.mxu0 %v6513_v55  ;;  %7708 = vmatprep.subr.mxu1 %v6495_v21  ;;  %v1648_v6 = vld [vmem:[%s11396_s6 + $0x138] sm:$0xff] }
 0x243   : > { %7541 = vmatmul.mubr.f32.gmra.mxu1 %v9658_v15  ;;  %v1520_v63 = vpop.f32.mrf.mxu1  ;;  %v9854_v15 = vpop.f32.mrf.mxu0  ;;  %7813 = vmatprep.subr.mxu0 %v6512_v46  ;;  %v3380_v31 = vld [vmem:[#allocation2 + $0xd8] sm:$0xff] }
 0x244   : > { %7639 = vmatmul.mubr.f32.gmra.mxu0 %v3374_v62  ;;  %7543 = vmatprep.mubr.f32.mxu1 %v9662_v53  ;;  %1739 = vst [vmem:[%s11396_s6 + $0xf0] sm:$0xff] %v1689_v49  ;;  %v1692_v61 = vadd.f32 %v1642_v60, %v1526_v4  ;;  %v1521_v22 = vadd.f32 %v9778_v41, %v1520_v63  ;;  %v3376_v53 = vld [vmem:[#allocation2 + $0xb8] sm:$0xff]  ;;  %v3381_v49 = vld [vmem:[#allocation2 + $0xe0] sm:$0xff] }
 0x245   : > { %7641 = vmatprep.mubr.f32.mxu0 %v3375_v14  ;;  %7709 = vmatpush3.msra.mxu1 %v6495_v21  ;;  %v6511_v4 = vld [vmem:[%s8254_s12 + $0x320] sm:$0xff] }
 0x246   : > { %v7236_v34 = vpop.f32.mrf.mxu1  ;;  %1742 = vst [vmem:[%s11396_s6 + $0x108] sm:$0xff] %v1692_v61  ;;  %v1691_v23 = vadd.f32 %v1641_v37, %v1521_v22  ;;  %7814 = vmatpush3.msra.mxu0 %v6512_v46  ;;  %7710 = vmatprep.subr.mxu1 %v6494_v42  ;;  %v1650_v22 = vld [vmem:[%s11396_s6 + $0x148] sm:$0xff]  ;;  %v1649_v46 = vld [vmem:[%s11396_s6 + $0x140] sm:$0xff] }
 0x247   : > { %7544 = vmatmul.mubr.f32.gmra.mxu1 %v9666_v35  ;;  %v1536_v38 = vadd.f32 %v7236_v34, %v9778_v41  ;;  %v9870_v35 = vpop.f32.mrf.mxu0  ;;  %7815 = vmatprep.subr.mxu0 %v6511_v4  ;;  %v6493_v34 = vld [vmem:[%s8254_s12 + $0x290] sm:$0xff] }
 0x248   : > { %7642 = vmatmul.mubr.f32.gmra.mxu0 %v3376_v53  ;;  %v1530_v10 = vpop.f32.mrf.mxu1  ;;  %7546 = vmatprep.mubr.f32.mxu1 %v9672_v52  ;;  %1741 = vst [vmem:[%s11396_s6 + $0x100] sm:$0xff] %v1691_v23  ;;  %v3378_v52 = vld [vmem:[#allocation2 + $0xc8] sm:$0xff]  ;;  %v3383_v23 = vld [vmem:[#allocation2 + $0xf0] sm:$0xff] }
 0x249   : > { %7644 = vmatprep.mubr.f32.mxu0 %v3377_v28  ;;  %v1694_v44 = vadd.f32 %v1644_v13, %v1536_v38  ;;  %v1531_v29 = vadd.f32 %v9778_v41, %v1530_v10  ;;  %v9883_v45 = vpop.f32.mrf.mxu0  ;;  %7711 = vmatpush3.msra.mxu1 %v6494_v42  ;;  %v6510_v38 = vld [vmem:[%s8254_s12 + $0x318] sm:$0xff] }
 0x24a   : > { %v7239_v20 = vpop.f32.mrf.mxu1  ;;  %7816 = vmatpush3.msra.mxu0 %v6511_v4  ;;  %7712 = vmatprep.subr.mxu1 %v6493_v34 }
 0x24b   : > { %7547 = vmatmul.mubr.f32.gmra.mxu1 %v9676_v2  ;;  %1744 = vst [vmem:[%s11396_s6 + $0x118] sm:$0xff] %v1694_v44  ;;  %v1693_v33 = vadd.f32 %v1643_v3, %v1531_v29  ;;  %v1546_v58 = vadd.f32 %v7239_v20, %v9778_v41  ;;  %v1652_v29 = vld [vmem:[%s11396_s6 + $0x158] sm:$0xff]  ;;  %7817 = vmatprep.subr.mxu0 %v6510_v38  ;;  %v6492_v20 = vld [vmem:[%s8254_s12 + $0x288] sm:$0xff] }
 0x24c   : > { %7645 = vmatmul.mubr.f32.gmra.mxu0 %v3378_v52  ;;  %v1540_v55 = vpop.f32.mrf.mxu1  ;;  %7549 = vmatprep.mubr.f32.mxu1 %v9683_v18  ;;  %v9902_v18 = vpop.f32.mrf.mxu0 }
 0x24d   : > { %7647 = vmatprep.mubr.f32.mxu0 %v3379_v43  ;;  %1743 = vst [vmem:[%s11396_s6 + $0x110] sm:$0xff] %v1693_v33  ;;  %v1696_v2 = vadd.f32 %v1646_v24, %v1546_v58  ;;  %v1541_v7 = vadd.f32 %v9778_v41, %v1540_v55  ;;  %v3385_v58 = vld [vmem:[#allocation2 + $0x100] sm:$0xff]  ;;  %v6509_v43 = vld [vmem:[%s8254_s12 + $0x310] sm:$0xff]  ;;  %7713 = vmatpush3.msra.mxu1 %v6493_v34 }
 0x24e   : > { %v7242_v57 = vpop.f32.mrf.mxu1  ;;  %v9914_v37 = vpop.f32.mrf.mxu0  ;;  %7818 = vmatpush3.msra.mxu0 %v6510_v38  ;;  %7714 = vmatprep.subr.mxu1 %v6492_v20  ;;  %v3391_v38 = vld [vmem:[#allocation2 + $0x130] sm:$0xff] }
 0x24f   : > { %7550 = vmatmul.mubr.f32.gmra.mxu1 %v9686_v50  ;;  %1746 = vst [vmem:[%s11396_s6 + $0x128] sm:$0xff] %v1696_v2  ;;  %v1695_v60 = vadd.f32 %v1645_v12, %v1541_v7  ;;  %v1556_v62 = vadd.f32 %v7242_v57, %v9778_v41  ;;  %v1647_v50 = vld [vmem:[%s11396_s6 + $0x130] sm:$0xff]  ;;  %7819 = vmatprep.subr.mxu0 %v6509_v43  ;;  %v6491_v2 = vld [vmem:[%s8254_s12 + $0x280] sm:$0xff] }
 0x250   : > { %7648 = vmatmul.mubr.f32.gmra.mxu0 %v3380_v31  ;;  %v1550_v14 = vpop.f32.mrf.mxu1  ;;  %7552 = vmatprep.mubr.f32.mxu1 %v9690_v9  ;;  %v3382_v9 = vld [vmem:[#allocation2 + $0xe8] sm:$0xff] }
 0x251   : > { %7650 = vmatprep.mubr.f32.mxu0 %v3381_v49  ;;  %1745 = vst [vmem:[%s11396_s6 + $0x120] sm:$0xff] %v1695_v60  ;;  %v1698_v21 = vadd.f32 %v1648_v6, %v1556_v62  ;;  %v1551_v63 = vadd.f32 %v9778_v41, %v1550_v14  ;;  %v1654_v31 = vld [vmem:[%s11396_s6 + $0x168] sm:$0xff]  ;;  %v3387_v60 = vld [vmem:[#allocation2 + $0x110] sm:$0xff]  ;;  %7715 = vmatpush3.msra.mxu1 %v6492_v20  ;;  %v1653_v14 = vld [vmem:[%s11396_s6 + $0x160] sm:$0xff] }
 0x252   : > { %7820 = vmatpush3.msra.mxu0 %v6509_v43  ;;  %7716 = vmatprep.subr.mxu1 %v6491_v2 }
 0x253   : > { %v7245_v61 = vpop.f32.mrf.mxu1  ;;  %7553 = vmatmul.mubr.f32.gmra.mxu1 %v9693_v40  ;;  %1748 = vst [vmem:[%s11396_s6 + $0x138] sm:$0xff] %v1698_v21  ;;  %v1697_v13 = vadd.f32 %v1647_v50, %v1551_v63  ;;  %v9933_v40 = vpop.f32.mrf.mxu0  ;;  %v3388_v21 = vld [vmem:[#allocation2 + $0x118] sm:$0xff] }
 0x254   : > { %v1566_v53 = vadd.f32 %v7245_v61, %v9778_v41  ;;  %7651 = vmatmul.mubr.f32.gmra.mxu0 %v3382_v9  ;;  %7555 = vmatprep.mubr.f32.mxu1 %v9696_v59  ;;  %v3384_v59 = vld [vmem:[#allocation2 + $0xf8] sm:$0xff]  ;;  %v3389_v61 = vld [vmem:[#allocation2 + $0x120] sm:$0xff] }
 0x255   : > { %v1560_v28 = vpop.f32.mrf.mxu1  ;;  %7653 = vmatprep.mubr.f32.mxu0 %v3383_v23  ;;  %1747 = vst [vmem:[%s11396_s6 + $0x130] sm:$0xff] %v1697_v13  ;;  %v9944_v52 = vpop.f32.mrf.mxu0  ;;  %v9980_v63 = vld [vmem:[%s8254_s12 + $0x3f8] sm:$0xff]  ;;  %7717 = vmatpush3.msra.mxu1 %v6491_v2 }
 0x256   : > { %v1700_v10 = vadd.f32 %v1650_v22, %v1566_v53  ;;  %v1561_v3 = vadd.f32 %v9778_v41, %v1560_v28  ;;  %v6507_v22 = vld [vmem:[%s8254_s12 + $0x300] sm:$0xff]  ;;  %7900 = vmatprep.subr.mxu1 %v9980_v63  ;;  %v1656_v23 = vld [vmem:[%s11396_s6 + $0x178] sm:$0xff] }
 0x257   : > { %v7248_v44 = vpop.f32.mrf.mxu1  ;;  %7556 = vmatmul.mubr.f32.gmra.mxu1 %v9699_v47  ;;  %v1651_v47 = vld [vmem:[%s11396_s6 + $0x150] sm:$0xff]  ;;  %v9958_v7 = vpop.f32.mrf.mxu0 }
 0x258   : > { %1750 = vst [vmem:[%s11396_s6 + $0x148] sm:$0xff] %v1700_v10  ;;  %v1699_v24 = vadd.f32 %v1649_v46, %v1561_v3  ;;  %v1576_v33 = vadd.f32 %v7248_v44, %v9778_v41  ;;  %7654 = vmatmul.mubr.f32.gmra.mxu0 %v3384_v59  ;;  %7558 = vmatprep.mubr.f32.mxu1 %v9702_v25  ;;  %v3386_v25 = vld [vmem:[#allocation2 + $0x108] sm:$0xff]  ;;  %v1655_v46 = vld [vmem:[%s11396_s6 + $0x170] sm:$0xff]  ;;  %v3392_v44 = vld [vmem:[#allocation2 + $0x138] sm:$0xff] }
 0x259   : > { %v1570_v42 = vpop.f32.mrf.mxu1  ;;  %7656 = vmatprep.mubr.f32.mxu0 %v3385_v58  ;;  %v9972_v49 = vpop.f32.mrf.mxu0  ;;  %v3395_v58 = vld [vmem:[#allocation2 + $0x150] sm:$0xff] }
 0x25a   : > { %1749 = vst [vmem:[%s11396_s6 + $0x140] sm:$0xff] %v1699_v24  ;;  %v1702_v55 = vadd.f32 %v1652_v29, %v1576_v33  ;;  %v1571_v12 = vadd.f32 %v9778_v41, %v1570_v42  ;;  %v1658_v24 = vld [vmem:[%s11396_s6 + $0x188] sm:$0xff]  ;;  %v1657_v42 = vld [vmem:[%s11396_s6 + $0x180] sm:$0xff] }
 0x25b   : > { %7559 = vmatmul.mubr.f32.gmra.mxu1 %v9705_v32  ;;  %v6508_v32 = vld [vmem:[%s8254_s12 + $0x308] sm:$0xff]  ;;  %v9987_v34 = vpop.f32.mrf.mxu0 }
 0x25c   : > { %1752 = vst [vmem:[%s11396_s6 + $0x158] sm:$0xff] %v1702_v55  ;;  %v1701_v57 = vadd.f32 %v1651_v47, %v1571_v12  ;;  %v7251_v6 = vpop.f32.mrf.mxu1  ;;  %7657 = vmatmul.mubr.f32.gmra.mxu0 %v3386_v25  ;;  %7561 = vmatprep.mubr.f32.mxu1 %v9708_v17 }
 0x25d   : > { %v1586_v62 = vadd.f32 %v7251_v6, %v9778_v41  ;;  %7659 = vmatprep.mubr.f32.mxu0 %v3387_v60  ;;  %7821 = vmatprep.subr.mxu0 %v6508_v32 }
 0x25e   : > { %1751 = vst [vmem:[%s11396_s6 + $0x150] sm:$0xff] %v1701_v57  ;;  %v1580_v4 = vpop.f32.mrf.mxu1  ;;  %7822 = vmatpush3.msra.mxu0 %v6508_v32  ;;  %v3397_v57 = vld [vmem:[#allocation2 + $0x160] sm:$0xff]  ;;  %v3398_v32 = vld [vmem:[#allocation2 + $0x168] sm:$0xff] }
 0x25f   : > { %v1704_v17 = vadd.f32 %v1654_v31, %v1586_v62  ;;  %v1581_v50 = vadd.f32 %v9778_v41, %v1580_v4  ;;  %7562 = vmatmul.mubr.f32.gmra.mxu1 %v9711_v36  ;;  %v3390_v36 = vld [vmem:[#allocation2 + $0x128] sm:$0xff]  ;;  %7823 = vmatprep.subr.mxu0 %v6507_v22  ;;  %v3887_v62 = vld [vmem:[#allocation2 + $0x11] sm:$0xff] }
 0x260   : > { %7660 = vmatmul.mubr.f32.gmra.mxu0 %v3388_v21  ;;  %7564 = vmatprep.mubr.f32.mxu1 %v9714_v26  ;;  %v9995_v26 = vld [vmem:[%s8254_s12 + $0x478] sm:$0xff] }
 0x261   : > { %1754 = vst [vmem:[%s11396_s6 + $0x168] sm:$0xff] %v1704_v17  ;;  %v1703_v9 = vadd.f32 %v1653_v14, %v1581_v50  ;;  %7662 = vmatprep.mubr.f32.mxu0 %v3389_v61  ;;  %v9997_v13 = vpop.f32.mrf.mxu0  ;;  %7824 = vmatpush3.msra.mxu0 %v6507_v22  ;;  %v3399_v14 = vld [vmem:[#allocation2 + $0x170] sm:$0xff]  ;;  %v1610_v50 = vld [vmem:[%s11396_s6 + $0x8] sm:$0xff]  ;;  %v10056_v61 = vld [vmem:[#allocation2 + $0x19] sm:$0xff]  ;;  %v1361_v22 = vadd.f32 %v9778_v41, %v9789_v1 }
 0x262   : > { %8007 = vmatprep.subr.mxu0 %v9995_v26 }
 0x263   : > { %1753 = vst [vmem:[%s11396_s6 + $0x160] sm:$0xff] %v1703_v9  ;;  %7565 = vmatmul.mubr.f32.gmra.mxu1 %v9717_v19  ;;  %v10010_v29 = vpop.f32.mrf.mxu0 }
 0x264   : > { %v7254_v53 = vpop.f32.mrf.mxu1  ;;  %7663 = vmatmul.mubr.f32.gmra.mxu0 %v3390_v36  ;;  %7567 = vmatprep.mubr.f32.mxu1 %v9720_v11  ;;  %v3393_v11 = vld [vmem:[#allocation2 + $0x140] sm:$0xff]  ;;  %v3400_v36 = vld [vmem:[#allocation2 + $0x178] sm:$0xff] }
 0x265   : > { %v1596_v28 = vadd.f32 %v7254_v53, %v9778_v41  ;;  %7665 = vmatprep.mubr.f32.mxu0 %v3391_v38  ;;  %v6537_v53 = vld [vmem:[%s8254_s12 + $0x3f0] sm:$0xff]  ;;  %v1376_v38 = vadd.f32 %v9806_v51, %v9778_v41 }
 0x266   : > { %v1590_v19 = vpop.f32.mrf.mxu1  ;;  %v10082_v51 = vld [vmem:[#allocation2 + $0x29] sm:$0xff] }
 0x267   : > { %v1706_v10 = vadd.f32 %v1656_v23, %v1596_v28  ;;  %v1591_v3 = vadd.f32 %v9778_v41, %v1590_v19  ;;  %7568 = vmatmul.mubr.f32.gmra.mxu1 %v9723_v0  ;;  %v10016_v20 = vpop.f32.mrf.mxu0  ;;  %v1609_v23 = vld [vmem:[%s11396_s6] sm:$0xff] }
 0x268   : > { %7666 = vmatmul.mubr.f32.gmra.mxu0 %v3392_v44  ;;  %7570 = vmatprep.mubr.f32.mxu1 %v9727_v27  ;;  %v3394_v27 = vld [vmem:[#allocation2 + $0x148] sm:$0xff]  ;;  %v3401_v19 = vld [vmem:[#allocation2 + $0x180] sm:$0xff]  ;;  %v1659_v44 = vadd.f32 %v1609_v23, %v1361_v22 }
 0x269   : > { %1756 = vst [vmem:[%s11396_s6 + $0x178] sm:$0xff] %v1706_v10  ;;  %v1705_v59 = vadd.f32 %v1655_v46, %v1591_v3  ;;  %7668 = vmatprep.mubr.f32.mxu0 %v3393_v11  ;;  %v10030_v47 = vpop.f32.mrf.mxu0  ;;  %v1612_v46 = vld [vmem:[%s11396_s6 + $0x18] sm:$0xff]  ;;  %v1371_v11 = vadd.f32 %v9778_v41, %v9815_v8  ;;  %v1386_v8 = vadd.f32 %v9826_v48, %v9778_v41  ;;  %v1613_v22 = vld [vmem:[%s11396_s6 + $0x20] sm:$0xff] }
 0x26b   : > { %1755 = vst [vmem:[%s11396_s6 + $0x170] sm:$0xff] %v1705_v59  ;;  %v7257_v0 = vpop.f32.mrf.mxu1  ;;  %7571 = vmatmul.mubr.f32.gmra.mxu1 %v9732_v39  ;;  %v3396_v39 = vld [vmem:[#allocation2 + $0x158] sm:$0xff] }
 0x26c   : > { %v1606_v33 = vadd.f32 %v7257_v0, %v9778_v41  ;;  %7669 = vmatmul.mubr.f32.gmra.mxu0 %v3394_v27  ;;  %7573 = vmatprep.mubr.f32.mxu1 %v9737_v5  ;;  %v10089_v27 = vld [vmem:[#allocation2 + $0x31] sm:$0xff] }
 0x26d   : > { %7671 = vmatprep.mubr.f32.mxu0 %v3395_v58  ;;  %v1600_v43 = vpop.f32.mrf.mxu1  ;;  %v1662_v58 = vadd.f32 %v1612_v46, %v1376_v38  ;;  %v10134_v46 = vld [vmem:[#allocation2 + $0x49] sm:$0xff] }
 0x26e   : > { %v1708_v55 = vadd.f32 %v1658_v24, %v1606_v33  ;;  %v1601_v12 = vadd.f32 %v9778_v41, %v1600_v43  ;;  %v3402_v24 = vld [vmem:[#allocation2 + $0x188] sm:$0xff] }
 0x26f   : > { %v7292_v25 = vpop.f32.mrf.mxu1  ;;  %7574 = vmatmul.mubr.f32.gmra.mxu1 %v9742_v16  ;;  %v2872_v16 = vld [vmem:[#allocation2 + $0x197] sm:$0xff]  ;;  %v6536_v33 = vld [vmem:[%s8254_s12 + $0x3e8] sm:$0xff] }
 0x270   : > { %1758 = vst [vmem:[%s11396_s6 + $0x188] sm:$0xff] %v1708_v55  ;;  %v1707_v5 = vadd.f32 %v1657_v42, %v1601_v12  ;;  %v10037_v2 = vpop.f32.mrf.mxu0  ;;  %7672 = vmatmul.mubr.f32.gmra.mxu0 %v3396_v39  ;;  %7576 = vmatprep.mubr.f32.mxu1 %v9746_v30  ;;  %v1366_v30 = vadd.f32 %v9780_v54, %v9778_v41  ;;  %v10063_v54 = vld [vmem:[#allocation2 + $0x21] sm:$0xff]  ;;  %v3403_v42 = vld [vmem:[#allocation2 + $0x190] sm:$0xff] }
 0x271   : > { %7674 = vmatprep.mubr.f32.mxu0 %v3397_v57  ;;  %v1892_v6 = vpop.f32.mrf.mxu1  ;;  %v1614_v39 = vld [vmem:[%s11396_s6 + $0x28] sm:$0xff]  ;;  %v10103_v57 = vld [vmem:[#allocation2 + $0x39] sm:$0xff] }
 0x272   : > { %1757 = vst [vmem:[%s11396_s6 + $0x180] sm:$0xff] %v1707_v5  ;;  %v10043_v31 = vpop.f32.mrf.mxu0  ;;  %v1660_v1 = vadd.f32 %v1610_v50, %v1366_v30  ;;  %v2191_v55 = vadd.f32 %v1892_v6, %v1659_v44  ;;  %v10113_v30 = vld [vmem:[#allocation2 + $0x41] sm:$0xff] }
 0x273   : > { %v7295_v60 = vpop.f32.mrf.mxu1  ;;  %7577 = vmatmul.mubr.f32.gmra.mxu1 %v2872_v16  ;;  %v6535_v50 = vld [vmem:[%s8254_s12 + $0x3e0] sm:$0xff] }
 0x274   : > { %v10045_v4 = vpop.f32.mrf.mxu0  ;;  %7675 = vmatmul.mubr.f32.gmra.mxu0 %v3398_v32  ;;  %7718 = vmatprep.mubr.f32.mxu1 %v3887_v62  ;;  %v2192_v59 = vadd.f32 %v7292_v25, %v1660_v1  ;;  %v1381_v32 = vadd.f32 %v9778_v41, %v9836_v56  ;;  %v2194_v48 = vadd.f32 %v7295_v60, %v1662_v58 }
 0x275   : > { %7677 = vmatprep.mubr.f32.mxu0 %v3399_v14  ;;  %v10049_v17 = vpop.f32.mrf.mxu1  ;;  %v3404_v14 = vld [vmem:[#allocation2 + $0x198] sm:$0xff]  ;;  %v1396_v56 = vadd.f32 %v9854_v15, %v9778_v41 }
 0x276   : > { %v10054_v21 = vpop.f32.mrf.mxu0  ;;  %v1663_v44 = vadd.f32 %v1613_v22, %v1381_v32  ;;  %v1617_v32 = vld [vmem:[%s11396_s6 + $0x40] sm:$0xff] }
 0x277   : > { %v10060_v9 = vpop.f32.mrf.mxu1  ;;  %7719 = vmatmul.mubr.f32.vlgmr.msra.gmra.mxu1 %v10056_v61 }
 0x278   : > { %v10071_v28 = vpop.f32.mrf.mxu0  ;;  %7678 = vmatmul.mubr.f32.gmra.mxu0 %v3400_v36  ;;  %7721 = vmatprep.mubr.f32.mxu1 %v10063_v54  ;;  %v1664_v36 = vadd.f32 %v1614_v39, %v1386_v8  ;;  %v1618_v8 = vld [vmem:[%s11396_s6 + $0x48] sm:$0xff] }
 0x279   : > { %7680 = vmatprep.mubr.f32.mxu0 %v3401_v19  ;;  %v10077_v10 = vpop.f32.mrf.mxu1  ;;  %7901 = vmatpush3.msra.mxu1 %v9980_v63  ;;  %v1611_v63 = vld [vmem:[%s11396_s6 + $0x10] sm:$0xff]  ;;  %v1391_v19 = vadd.f32 %v9778_v41, %v9870_v35 }
 0x27a   : > { %v10080_v3 = vpop.f32.mrf.mxu0  ;;  %7902 = vmatprep.subr.mxu1 %v6537_v53  ;;  %v1661_v16 = vadd.f32 %v1611_v63, %v1371_v11  ;;  %v2196_v11 = vadd.f32 %v10060_v9, %v1664_v36  ;;  %v10146_v35 = vld [vmem:[#allocation2 + $0x51] sm:$0xff]  ;;  %v1406_v9 = vadd.f32 %v9883_v45, %v9778_v41  ;;  %v2195_v63 = vadd.f32 %v10077_v10, %v1663_v44  ;;  %v6552_v10 = vld [vmem:[%s8254_s12 + $0x468] sm:$0xff] }
 0x27b   : > { %v10086_v0 = vpop.f32.mrf.mxu1  ;;  %7722 = vmatmul.mubr.f32.gmra.mxu1 %v10082_v51  ;;  %v1619_v36 = vld [vmem:[%s11396_s6 + $0x50] sm:$0xff]  ;;  %v1426_v44 = vadd.f32 %v9944_v52, %v9778_v41  ;;  %v10229_v52 = vld [vmem:[#allocation2 + $0x79] sm:$0xff] }
 0x27c   : > { %v7399_v43 = vpop.f32.mrf.mxu0  ;;  %7681 = vmatmul.mubr.f32.gmra.mxu0 %v3402_v24  ;;  %7724 = vmatprep.mubr.f32.mxu1 %v10089_v27  ;;  %v2193_v23 = vadd.f32 %v10049_v17, %v1661_v16  ;;  %v1615_v17 = vld [vmem:[%s11396_s6 + $0x30] sm:$0xff]  ;;  %v6534_v16 = vld [vmem:[%s8254_s12 + $0x3d8] sm:$0xff] }
 0x27d   : > { %v2724_v12 = vadd.f32 %v7399_v43, %v2192_v59  ;;  %7683 = vmatprep.mubr.f32.mxu0 %v3403_v42  ;;  %v10098_v25 = vpop.f32.mrf.mxu1  ;;  %7903 = vmatpush3.msra.mxu1 %v6537_v53  ;;  %v1616_v53 = vld [vmem:[%s11396_s6 + $0x38] sm:$0xff]  ;;  %v6553_v24 = vld [vmem:[%s8254_s12 + $0x470] sm:$0xff] }
 0x27e   : > { %v2424_v5 = vpop.f32.mrf.mxu0  ;;  %7904 = vmatprep.subr.mxu1 %v6536_v33 }
 0x27f   : > { %2774 = vst [vmem:[%s11396_s6 + $0x8] sm:$0xff] %v2724_v12  ;;  %v2723_v6 = vadd.f32 %v2424_v5, %v2191_v55  ;;  %v10110_v62 = vpop.f32.mrf.mxu1  ;;  %7725 = vmatmul.mubr.f32.gmra.mxu1 %v10103_v57  ;;  %v10164_v55 = vld [vmem:[#allocation2 + $0x59] sm:$0xff]  ;;  %v10176_v5 = vld [vmem:[#allocation2 + $0x61] sm:$0xff] }
 0x280   : > { %v7402_v60 = vpop.f32.mrf.mxu0  ;;  %7684 = vmatmul.mubr.f32.gmra.mxu0 %v3404_v14  ;;  %7727 = vmatprep.mubr.f32.mxu1 %v10113_v30  ;;  %v1620_v14 = vld [vmem:[%s11396_s6 + $0x58] sm:$0xff] }
 0x281   : > { %2773 = vst [vmem:[%s11396_s6] sm:$0xff] %v2723_v6  ;;  %v2726_v38 = vadd.f32 %v7402_v60, %v2194_v48  ;;  %7825 = vmatprep.mubr.f32.mxu0 %v10056_v61  ;;  %v10130_v15 = vpop.f32.mrf.mxu1  ;;  %7905 = vmatpush3.msra.mxu1 %v6536_v33  ;;  %v1666_v33 = vadd.f32 %v1616_v53, %v1396_v56  ;;  %v6551_v48 = vld [vmem:[%s8254_s12 + $0x460] sm:$0xff]  ;;  %v10199_v60 = vld [vmem:[#allocation2 + $0x69] sm:$0xff] }
 0x282   : > { %v2434_v1 = vpop.f32.mrf.mxu0  ;;  %7906 = vmatprep.subr.mxu1 %v6535_v50  ;;  %v1668_v6 = vadd.f32 %v1618_v8, %v1406_v9  ;;  %v6549_v8 = vld [vmem:[%s8254_s12 + $0x450] sm:$0xff] }
 0x283   : > { %2776 = vst [vmem:[%s11396_s6 + $0x18] sm:$0xff] %v2726_v38  ;;  %v2725_v61 = vadd.f32 %v2434_v1, %v2193_v23  ;;  %v10143_v59 = vpop.f32.mrf.mxu1  ;;  %7728 = vmatmul.mubr.f32.gmra.mxu1 %v10134_v46  ;;  %v6533_v38 = vld [vmem:[%s8254_s12 + $0x3d0] sm:$0xff] }
 0x284   : > { %v7405_v58 = vpop.f32.mrf.mxu0  ;;  %7826 = vmatmul.mubr.f32.vlgmr.msra.gmra.mxu0 %v10063_v54  ;;  %7730 = vmatprep.mubr.f32.mxu1 %v10146_v35  ;;  %v1665_v54 = vadd.f32 %v1615_v17, %v1391_v19 }
 0x285   : > { %2775 = vst [vmem:[%s11396_s6 + $0x10] sm:$0xff] %v2725_v61  ;;  %v2728_v43 = vadd.f32 %v7405_v58, %v2196_v11  ;;  %8008 = vmatpush3.msra.mxu0 %v9995_v26  ;;  %7828 = vmatprep.mubr.f32.mxu0 %v10082_v51  ;;  %v10159_v42 = vpop.f32.mrf.mxu1  ;;  %v1401_v26 = vadd.f32 %v9778_v41, %v9902_v18 }
 0x286   : > { %v2444_v45 = vpop.f32.mrf.mxu0  ;;  %8009 = vmatprep.subr.mxu0 %v6553_v24  ;;  %7907 = vmatpush3.msra.mxu1 %v6535_v50  ;;  %v2198_v51 = vadd.f32 %v10086_v0, %v1666_v33  ;;  %v1416_v18 = vadd.f32 %v9914_v37, %v9778_v41  ;;  %v2197_v50 = vadd.f32 %v10098_v25, %v1665_v54  ;;  %v1621_v54 = vld [vmem:[%s11396_s6 + $0x60] sm:$0xff] }
 0x287   : > { %2778 = vst [vmem:[%s11396_s6 + $0x28] sm:$0xff] %v2728_v43  ;;  %v2727_v12 = vadd.f32 %v2444_v45, %v2195_v63  ;;  %v10173_v39 = vpop.f32.mrf.mxu1  ;;  %7731 = vmatmul.mubr.f32.gmra.mxu1 %v10164_v55  ;;  %8010 = vmatpush3.msra.mxu0 %v6553_v24  ;;  %v1667_v25 = vadd.f32 %v1617_v32, %v1401_v26  ;;  %v1622_v24 = vld [vmem:[%s11396_s6 + $0x68] sm:$0xff]  ;;  %v1623_v32 = vld [vmem:[%s11396_s6 + $0x70] sm:$0xff] }
 0x288   : > { %v7408_v0 = vpop.f32.mrf.mxu0  ;;  %7829 = vmatmul.mubr.f32.gmra.mxu0 %v10089_v27  ;;  %7733 = vmatprep.mubr.f32.mxu1 %v10176_v5  ;;  %v1411_v27 = vadd.f32 %v9778_v41, %v9933_v40  ;;  %v10211_v40 = vld [vmem:[#allocation2 + $0x71] sm:$0xff]  ;;  %v1670_v19 = vadd.f32 %v1620_v14, %v1416_v18  ;;  %v10240_v63 = vld [vmem:[#allocation2 + $0x81] sm:$0xff]  ;;  %v1672_v45 = vadd.f32 %v1622_v24, %v1426_v44 }
 0x289   : > { %2777 = vst [vmem:[%s11396_s6 + $0x20] sm:$0xff] %v2727_v12  ;;  %v2730_v22 = vadd.f32 %v7408_v0, %v2198_v51  ;;  %7831 = vmatprep.mubr.f32.mxu0 %v10103_v57  ;;  %v10195_v37 = vpop.f32.mrf.mxu1  ;;  %8011 = vmatprep.subr.mxu0 %v6552_v10  ;;  %v2200_v57 = vadd.f32 %v10110_v62, %v1668_v6  ;;  %v6550_v62 = vld [vmem:[%s8254_s12 + $0x458] sm:$0xff]  ;;  %v6532_v43 = vld [vmem:[%s8254_s12 + $0x3c8] sm:$0xff] }
 0x28a   : > { %v2454_v56 = vpop.f32.mrf.mxu0  ;;  %8012 = vmatpush3.msra.mxu0 %v6552_v10  ;;  %7908 = vmatprep.subr.mxu1 %v6534_v16  ;;  %v2199_v17 = vadd.f32 %v10130_v15, %v1667_v25  ;;  %v1421_v15 = vadd.f32 %v9778_v41, %v9958_v7  ;;  %v1436_v7 = vadd.f32 %v9972_v49, %v9778_v41  ;;  %v1624_v10 = vld [vmem:[%s11396_s6 + $0x78] sm:$0xff]  ;;  %v1626_v25 = vld [vmem:[%s11396_s6 + $0x88] sm:$0xff] }
 0x28b   : > { %2780 = vst [vmem:[%s11396_s6 + $0x38] sm:$0xff] %v2730_v22  ;;  %v2729_v53 = vadd.f32 %v2454_v56, %v2197_v50  ;;  %v10208_v23 = vpop.f32.mrf.mxu1  ;;  %7734 = vmatmul.mubr.f32.gmra.mxu1 %v10199_v60  ;;  %8013 = vmatprep.subr.mxu0 %v6551_v48  ;;  %v1446_v50 = vadd.f32 %v9997_v13, %v9778_v41  ;;  %v10296_v13 = vld [vmem:[%s8249_s9] ss:$0 sm:$0xff] }
 0x28c   : > { %v7411_v1 = vpop.f32.mrf.mxu0  ;;  %7832 = vmatmul.mubr.f32.gmra.mxu0 %v10113_v30  ;;  %7736 = vmatprep.mubr.f32.mxu1 %v10211_v40  ;;  %v1669_v30 = vadd.f32 %v1619_v36, %v1411_v27  ;;  %v1674_v6 = vadd.f32 %v1624_v10, %v1436_v7 }
 0x28d   : > { %2779 = vst [vmem:[%s11396_s6 + $0x30] sm:$0xff] %v2729_v53  ;;  %v2732_v11 = vadd.f32 %v7411_v1, %v2200_v57  ;;  %7834 = vmatprep.mubr.f32.mxu0 %v10134_v46  ;;  %v10224_v61 = vpop.f32.mrf.mxu1  ;;  %7909 = vmatpush3.msra.mxu1 %v6534_v16  ;;  %v2202_v46 = vadd.f32 %v10143_v59, %v1670_v19  ;;  %v10263_v16 = vld [vmem:[#allocation2 + $0x89] sm:$0xff]  ;;  %v6530_v19 = vld [vmem:[%s8254_s12 + $0x3b8] sm:$0xff]  ;;  %v1625_v1 = vld [vmem:[%s11396_s6 + $0x80] sm:$0xff] }
 0x28e   : > { %v2464_v33 = vpop.f32.mrf.mxu0  ;;  %8014 = vmatpush3.msra.mxu0 %v6551_v48  ;;  %7910 = vmatprep.subr.mxu1 %v6533_v38  ;;  %v2201_v26 = vadd.f32 %v10159_v42, %v1669_v30  ;;  %v1671_v42 = vadd.f32 %v1621_v54, %v1421_v15  ;;  %v6531_v48 = vld [vmem:[%s8254_s12 + $0x3c0] sm:$0xff]  ;;  %v1676_v44 = vadd.f32 %v1626_v25, %v1446_v50  ;;  %v1627_v15 = vld [vmem:[%s11396_s6 + $0x90] sm:$0xff] }
 0x28f   : > { %2782 = vst [vmem:[%s11396_s6 + $0x48] sm:$0xff] %v2732_v11  ;;  %v2731_v58 = vadd.f32 %v2464_v33, %v2199_v17  ;;  %v10237_v9 = vpop.f32.mrf.mxu1  ;;  %7737 = vmatmul.mubr.f32.gmra.mxu1 %v10229_v52  ;;  %8015 = vmatprep.subr.mxu0 %v6550_v62  ;;  %v1628_v17 = vld [vmem:[%s11396_s6 + $0x98] sm:$0xff]  ;;  %v10330_v33 = vld [vmem:[#allocation2 + $0xa9] sm:$0xff] }
 0x290   : > { %v7414_v59 = vpop.f32.mrf.mxu0  ;;  %7835 = vmatmul.mubr.f32.gmra.mxu0 %v10146_v35  ;;  %7739 = vmatprep.mubr.f32.mxu1 %v10240_v63  ;;  %v1431_v35 = vadd.f32 %v9778_v41, %v9987_v34  ;;  %v10275_v34 = vld [vmem:[#allocation2 + $0x91] sm:$0xff]  ;;  %v2203_v22 = vadd.f32 %v10195_v37, %v1671_v42  ;;  %v10293_v41 = vld [vmem:[#allocation2 + $0x99] sm:$0xff]  ;;  %v1441_v37 = vadd.f32 %v10296_v13, %v10010_v29  ;;  %v10371_v42 = vld [vmem:[#allocation2 + $0xc1] sm:$0xff] }
 0x291   : > { %2781 = vst [vmem:[%s11396_s6 + $0x40] sm:$0xff] %v2731_v58  ;;  %v2734_v51 = vadd.f32 %v7414_v59, %v2202_v46  ;;  %7837 = vmatprep.mubr.f32.mxu0 %v10164_v55  ;;  %v10259_v49 = vpop.f32.mrf.mxu1  ;;  %7911 = vmatpush3.msra.mxu1 %v6533_v38  ;;  %v2204_v55 = vadd.f32 %v10173_v39, %v1672_v45  ;;  %v6548_v39 = vld [vmem:[%s8254_s12 + $0x448] sm:$0xff] }
 0x292   : > { %v2474_v12 = vpop.f32.mrf.mxu0  ;;  %8016 = vmatpush3.msra.mxu0 %v6550_v62  ;;  %7912 = vmatprep.subr.mxu1 %v6532_v43  ;;  %v10307_v38 = vld [vmem:[#allocation2 + $0xa1] sm:$0xff]  ;;  %v1456_v29 = vadd.f32 %v10296_v13, %v10016_v20  ;;  %v1466_v59 = vadd.f32 %v10296_v13, %v10037_v2  ;;  %v10360_v2 = vld [vmem:[#allocation2 + $0xb9] sm:$0xff] }
 0x293   : > { %2784 = vst [vmem:[%s11396_s6 + $0x58] sm:$0xff] %v2734_v51  ;;  %v2733_v18 = vadd.f32 %v2474_v12, %v2201_v26  ;;  %v10272_v0 = vpop.f32.mrf.mxu1  ;;  %7740 = vmatmul.mubr.f32.gmra.mxu1 %v10263_v16  ;;  %8017 = vmatprep.subr.mxu0 %v6549_v8  ;;  %v6547_v62 = vld [vmem:[%s8254_s12 + $0x440] sm:$0xff]  ;;  %v1630_v26 = vld [vmem:[%s11396_s6 + $0xa8] sm:$0xff] }
 0x294   : > { %v7417_v14 = vpop.f32.mrf.mxu0  ;;  %7838 = vmatmul.mubr.f32.gmra.mxu0 %v10176_v5  ;;  %7742 = vmatprep.mubr.f32.mxu1 %v10275_v34  ;;  %v1673_v5 = vadd.f32 %v1623_v32, %v1431_v35  ;;  %v1678_v54 = vadd.f32 %v1628_v17, %v1456_v29  ;;  %v6528_v32 = vld [vmem:[%s8254_s12 + $0x3a8] sm:$0xff] }
 0x295   : > { %2783 = vst [vmem:[%s11396_s6 + $0x50] sm:$0xff] %v2733_v18  ;;  %v2736_v27 = vadd.f32 %v7417_v14, %v2204_v55  ;;  %7840 = vmatprep.mubr.f32.mxu0 %v10199_v60  ;;  %v10288_v56 = vpop.f32.mrf.mxu1  ;;  %7913 = vmatpush3.msra.mxu1 %v6532_v43  ;;  %v2206_v60 = vadd.f32 %v10208_v23, %v1674_v6  ;;  %v6529_v43 = vld [vmem:[%s8254_s12 + $0x3b0] sm:$0xff]  ;;  %v1629_v55 = vld [vmem:[%s11396_s6 + $0xa0] sm:$0xff]  ;;  %v1632_v6 = vld [vmem:[%s11396_s6 + $0xb8] sm:$0xff] }
 0x296   : > { %v2484_v36 = vpop.f32.mrf.mxu0  ;;  %8018 = vmatpush3.msra.mxu0 %v6549_v8  ;;  %7914 = vmatprep.subr.mxu1 %v6531_v48  ;;  %v2205_v11 = vadd.f32 %v10224_v61, %v1673_v5  ;;  %v1675_v61 = vadd.f32 %v1625_v1, %v1441_v37  ;;  %v2210_v35 = vadd.f32 %v10272_v0, %v1678_v54  ;;  %v6545_v0 = vld [vmem:[%s8254_s12 + $0x430] sm:$0xff] }
 0x297   : > { %2786 = vst [vmem:[%s11396_s6 + $0x68] sm:$0xff] %v2736_v27  ;;  %v2735_v57 = vadd.f32 %v2484_v36, %v2203_v22  ;;  %v10304_v53 = vpop.f32.mrf.mxu1  ;;  %7743 = vmatmul.mubr.f32.gmra.mxu1 %v10293_v41  ;;  %8019 = vmatprep.subr.mxu0 %v6548_v39  ;;  %v10394_v22 = vld [vmem:[#allocation2 + $0xc9] sm:$0xff] }
 0x298   : > { %v7420_v23 = vpop.f32.mrf.mxu0  ;;  %7841 = vmatmul.mubr.f32.gmra.mxu0 %v10211_v40  ;;  %7745 = vmatprep.mubr.f32.mxu1 %v10307_v38  ;;  %v1451_v40 = vadd.f32 %v10296_v13, %v10030_v47  ;;  %v10342_v47 = vld [vmem:[#allocation2 + $0xb1] sm:$0xff]  ;;  %v2207_v8 = vadd.f32 %v10259_v49, %v1675_v61  ;;  %v1461_v49 = vadd.f32 %v10296_v13, %v10043_v31 }
 0x299   : > { %2785 = vst [vmem:[%s11396_s6 + $0x60] sm:$0xff] %v2735_v57  ;;  %v2738_v30 = vadd.f32 %v7420_v23, %v2206_v60  ;;  %7843 = vmatprep.mubr.f32.mxu0 %v10229_v52  ;;  %v10326_v20 = vpop.f32.mrf.mxu1  ;;  %7915 = vmatpush3.msra.mxu1 %v6531_v48  ;;  %v2208_v52 = vadd.f32 %v10237_v9, %v1676_v44  ;;  %v6546_v9 = vld [vmem:[%s8254_s12 + $0x438] sm:$0xff]  ;;  %v6544_v57 = vld [vmem:[%s8254_s12 + $0x428] sm:$0xff] }
 0x29a   : > { %v2494_v24 = vpop.f32.mrf.mxu0  ;;  %8020 = vmatpush3.msra.mxu0 %v6548_v39  ;;  %7916 = vmatprep.subr.mxu1 %v6530_v19  ;;  %v1476_v31 = vadd.f32 %v10296_v13, %v10045_v4  ;;  %v1680_v48 = vadd.f32 %v1630_v26, %v1466_v59  ;;  %v1679_v27 = vadd.f32 %v1629_v55, %v1461_v49  ;;  %v1634_v23 = vld [vmem:[%s11396_s6 + $0xc8] sm:$0xff]  ;;  %v6525_v59 = vld [vmem:[%s8254_s12 + $0x390] sm:$0xff]  ;;  %v10476_v49 = vld [vmem:[#allocation2 + $0xf9] sm:$0xff] }
 0x29b   : > { %2788 = vst [vmem:[%s11396_s6 + $0x78] sm:$0xff] %v2738_v30  ;;  %v2737_v46 = vadd.f32 %v2494_v24, %v2205_v11  ;;  %v10339_v58 = vpop.f32.mrf.mxu1  ;;  %7746 = vmatmul.mubr.f32.gmra.mxu1 %v10330_v33  ;;  %8021 = vmatprep.subr.mxu0 %v6547_v62  ;;  %v1481_v44 = vadd.f32 %v10296_v13, %v10080_v3  ;;  %v1633_v24 = vld [vmem:[%s11396_s6 + $0xc0] sm:$0xff]  ;;  %v2167_v55 = vld [vmem:[%s11396_s6 + $0xd0] sm:$0xff] }
 0x29c   : > { %v7423_v7 = vpop.f32.mrf.mxu0  ;;  %7844 = vmatmul.mubr.f32.gmra.mxu0 %v10240_v63  ;;  %7748 = vmatprep.mubr.f32.mxu1 %v10342_v47  ;;  %v1677_v63 = vadd.f32 %v1627_v15, %v1451_v40  ;;  %v2212_v5 = vadd.f32 %v10304_v53, %v1680_v48  ;;  %v1682_v37 = vadd.f32 %v1632_v6, %v1476_v31  ;;  %v6526_v40 = vld [vmem:[%s8254_s12 + $0x398] sm:$0xff] }
 0x29d   : > { %2787 = vst [vmem:[%s11396_s6 + $0x70] sm:$0xff] %v2737_v46  ;;  %v2740_v45 = vadd.f32 %v7423_v7, %v2208_v52  ;;  %7846 = vmatprep.mubr.f32.mxu0 %v10263_v16  ;;  %v10355_v10 = vpop.f32.mrf.mxu1  ;;  %7917 = vmatpush3.msra.mxu1 %v6530_v19  ;;  %v1486_v53 = vadd.f32 %v10296_v13, %v10071_v28  ;;  %v10424_v28 = vld [vmem:[#allocation2 + $0xd9] sm:$0xff] }
 0x29e   : > { %v2504_v51 = vpop.f32.mrf.mxu0  ;;  %8022 = vmatpush3.msra.mxu0 %v6547_v62  ;;  %7918 = vmatprep.subr.mxu1 %v6529_v43  ;;  %v2209_v14 = vadd.f32 %v10288_v56, %v1677_v63  ;;  %v1631_v56 = vld [vmem:[%s11396_s6 + $0xb0] sm:$0xff]  ;;  %v2211_v19 = vadd.f32 %v10326_v20, %v1679_v27  ;;  %v2214_v17 = vadd.f32 %v10339_v58, %v1682_v37  ;;  %v10435_v20 = vld [vmem:[#allocation2 + $0xe1] sm:$0xff] }
 0x29f   : > { %2790 = vst [vmem:[%s11396_s6 + $0x88] sm:$0xff] %v2740_v45  ;;  %v2739_v12 = vadd.f32 %v2504_v51, %v2207_v8  ;;  %v10368_v16 = vpop.f32.mrf.mxu1  ;;  %7749 = vmatmul.mubr.f32.gmra.mxu1 %v10360_v2  ;;  %8023 = vmatprep.subr.mxu0 %v6546_v9  ;;  %v10451_v58 = vld [vmem:[#allocation2 + $0xe9] sm:$0xff]  ;;  %v6542_v45 = vld [vmem:[%s8254_s12 + $0x418] sm:$0xff] }
 0x2a0   : > { %v7426_v18 = vpop.f32.mrf.mxu0  ;;  %7847 = vmatmul.mubr.f32.gmra.mxu0 %v10275_v34  ;;  %7751 = vmatprep.mubr.f32.mxu1 %v10371_v42  ;;  %v1471_v34 = vadd.f32 %v10296_v13, %v10054_v21  ;;  %v10406_v21 = vld [vmem:[#allocation2 + $0xd1] sm:$0xff]  ;;  %v6543_v13 = vld [vmem:[%s8254_s12 + $0x420] sm:$0xff] }
 0x2a1   : > { %2789 = vst [vmem:[%s11396_s6 + $0x80] sm:$0xff] %v2739_v12  ;;  %v2742_v39 = vadd.f32 %v7426_v18, %v2210_v35  ;;  %7849 = vmatprep.mubr.f32.mxu0 %v10293_v41  ;;  %v10390_v4 = vpop.f32.mrf.mxu1  ;;  %7919 = vmatpush3.msra.mxu1 %v6529_v43  ;;  %v6527_v41 = vld [vmem:[%s8254_s12 + $0x3a0] sm:$0xff]  ;;  %v2168_v51 = vld [vmem:[%s11396_s6 + $0xd8] sm:$0xff]  ;;  %v6541_v18 = vld [vmem:[%s8254_s12 + $0x410] sm:$0xff] }
 0x2a2   : > { %v2514_v50 = vpop.f32.mrf.mxu0  ;;  %8024 = vmatpush3.msra.mxu0 %v6546_v9  ;;  %7920 = vmatprep.subr.mxu1 %v6528_v32  ;;  %v10460_v9 = vld [vmem:[#allocation2 + $0xf1] sm:$0xff] }
 0x2a3   : > { %2792 = vst [vmem:[%s11396_s6 + $0x98] sm:$0xff] %v2742_v39  ;;  %v2741_v25 = vadd.f32 %v2514_v50, %v2209_v14  ;;  %v10403_v36 = vpop.f32.mrf.mxu1  ;;  %7752 = vmatmul.mubr.f32.gmra.mxu1 %v10394_v22  ;;  %8025 = vmatprep.subr.mxu0 %v6545_v0  ;;  %v2170_v14 = vld [vmem:[%s11396_s6 + $0xe8] sm:$0xff]  ;;  %v10513_v27 = vld [vmem:[#allocation2 + $0x111] sm:$0xff] }
 0x2a4   : > { %v7429_v60 = vpop.f32.mrf.mxu0  ;;  %7850 = vmatmul.mubr.f32.gmra.mxu0 %v10307_v38  ;;  %7754 = vmatprep.mubr.f32.mxu1 %v10406_v21  ;;  %v1681_v38 = vadd.f32 %v1631_v56, %v1471_v34  ;;  %v2218_v35 = vadd.f32 %v10403_v36, %v2168_v51  ;;  %v6523_v56 = vld [vmem:[%s8254_s12 + $0x380] sm:$0xff]  ;;  %v6540_v36 = vld [vmem:[%s8254_s12 + $0x408] sm:$0xff] }
 0x2a5   : > { %2791 = vst [vmem:[%s11396_s6 + $0x90] sm:$0xff] %v2741_v25  ;;  %v2744_v1 = vadd.f32 %v7429_v60, %v2212_v5  ;;  %7852 = vmatprep.mubr.f32.mxu0 %v10330_v33  ;;  %v10419_v29 = vpop.f32.mrf.mxu1  ;;  %7921 = vmatpush3.msra.mxu1 %v6528_v32  ;;  %v1684_v33 = vadd.f32 %v1634_v23, %v1486_v53  ;;  %v6524_v32 = vld [vmem:[%s8254_s12 + $0x388] sm:$0xff]  ;;  %v2169_v5 = vld [vmem:[%s11396_s6 + $0xe0] sm:$0xff]  ;;  %v2172_v60 = vld [vmem:[%s11396_s6 + $0xf8] sm:$0xff] }
 0x2a6   : > { %v2524_v62 = vpop.f32.mrf.mxu0  ;;  %8026 = vmatpush3.msra.mxu0 %v6545_v0  ;;  %7922 = vmatprep.subr.mxu1 %v6527_v41  ;;  %v2213_v61 = vadd.f32 %v10355_v10, %v1681_v38  ;;  %v2217_v0 = vadd.f32 %v2167_v55, %v10419_v29  ;;  %v3920_v53 = vld [vmem:[#allocation2 + $0x119] sm:$0xff]  ;;  %v3921_v38 = vld [vmem:[#allocation2 + $0x121] sm:$0xff]  ;;  %v2171_v23 = vld [vmem:[%s11396_s6 + $0xf0] sm:$0xff] }
 0x2a7   : > { %2794 = vst [vmem:[%s11396_s6 + $0xa8] sm:$0xff] %v2744_v1  ;;  %v2743_v11 = vadd.f32 %v2524_v62, %v2211_v19  ;;  %v10432_v30 = vpop.f32.mrf.mxu1  ;;  %7755 = vmatmul.mubr.f32.gmra.mxu1 %v10424_v28  ;;  %8027 = vmatprep.subr.mxu0 %v6544_v57  ;;  %v2216_v43 = vadd.f32 %v10368_v16, %v1684_v33  ;;  %v3923_v33 = vld [vmem:[#allocation2 + $0x131] sm:$0xff]  ;;  %v2177_v55 = vld [vmem:[%s11396_s6 + $0x120] sm:$0xff] }
 0x2a8   : > { %v7432_v3 = vpop.f32.mrf.mxu0  ;;  %7853 = vmatmul.mubr.f32.gmra.mxu0 %v10342_v47  ;;  %7757 = vmatprep.mubr.f32.mxu1 %v10435_v20  ;;  %v1683_v47 = vadd.f32 %v1633_v24, %v1481_v44  ;;  %v2220_v34 = vadd.f32 %v10432_v30, %v2170_v14  ;;  %v2174_v30 = vld [vmem:[%s11396_s6 + $0x108] sm:$0xff] }
 0x2a9   : > { %2793 = vst [vmem:[%s11396_s6 + $0xa0] sm:$0xff] %v2743_v11  ;;  %v2746_v15 = vadd.f32 %v7432_v3, %v2214_v17  ;;  %7855 = vmatprep.mubr.f32.mxu0 %v10360_v2  ;;  %v10449_v52 = vpop.f32.mrf.mxu1  ;;  %7923 = vmatpush3.msra.mxu1 %v6527_v41 }
 0x2aa   : > { %v2534_v46 = vpop.f32.mrf.mxu0  ;;  %8028 = vmatpush3.msra.mxu0 %v6544_v57  ;;  %7924 = vmatprep.subr.mxu1 %v6526_v40  ;;  %v2215_v10 = vadd.f32 %v10390_v4, %v1683_v47  ;;  %v10504_v4 = vld [vmem:[#allocation2 + $0x109] sm:$0xff]  ;;  %v2176_v47 = vld [vmem:[%s11396_s6 + $0x118] sm:$0xff] }
 0x2ab   : > { %2796 = vst [vmem:[%s11396_s6 + $0xb8] sm:$0xff] %v2746_v15  ;;  %v2745_v54 = vadd.f32 %v2534_v46, %v2213_v61  ;;  %v10457_v7 = vpop.f32.mrf.mxu1  ;;  %7758 = vmatmul.mubr.f32.gmra.mxu1 %v10451_v58  ;;  %8029 = vmatprep.subr.mxu0 %v6543_v13  ;;  %v2173_v61 = vld [vmem:[%s11396_s6 + $0x100] sm:$0xff] }
 0x2ac   : > { %v7435_v8 = vpop.f32.mrf.mxu0  ;;  %7856 = vmatmul.mubr.f32.gmra.mxu0 %v10371_v42  ;;  %7760 = vmatprep.mubr.f32.mxu1 %v10460_v9  ;;  %v10485_v42 = vld [vmem:[#allocation2 + $0x101] sm:$0xff]  ;;  %v2222_v19 = vadd.f32 %v10457_v7, %v2172_v60 }
 0x2ad   : > { %2795 = vst [vmem:[%s11396_s6 + $0xb0] sm:$0xff] %v2745_v54  ;;  %v2748_v63 = vadd.f32 %v7435_v8, %v2216_v43  ;;  %7858 = vmatprep.mubr.f32.mxu0 %v10394_v22  ;;  %v10471_v26 = vpop.f32.mrf.mxu1  ;;  %7925 = vmatpush3.msra.mxu1 %v6526_v40  ;;  %v3922_v40 = vld [vmem:[#allocation2 + $0x129] sm:$0xff]  ;;  %v3924_v54 = vld [vmem:[#allocation2 + $0x139] sm:$0xff]  ;;  %v3925_v8 = vld [vmem:[#allocation2 + $0x141] sm:$0xff] }
 0x2ae   : > { %v2544_v2 = vpop.f32.mrf.mxu0  ;;  %8030 = vmatpush3.msra.mxu0 %v6543_v13  ;;  %7926 = vmatprep.subr.mxu1 %v6525_v59  ;;  %v2221_v44 = vadd.f32 %v2171_v23, %v10471_v26 }
 0x2af   : > { %2798 = vst [vmem:[%s11396_s6 + $0xc8] sm:$0xff] %v2748_v63  ;;  %v2747_v12 = vadd.f32 %v2544_v2, %v2215_v10  ;;  %v10482_v16 = vpop.f32.mrf.mxu1  ;;  %7761 = vmatmul.mubr.f32.gmra.mxu1 %v10476_v49  ;;  %8031 = vmatprep.subr.mxu0 %v6542_v45  ;;  %v2178_v2 = vld [vmem:[%s11396_s6 + $0x128] sm:$0xff] }
 0x2b0   : > { %v7438_v31 = vpop.f32.mrf.mxu0  ;;  %7859 = vmatmul.mubr.f32.gmra.mxu0 %v10406_v21  ;;  %7763 = vmatprep.mubr.f32.mxu1 %v10485_v42  ;;  %v2219_v21 = vadd.f32 %v2169_v5, %v10449_v52  ;;  %v2224_v24 = vadd.f32 %v10482_v16, %v2174_v30 }
 0x2b1   : > { %2797 = vst [vmem:[%s11396_s6 + $0xc0] sm:$0xff] %v2747_v12  ;;  %v2750_v48 = vadd.f32 %v7438_v31, %v2218_v35  ;;  %7861 = vmatprep.mubr.f32.mxu0 %v10424_v28  ;;  %v10499_v6 = vpop.f32.mrf.mxu1  ;;  %7927 = vmatpush3.msra.mxu1 %v6525_v59  ;;  %v6539_v28 = vld [vmem:[%s8254_s12 + $0x400] sm:$0xff]  ;;  %v3926_v35 = vld [vmem:[#allocation2 + $0x149] sm:$0xff] }
 0x2b2   : > { %v2554_v39 = vpop.f32.mrf.mxu0  ;;  %8032 = vmatpush3.msra.mxu0 %v6542_v45  ;;  %7928 = vmatprep.subr.mxu1 %v6524_v32  ;;  %v2223_v52 = vadd.f32 %v2173_v61, %v10499_v6  ;;  %v2175_v45 = vld [vmem:[%s11396_s6 + $0x110] sm:$0xff]  ;;  %v2180_v6 = vld [vmem:[%s11396_s6 + $0x138] sm:$0xff] }
 0x2b3   : > { %2800 = vst [vmem:[%s11396_s6 + $0xd8] sm:$0xff] %v2750_v48  ;;  %v2749_v50 = vadd.f32 %v2554_v39, %v2217_v0  ;;  %v10510_v22 = vpop.f32.mrf.mxu1  ;;  %7764 = vmatmul.mubr.f32.gmra.mxu1 %v10504_v4  ;;  %8033 = vmatprep.subr.mxu0 %v6541_v18  ;;  %v3928_v39 = vld [vmem:[#allocation2 + $0x159] sm:$0xff] }
 0x2b4   : > { %v7441_v25 = vpop.f32.mrf.mxu0  ;;  %7862 = vmatmul.mubr.f32.gmra.mxu0 %v10435_v20  ;;  %7766 = vmatprep.mubr.f32.mxu1 %v10513_v27  ;;  %v2226_v7 = vadd.f32 %v10510_v22, %v2176_v47  ;;  %v3929_v22 = vld [vmem:[#allocation2 + $0x161] sm:$0xff] }
 0x2b5   : > { %2799 = vst [vmem:[%s11396_s6 + $0xd0] sm:$0xff] %v2749_v50  ;;  %v2752_v41 = vadd.f32 %v7441_v25, %v2220_v34  ;;  %7864 = vmatprep.mubr.f32.mxu0 %v10451_v58  ;;  %v2062_v37 = vpop.f32.mrf.mxu1  ;;  %7929 = vmatpush3.msra.mxu1 %v6524_v32  ;;  %v3927_v32 = vld [vmem:[#allocation2 + $0x151] sm:$0xff] }
 0x2b6   : > { %v2564_v57 = vpop.f32.mrf.mxu0  ;;  %8034 = vmatpush3.msra.mxu0 %v6541_v18  ;;  %7930 = vmatprep.subr.mxu1 %v6523_v56  ;;  %v2225_v63 = vadd.f32 %v2175_v45, %v2062_v37  ;;  %v3930_v37 = vld [vmem:[#allocation2 + $0x169] sm:$0xff] }
 0x2b7   : > { %2802 = vst [vmem:[%s11396_s6 + $0xe8] sm:$0xff] %v2752_v41  ;;  %v2751_v1 = vadd.f32 %v2564_v57, %v2219_v21  ;;  %v7346_v29 = vpop.f32.mrf.mxu1  ;;  %7767 = vmatmul.mubr.f32.gmra.mxu1 %v3920_v53  ;;  %8035 = vmatprep.subr.mxu0 %v6540_v36  ;;  %v2182_v21 = vld [vmem:[%s11396_s6 + $0x148] sm:$0xff] }
 0x2b8   : > { %v7444_v62 = vpop.f32.mrf.mxu0  ;;  %7865 = vmatmul.mubr.f32.gmra.mxu0 %v10460_v9  ;;  %7769 = vmatprep.mubr.f32.mxu1 %v3921_v38  ;;  %v2228_v12 = vadd.f32 %v7346_v29, %v2178_v2 }
 0x2b9   : > { %2801 = vst [vmem:[%s11396_s6 + $0xe0] sm:$0xff] %v2751_v1  ;;  %v2754_v17 = vadd.f32 %v7444_v62, %v2222_v19  ;;  %7867 = vmatprep.mubr.f32.mxu0 %v10476_v49  ;;  %v2072_v11 = vpop.f32.mrf.mxu1  ;;  %7931 = vmatpush3.msra.mxu1 %v6523_v56  ;;  %v3931_v19 = vld [vmem:[#allocation2 + $0x171] sm:$0xff]  ;;  %v2181_v1 = vld [vmem:[%s11396_s6 + $0x140] sm:$0xff] }
 0x2ba   : > { %v2574_v20 = vpop.f32.mrf.mxu0  ;;  %8036 = vmatpush3.msra.mxu0 %v6540_v36  ;;  %v2227_v18 = vadd.f32 %v2177_v55, %v2072_v11 }
 0x2bb   : > { %2804 = vst [vmem:[%s11396_s6 + $0xf8] sm:$0xff] %v2754_v17  ;;  %v2753_v3 = vadd.f32 %v2574_v20, %v2221_v44  ;;  %v7349_v13 = vpop.f32.mrf.mxu1  ;;  %7770 = vmatmul.mubr.f32.gmra.mxu1 %v3922_v40  ;;  %8037 = vmatprep.subr.mxu0 %v6539_v28  ;;  %v3932_v17 = vld [vmem:[#allocation2 + $0x179] sm:$0xff] }
 0x2bc   : > { %v7447_v15 = vpop.f32.mrf.mxu0  ;;  %7868 = vmatmul.mubr.f32.gmra.mxu0 %v10485_v42  ;;  %7772 = vmatprep.mubr.f32.mxu1 %v3923_v33 }
 0x2bd   : > { %2803 = vst [vmem:[%s11396_s6 + $0xf0] sm:$0xff] %v2753_v3  ;;  %v2756_v46 = vadd.f32 %v7447_v15, %v2224_v24  ;;  %7870 = vmatprep.mubr.f32.mxu0 %v10504_v4  ;;  %v2082_v58 = vpop.f32.mrf.mxu1  ;;  %8038 = vmatpush3.msra.mxu0 %v6539_v28  ;;  %v2230_v4 = vadd.f32 %v7349_v13, %v2180_v6  ;;  %v2184_v28 = vld [vmem:[%s11396_s6 + $0x158] sm:$0xff]  ;;  %v2183_v24 = vld [vmem:[%s11396_s6 + $0x150] sm:$0xff]  ;;  %v2186_v15 = vld [vmem:[%s11396_s6 + $0x168] sm:$0xff] }
 0x2be   : > { %v2584_v43 = vpop.f32.mrf.mxu0 }
 0x2bf   : > { %2806 = vst [vmem:[%s11396_s6 + $0x108] sm:$0xff] %v2756_v46  ;;  %v2755_v9 = vadd.f32 %v2584_v43, %v2223_v52  ;;  %v7352_v59 = vpop.f32.mrf.mxu1  ;;  %7773 = vmatmul.mubr.f32.gmra.mxu1 %v3924_v54  ;;  %v3934_v46 = vld [vmem:[#allocation2 + $0x189] sm:$0xff] }
 0x2c0   : > { %v7450_v10 = vpop.f32.mrf.mxu0  ;;  %7871 = vmatmul.mubr.f32.gmra.mxu0 %v10513_v27  ;;  %7775 = vmatprep.mubr.f32.mxu1 %v3925_v8  ;;  %v2179_v27 = vld [vmem:[%s11396_s6 + $0x130] sm:$0xff]  ;;  %v2232_v60 = vadd.f32 %v7352_v59, %v2182_v21 }
 0x2c1   : > { %2805 = vst [vmem:[%s11396_s6 + $0x100] sm:$0xff] %v2755_v9  ;;  %v2758_v26 = vadd.f32 %v7450_v10, %v2226_v7  ;;  %7873 = vmatprep.mubr.f32.mxu0 %v3920_v53  ;;  %v2092_v51 = vpop.f32.mrf.mxu1  ;;  %v2229_v5 = vadd.f32 %v2179_v27, %v2082_v58  ;;  %v2185_v7 = vld [vmem:[%s11396_s6 + $0x160] sm:$0xff]  ;;  %v2188_v10 = vld [vmem:[%s11396_s6 + $0x178] sm:$0xff] }
 0x2c2   : > { %v2594_v49 = vpop.f32.mrf.mxu0 }
 0x2c3   : > { %2808 = vst [vmem:[%s11396_s6 + $0x118] sm:$0xff] %v2758_v26  ;;  %v2757_v16 = vadd.f32 %v2594_v49, %v2225_v63  ;;  %v7355_v42 = vpop.f32.mrf.mxu1  ;;  %7776 = vmatmul.mubr.f32.gmra.mxu1 %v3926_v35  ;;  %v3936_v26 = vld [vmem:[#allocation2 + $0x199] sm:$0xff] }
 0x2c4   : > { %v7453_v31 = vpop.f32.mrf.mxu0  ;;  %7874 = vmatmul.mubr.f32.gmra.mxu0 %v3921_v38  ;;  %7778 = vmatprep.mubr.f32.mxu1 %v3927_v32  ;;  %v2231_v38 = vadd.f32 %v2181_v1, %v2092_v51  ;;  %v2234_v11 = vadd.f32 %v7355_v42, %v2184_v28 }
 0x2c5   : > { %2807 = vst [vmem:[%s11396_s6 + $0x110] sm:$0xff] %v2757_v16  ;;  %v2760_v0 = vadd.f32 %v7453_v31, %v2228_v12  ;;  %7876 = vmatprep.mubr.f32.mxu0 %v3922_v40  ;;  %v2102_v48 = vpop.f32.mrf.mxu1  ;;  %v3933_v40 = vld [vmem:[#allocation2 + $0x181] sm:$0xff]  ;;  %v2187_v12 = vld [vmem:[%s11396_s6 + $0x170] sm:$0xff] }
 0x2c6   : > { %v2604_v14 = vpop.f32.mrf.mxu0  ;;  %v2233_v13 = vadd.f32 %v2183_v24, %v2102_v48  ;;  %v2190_v31 = vld [vmem:[%s11396_s6 + $0x188] sm:$0xff] }
 0x2c7   : > { %2810 = vst [vmem:[%s11396_s6 + $0x128] sm:$0xff] %v2760_v0  ;;  %v2759_v34 = vadd.f32 %v2604_v14, %v2227_v18  ;;  %v7358_v50 = vpop.f32.mrf.mxu1  ;;  %7779 = vmatmul.mubr.f32.gmra.mxu1 %v3928_v39  ;;  %v4952_v0 = vld [vmem:[#allocation2 + $0x22] sm:$0xff] }
 0x2c8   : > { %v7456_v56 = vpop.f32.mrf.mxu0  ;;  %7877 = vmatmul.mubr.f32.gmra.mxu0 %v3923_v33  ;;  %7781 = vmatprep.mubr.f32.mxu1 %v3929_v22  ;;  %v2236_v58 = vadd.f32 %v7358_v50, %v2186_v15  ;;  %v4958_v15 = vld [vmem:[#allocation2 + $0x52] sm:$0xff] }
 0x2c9   : > { %2809 = vst [vmem:[%s11396_s6 + $0x120] sm:$0xff] %v2759_v34  ;;  %v2762_v25 = vadd.f32 %v7456_v56, %v2230_v4  ;;  %7879 = vmatprep.mubr.f32.mxu0 %v3924_v54  ;;  %v2112_v36 = vpop.f32.mrf.mxu1  ;;  %v3935_v54 = vld [vmem:[#allocation2 + $0x191] sm:$0xff]  ;;  %v2189_v4 = vld [vmem:[%s11396_s6 + $0x180] sm:$0xff]  ;;  %v3206_v56 = vld [vmem:[%s11396_s6 + $0x8] sm:$0xff] }
 0x2ca   : > { %v2614_v41 = vpop.f32.mrf.mxu0  ;;  %v2235_v59 = vadd.f32 %v2185_v7, %v2112_v36 }
 0x2cb   : > { %2812 = vst [vmem:[%s11396_s6 + $0x138] sm:$0xff] %v2762_v25  ;;  %v2761_v57 = vadd.f32 %v2614_v41, %v2229_v5  ;;  %v7361_v53 = vpop.f32.mrf.mxu1  ;;  %7782 = vmatmul.mubr.f32.gmra.mxu1 %v3930_v37  ;;  %v4954_v25 = vld [vmem:[#allocation2 + $0x32] sm:$0xff] }
 0x2cc   : > { %v7459_v29 = vpop.f32.mrf.mxu0  ;;  %7880 = vmatmul.mubr.f32.gmra.mxu0 %v3925_v8  ;;  %7784 = vmatprep.mubr.f32.mxu1 %v3931_v19  ;;  %v2238_v51 = vadd.f32 %v7361_v53, %v2188_v10  ;;  %v3212_v10 = vld [vmem:[%s11396_s6 + $0x38] sm:$0xff] }
 0x2cd   : > { %2811 = vst [vmem:[%s11396_s6 + $0x130] sm:$0xff] %v2761_v57  ;;  %v2764_v23 = vadd.f32 %v7459_v29, %v2232_v60  ;;  %7882 = vmatprep.mubr.f32.mxu0 %v3926_v35  ;;  %v2122_v62 = vpop.f32.mrf.mxu1  ;;  %v4951_v35 = vld [vmem:[#allocation2 + $0x1a] sm:$0xff] }
 0x2ce   : > { %v2624_v44 = vpop.f32.mrf.mxu0  ;;  %v2237_v42 = vadd.f32 %v2187_v12, %v2122_v62  ;;  %v3205_v60 = vld [vmem:[%s11396_s6] sm:$0xff]  ;;  %v4961_v12 = vld [vmem:[#allocation2 + $0x6a] sm:$0xff] }
 0x2cf   : > { %2814 = vst [vmem:[%s11396_s6 + $0x148] sm:$0xff] %v2764_v23  ;;  %v2763_v30 = vadd.f32 %v2624_v44, %v2231_v38  ;;  %v7364_v20 = vpop.f32.mrf.mxu1  ;;  %7785 = vmatmul.mubr.f32.gmra.mxu1 %v3932_v17  ;;  %v4468_v29 = vld [vmem:[#allocation2 + $0x1a1] sm:$0xff]  ;;  %v3208_v38 = vld [vmem:[%s11396_s6 + $0x18] sm:$0xff] }
 0x2d0   : > { %v7462_v3 = vpop.f32.mrf.mxu0  ;;  %7883 = vmatmul.mubr.f32.gmra.mxu0 %v3927_v32  ;;  %7787 = vmatprep.mubr.f32.mxu1 %v3933_v40  ;;  %v2240_v48 = vadd.f32 %v7364_v20, %v2190_v31  ;;  %v4956_v62 = vld [vmem:[#allocation2 + $0x42] sm:$0xff] }
 0x2d1   : > { %2813 = vst [vmem:[%s11396_s6 + $0x140] sm:$0xff] %v2763_v30  ;;  %v2766_v33 = vadd.f32 %v7462_v3, %v2234_v11  ;;  %7885 = vmatprep.mubr.f32.mxu0 %v3928_v39  ;;  %v2132_v61 = vpop.f32.mrf.mxu1  ;;  %v4953_v39 = vld [vmem:[#allocation2 + $0x2a] sm:$0xff] }
 0x2d2   : > { %v2634_v52 = vpop.f32.mrf.mxu0  ;;  %v2239_v50 = vadd.f32 %v2189_v4, %v2132_v61  ;;  %v4957_v11 = vld [vmem:[#allocation2 + $0x4a] sm:$0xff] }
 0x2d3   : > { %2816 = vst [vmem:[%s11396_s6 + $0x158] sm:$0xff] %v2766_v33  ;;  %v2765_v47 = vadd.f32 %v2634_v52, %v2233_v13  ;;  %v7506_v43 = vpop.f32.mrf.mxu1  ;;  %7788 = vmatmul.mubr.f32.gmra.mxu1 %v3934_v46  ;;  %v3207_v30 = vld [vmem:[%s11396_s6 + $0x10] sm:$0xff]  ;;  %v3210_v33 = vld [vmem:[%s11396_s6 + $0x28] sm:$0xff] }
 0x2d4   : > { %v7465_v9 = vpop.f32.mrf.mxu0  ;;  %7886 = vmatmul.mubr.f32.gmra.mxu0 %v3929_v22  ;;  %7790 = vmatprep.mubr.f32.mxu1 %v3935_v54  ;;  %v3256_v36 = vadd.f32 %v7506_v43, %v3206_v56  ;;  %v4959_v43 = vld [vmem:[#allocation2 + $0x5a] sm:$0xff]  ;;  %v5489_v56 = vld [vmem:[#allocation2 + $0x4b] sm:$0xff] }
 0x2d5   : > { %2815 = vst [vmem:[%s11396_s6 + $0x150] sm:$0xff] %v2765_v47  ;;  %v2768_v8 = vadd.f32 %v7465_v9, %v2236_v58  ;;  %7888 = vmatprep.mubr.f32.mxu0 %v3930_v37  ;;  %v2956_v45 = vpop.f32.mrf.mxu1  ;;  %v4955_v37 = vld [vmem:[#allocation2 + $0x3a] sm:$0xff]  ;;  %v5484_v47 = vld [vmem:[#allocation2 + $0x23] sm:$0xff]  ;;  %v5485_v9 = vld [vmem:[#allocation2 + $0x2b] sm:$0xff] }
 0x2d6   : > { %v2644_v63 = vpop.f32.mrf.mxu0  ;;  %v3255_v53 = vadd.f32 %v3205_v60, %v2956_v45 }
 0x2d7   : > { %2818 = vst [vmem:[%s11396_s6 + $0x168] sm:$0xff] %v2768_v8  ;;  %v2767_v2 = vadd.f32 %v2644_v63, %v2235_v59  ;;  %v7509_v49 = vpop.f32.mrf.mxu1  ;;  %7791 = vmatmul.mubr.f32.gmra.mxu1 %v3936_v26 }
 0x2d8   : > { %v7468_v16 = vpop.f32.mrf.mxu0  ;;  %7889 = vmatmul.mubr.f32.gmra.mxu0 %v3931_v19  ;;  %7932 = vmatprep.mubr.f32.mxu1 %v4951_v35  ;;  %v3258_v28 = vadd.f32 %v7509_v49, %v3208_v38  ;;  %v5486_v35 = vld [vmem:[#allocation2 + $0x33] sm:$0xff] }
 0x2d9   : > { %2817 = vst [vmem:[%s11396_s6 + $0x160] sm:$0xff] %v2767_v2  ;;  %v2770_v32 = vadd.f32 %v7468_v16, %v2238_v51  ;;  %7891 = vmatprep.mubr.f32.mxu0 %v3932_v17  ;;  %v2966_v55 = vpop.f32.mrf.mxu1  ;;  %v3211_v16 = vld [vmem:[%s11396_s6 + $0x30] sm:$0xff] }
 0x2da   : > { %v2654_v18 = vpop.f32.mrf.mxu0  ;;  %v3257_v24 = vadd.f32 %v3207_v30, %v2966_v55  ;;  %v4966_v30 = vld [vmem:[#allocation2 + $0x92] sm:$0xff] }
 0x2db   : > { %2820 = vst [vmem:[%s11396_s6 + $0x178] sm:$0xff] %v2770_v32  ;;  %v2769_v6 = vadd.f32 %v2654_v18, %v2237_v42  ;;  %v7512_v14 = vpop.f32.mrf.mxu1  ;;  %7933 = vmatmul.mubr.f32.vlgmr.msra.gmra.mxu1 %v4952_v0  ;;  %v5487_v32 = vld [vmem:[#allocation2 + $0x3b] sm:$0xff]  ;;  %v3214_v0 = vld [vmem:[%s11396_s6 + $0x48] sm:$0xff] }
 0x2dc   : > { %v7471_v34 = vpop.f32.mrf.mxu0  ;;  %7892 = vmatmul.mubr.f32.gmra.mxu0 %v3933_v40  ;;  %7935 = vmatprep.mubr.f32.mxu1 %v4953_v39  ;;  %v5483_v40 = vld [vmem:[#allocation2 + $0x1b] sm:$0xff]  ;;  %v3260_v52 = vadd.f32 %v7512_v14, %v3210_v33 }
 0x2dd   : > { %2819 = vst [vmem:[%s11396_s6 + $0x170] sm:$0xff] %v2769_v6  ;;  %v2772_v22 = vadd.f32 %v7471_v34, %v2240_v48  ;;  %7894 = vmatprep.mubr.f32.mxu0 %v3934_v46  ;;  %v2976_v27 = vpop.f32.mrf.mxu1  ;;  %v4962_v6 = vld [vmem:[#allocation2 + $0x72] sm:$0xff]  ;;  %v5488_v34 = vld [vmem:[#allocation2 + $0x43] sm:$0xff] }
 0x2de   : > { %v2664_v5 = vpop.f32.mrf.mxu0  ;;  %v3217_v33 = vld [vmem:[%s11396_s6 + $0x60] sm:$0xff] }
 0x2df   : > { %2822 = vst [vmem:[%s11396_s6 + $0x188] sm:$0xff] %v2772_v22  ;;  %v2771_v21 = vadd.f32 %v2664_v5, %v2239_v50  ;;  %v7515_v41 = vpop.f32.mrf.mxu1  ;;  %7936 = vmatmul.mubr.f32.gmra.mxu1 %v4954_v25  ;;  %v4963_v50 = vld [vmem:[#allocation2 + $0x7a] sm:$0xff] }
 0x2e0   : > { %v7613_v57 = vpop.f32.mrf.mxu0  ;;  %7895 = vmatmul.mubr.f32.gmra.mxu0 %v3935_v54  ;;  %7938 = vmatprep.mubr.f32.mxu1 %v4955_v37  ;;  %v3209_v54 = vld [vmem:[%s11396_s6 + $0x20] sm:$0xff]  ;;  %v3262_v51 = vadd.f32 %v7515_v41, %v3212_v10  ;;  %v3219_v10 = vld [vmem:[%s11396_s6 + $0x70] sm:$0xff] }
 0x2e1   : > { %2821 = vst [vmem:[%s11396_s6 + $0x180] sm:$0xff] %v2771_v21  ;;  %v3788_v19 = vadd.f32 %v7613_v57, %v3256_v36  ;;  %7897 = vmatprep.mubr.f32.mxu0 %v3936_v26  ;;  %v2986_v1 = vpop.f32.mrf.mxu1  ;;  %v3259_v59 = vadd.f32 %v3209_v54, %v2976_v27  ;;  %v4960_v26 = vld [vmem:[#allocation2 + $0x62] sm:$0xff]  ;;  %v3216_v21 = vld [vmem:[%s11396_s6 + $0x58] sm:$0xff] }
 0x2e2   : > { %v3488_v23 = vpop.f32.mrf.mxu0  ;;  %v3261_v55 = vadd.f32 %v3211_v16, %v2986_v1  ;;  %v3213_v22 = vld [vmem:[%s11396_s6 + $0x40] sm:$0xff]  ;;  %v4965_v1 = vld [vmem:[#allocation2 + $0x8a] sm:$0xff]  ;;  %v4970_v16 = vld [vmem:[#allocation2 + $0xb2] sm:$0xff] }
 0x2e3   : > { %3838 = vst [vmem:[%s11396_s6 + $0x8] sm:$0xff] %v3788_v19  ;;  %v3787_v44 = vadd.f32 %v3488_v23, %v3255_v53  ;;  %v7518_v17 = vpop.f32.mrf.mxu1  ;;  %7939 = vmatmul.mubr.f32.gmra.mxu1 %v4956_v62  ;;  %v4964_v37 = vld [vmem:[#allocation2 + $0x82] sm:$0xff]  ;;  %v5490_v19 = vld [vmem:[#allocation2 + $0x53] sm:$0xff] }
 0x2e4   : > { %v7616_v20 = vpop.f32.mrf.mxu0  ;;  %7898 = vmatmul.mubr.f32.gmra.mxu0 %v4468_v29  ;;  %7941 = vmatprep.mubr.f32.mxu1 %v4957_v11  ;;  %v3264_v14 = vadd.f32 %v7518_v17, %v3214_v0  ;;  %v3215_v29 = vld [vmem:[%s11396_s6 + $0x50] sm:$0xff]  ;;  %v5491_v23 = vld [vmem:[#allocation2 + $0x5b] sm:$0xff]  ;;  %v3218_v17 = vld [vmem:[%s11396_s6 + $0x68] sm:$0xff] }
 0x2e5   : > { %3837 = vst [vmem:[%s11396_s6] sm:$0xff] %v3787_v44  ;;  %v3790_v3 = vadd.f32 %v7616_v20, %v3258_v28  ;;  %8039 = vmatprep.mubr.f32.mxu0 %v5483_v40  ;;  %v2996_v13 = vpop.f32.mrf.mxu1  ;;  %v4968_v54 = vld [vmem:[#allocation2 + $0xa2] sm:$0xff] }
 0x2e6   : > { %v3498_v61 = vpop.f32.mrf.mxu0  ;;  %v3263_v5 = vadd.f32 %v3213_v22, %v2996_v13  ;;  %v4967_v13 = vld [vmem:[#allocation2 + $0x9a] sm:$0xff] }
 0x2e7   : > { %3840 = vst [vmem:[%s11396_s6 + $0x18] sm:$0xff] %v3790_v3  ;;  %v3789_v46 = vadd.f32 %v3498_v61, %v3257_v24  ;;  %v7521_v58 = vpop.f32.mrf.mxu1  ;;  %7942 = vmatmul.mubr.f32.gmra.mxu1 %v4958_v15  ;;  %v5492_v3 = vld [vmem:[#allocation2 + $0x63] sm:$0xff]  ;;  %v5493_v15 = vld [vmem:[#allocation2 + $0x6b] sm:$0xff] }
 0x2e8   : > { %v7619_v7 = vpop.f32.mrf.mxu0  ;;  %8040 = vmatmul.mubr.f32.vlgmr.msra.gmra.mxu0 %v5484_v47  ;;  %7944 = vmatprep.mubr.f32.mxu1 %v4959_v43  ;;  %v3266_v60 = vadd.f32 %v7521_v58, %v3216_v21  ;;  %v3220_v47 = vld [vmem:[%s11396_s6 + $0x78] sm:$0xff]  ;;  %v3221_v0 = vld [vmem:[%s11396_s6 + $0x80] sm:$0xff] }
 0x2e9   : > { %3839 = vst [vmem:[%s11396_s6 + $0x10] sm:$0xff] %v3789_v46  ;;  %v3792_v8 = vadd.f32 %v7619_v7, %v3260_v52  ;;  %8042 = vmatprep.mubr.f32.mxu0 %v5485_v9  ;;  %v3006_v45 = vpop.f32.mrf.mxu1  ;;  %v5498_v21 = vld [vmem:[#allocation2 + $0x93] sm:$0xff] }
 0x2ea   : > { %v3508_v63 = vpop.f32.mrf.mxu0  ;;  %v3265_v62 = vadd.f32 %v3215_v29, %v3006_v45  ;;  %v4969_v45 = vld [vmem:[#allocation2 + $0xaa] sm:$0xff] }
 0x2eb   : > { %3842 = vst [vmem:[%s11396_s6 + $0x28] sm:$0xff] %v3792_v8  ;;  %v3791_v2 = vadd.f32 %v3508_v63, %v3259_v59  ;;  %v7524_v49 = vpop.f32.mrf.mxu1  ;;  %7945 = vmatmul.mubr.f32.gmra.mxu1 %v4960_v26  ;;  %v5494_v8 = vld [vmem:[#allocation2 + $0x73] sm:$0xff]  ;;  %v5495_v26 = vld [vmem:[#allocation2 + $0x7b] sm:$0xff] }
 0x2ec   : > { %v7622_v42 = vpop.f32.mrf.mxu0  ;;  %8043 = vmatmul.mubr.f32.gmra.mxu0 %v5486_v35  ;;  %7947 = vmatprep.mubr.f32.mxu1 %v4961_v12  ;;  %v3268_v20 = vadd.f32 %v7524_v49, %v3218_v17  ;;  %v3222_v35 = vld [vmem:[%s11396_s6 + $0x88] sm:$0xff] }
 0x2ed   : > { %3841 = vst [vmem:[%s11396_s6 + $0x20] sm:$0xff] %v3791_v2  ;;  %v3794_v31 = vadd.f32 %v7622_v42, %v3262_v51  ;;  %8045 = vmatprep.mubr.f32.mxu0 %v5487_v32  ;;  %v3016_v18 = vpop.f32.mrf.mxu1 }
 0x2ee   : > { %v3518_v48 = vpop.f32.mrf.mxu0  ;;  %v3267_v52 = vadd.f32 %v3217_v33, %v3016_v18  ;;  %v4971_v18 = vld [vmem:[#allocation2 + $0xba] sm:$0xff] }
 0x2ef   : > { %3844 = vst [vmem:[%s11396_s6 + $0x38] sm:$0xff] %v3794_v31  ;;  %v10712_v39 = vadd.f32 %v3518_v48, %v3261_v55  ;;  %v7527_v4 = vpop.f32.mrf.mxu1  ;;  %7948 = vmatmul.mubr.f32.gmra.mxu1 %v4962_v6  ;;  %v5496_v31 = vld [vmem:[#allocation2 + $0x83] sm:$0xff]  ;;  %v5497_v6 = vld [vmem:[#allocation2 + $0x8b] sm:$0xff] }
 0x2f0   : > { %v7625_v27 = vpop.f32.mrf.mxu0  ;;  %8046 = vmatmul.mubr.f32.gmra.mxu0 %v5488_v34  ;;  %7950 = vmatprep.mubr.f32.mxu1 %v4963_v50  ;;  %v3270_v7 = vadd.f32 %v7527_v4, %v3220_v47  ;;  %v3224_v50 = vld [vmem:[%s11396_s6 + $0x98] sm:$0xff]  ;;  %v4976_v47 = vld [vmem:[#allocation2 + $0xe2] sm:$0xff] }
 0x2f1   : > { %v10717_v25 = vadd.f32 %v7625_v27, %v3264_v14  ;;  %8048 = vmatprep.mubr.f32.mxu0 %v5489_v56  ;;  %v3026_v36 = vpop.f32.mrf.mxu1  ;;  %v4972_v27 = vld [vmem:[#allocation2 + $0xc2] sm:$0xff] }
 0x2f2   : > { %v3528_v41 = vpop.f32.mrf.mxu0  ;;  %v3269_v51 = vadd.f32 %v3219_v10, %v3026_v36 }
 0x2f3   : > { %v10722_v57 = vadd.f32 %v3528_v41, %v3263_v5  ;;  %v7530_v53 = vpop.f32.mrf.mxu1  ;;  %7951 = vmatmul.mubr.f32.gmra.mxu1 %v4964_v37  ;;  %v4973_v41 = vld [vmem:[#allocation2 + $0xca] sm:$0xff] }
 0x2f4   : > { %v7628_v38 = vpop.f32.mrf.mxu0  ;;  %8049 = vmatmul.mubr.f32.gmra.mxu0 %v5490_v19  ;;  %7953 = vmatprep.mubr.f32.mxu1 %v4965_v1  ;;  %v3272_v42 = vadd.f32 %v7530_v53, %v3222_v35  ;;  %v3223_v37 = vld [vmem:[%s11396_s6 + $0x90] sm:$0xff]  ;;  %v5499_v53 = vld [vmem:[#allocation2 + $0x9b] sm:$0xff]  ;;  %v3230_v35 = vld [vmem:[%s11396_s6 + $0xc8] sm:$0xff] }
 0x2f5   : > { %v10727_v28 = vadd.f32 %v7628_v38, %v3266_v60  ;;  %8051 = vmatprep.mubr.f32.mxu0 %v5491_v23  ;;  %v3036_v44 = vpop.f32.mrf.mxu1  ;;  %v3226_v38 = vld [vmem:[%s11396_s6 + $0xa8] sm:$0xff] }
 0x2f6   : > { %v3538_v11 = vpop.f32.mrf.mxu0  ;;  %v3271_v14 = vadd.f32 %v3221_v0, %v3036_v44  ;;  %v4979_v0 = vld [vmem:[#allocation2 + $0xfa] sm:$0xff] }
 0x2f7   : > { %v10732_v40 = vadd.f32 %v3538_v11, %v3265_v62  ;;  %v7533_v24 = vpop.f32.mrf.mxu1  ;;  %7954 = vmatmul.mubr.f32.gmra.mxu1 %v4966_v30  ;;  %v4974_v62 = vld [vmem:[#allocation2 + $0xd2] sm:$0xff]  ;;  %v5500_v30 = vld [vmem:[#allocation2 + $0xa3] sm:$0xff] }
 0x2f8   : > { %v7631_v61 = vpop.f32.mrf.mxu0  ;;  %8052 = vmatmul.mubr.f32.gmra.mxu0 %v5492_v3  ;;  %7956 = vmatprep.mubr.f32.mxu1 %v4967_v13  ;;  %v3274_v56 = vadd.f32 %v7533_v24, %v3224_v50  ;;  %v3225_v24 = vld [vmem:[%s11396_s6 + $0xa0] sm:$0xff]  ;;  %v5501_v13 = vld [vmem:[#allocation2 + $0xab] sm:$0xff] }
 0x2f9   : > { %v10737_v46 = vadd.f32 %v7631_v61, %v3268_v20  ;;  %8054 = vmatprep.mubr.f32.mxu0 %v5493_v15  ;;  %v3046_v58 = vpop.f32.mrf.mxu1  ;;  %v4975_v20 = vld [vmem:[#allocation2 + $0xda] sm:$0xff] }
 0x2fa   : > { %v3548_v43 = vpop.f32.mrf.mxu0  ;;  %v3273_v19 = vadd.f32 %v3223_v37, %v3046_v58 }
 0x2fb   : > { %v10742_v9 = vadd.f32 %v3548_v43, %v3267_v52  ;;  %v7536_v59 = vpop.f32.mrf.mxu1  ;;  %7957 = vmatmul.mubr.f32.gmra.mxu1 %v4968_v54  ;;  %v3228_v52 = vld [vmem:[%s11396_s6 + $0xb8] sm:$0xff] }
 0x2fc   : > { %v7634_v63 = vpop.f32.mrf.mxu0  ;;  %8055 = vmatmul.mubr.f32.gmra.mxu0 %v5494_v8  ;;  %7959 = vmatprep.mubr.f32.mxu1 %v4969_v45  ;;  %v3276_v44 = vadd.f32 %v7536_v59, %v3226_v38  ;;  %v5502_v59 = vld [vmem:[#allocation2 + $0xb3] sm:$0xff]  ;;  %v4977_v8 = vld [vmem:[#allocation2 + $0xea] sm:$0xff]  ;;  %v5507_v38 = vld [vmem:[#allocation2 + $0xdb] sm:$0xff] }
 0x2fd   : > { %v10747_v2 = vadd.f32 %v7634_v63, %v3270_v7  ;;  %8057 = vmatprep.mubr.f32.mxu0 %v5495_v26  ;;  %v3056_v49 = vpop.f32.mrf.mxu1  ;;  %v3227_v45 = vld [vmem:[%s11396_s6 + $0xb0] sm:$0xff]  ;;  %v5503_v63 = vld [vmem:[#allocation2 + $0xbb] sm:$0xff] }
 0x2fe   : > { %v3558_v12 = vpop.f32.mrf.mxu0  ;;  %v3275_v33 = vadd.f32 %v3225_v24, %v3056_v49 }
 0x2ff   : > { %v10752_v32 = vadd.f32 %v3558_v12, %v3269_v51  ;;  %v7539_v55 = vpop.f32.mrf.mxu1  ;;  %7960 = vmatmul.mubr.f32.gmra.mxu1 %v4970_v16  ;;  %v4978_v16 = vld [vmem:[#allocation2 + $0xf2] sm:$0xff] }
 0x300   : > { %v7637_v48 = vpop.f32.mrf.mxu0  ;;  %8058 = vmatmul.mubr.f32.gmra.mxu0 %v5496_v31  ;;  %7962 = vmatprep.mubr.f32.mxu1 %v4971_v18  ;;  %v3278_v43 = vadd.f32 %v7539_v55, %v3228_v52  ;;  %v5504_v18 = vld [vmem:[#allocation2 + $0xc3] sm:$0xff]  ;;  %v4983_v52 = vld [vmem:[#allocation2 + $0x11a] sm:$0xff] }
 0x301   : > { %v10757_v4 = vadd.f32 %v7637_v48, %v3272_v42  ;;  %8060 = vmatprep.mubr.f32.mxu0 %v5497_v6  ;;  %v3066_v34 = vpop.f32.mrf.mxu1  ;;  %v3229_v48 = vld [vmem:[%s11396_s6 + $0xc0] sm:$0xff] }
 0x302   : > { %v3568_v22 = vpop.f32.mrf.mxu0  ;;  %v3277_v26 = vadd.f32 %v3227_v45, %v3066_v34 }
 0x303   : > { %v10762_v5 = vadd.f32 %v3568_v22, %v3271_v14  ;;  %v7542_v36 = vpop.f32.mrf.mxu1  ;;  %7963 = vmatmul.mubr.f32.gmra.mxu1 %v4972_v27  ;;  %v5505_v14 = vld [vmem:[#allocation2 + $0xcb] sm:$0xff]  ;;  %v3232_v27 = vld [vmem:[%s11396_s6 + $0xd8] sm:$0xff] }
 0x304   : > { %v7640_v60 = vpop.f32.mrf.mxu0  ;;  %8061 = vmatmul.mubr.f32.gmra.mxu0 %v5498_v21  ;;  %7965 = vmatprep.mubr.f32.mxu1 %v4973_v41  ;;  %v3280_v42 = vadd.f32 %v7542_v36, %v3230_v35  ;;  %v4980_v36 = vld [vmem:[#allocation2 + $0x102] sm:$0xff] }
 0x305   : > { %v10767_v1 = vadd.f32 %v7640_v60, %v3274_v56  ;;  %8063 = vmatprep.mubr.f32.mxu0 %v5499_v53  ;;  %v3076_v29 = vpop.f32.mrf.mxu1  ;;  %v5506_v60 = vld [vmem:[#allocation2 + $0xd3] sm:$0xff]  ;;  %v4981_v53 = vld [vmem:[#allocation2 + $0x10a] sm:$0xff] }
 0x306   : > { %v3578_v23 = vpop.f32.mrf.mxu0  ;;  %v3279_v34 = vadd.f32 %v3229_v48, %v3076_v29 }
 0x307   : > { %v10772_v17 = vadd.f32 %v3578_v23, %v3273_v19  ;;  %v7545_v11 = vpop.f32.mrf.mxu1  ;;  %7966 = vmatmul.mubr.f32.gmra.mxu1 %v4974_v62  ;;  %v3231_v19 = vld [vmem:[%s11396_s6 + $0xd0] sm:$0xff] }
 0x308   : > { %v7643_v3 = vpop.f32.mrf.mxu0  ;;  %8064 = vmatmul.mubr.f32.gmra.mxu0 %v5500_v30  ;;  %7968 = vmatprep.mubr.f32.mxu1 %v4975_v20  ;;  %v3282_v21 = vadd.f32 %v7545_v11, %v3232_v27  ;;  %v3234_v11 = vld [vmem:[%s11396_s6 + $0xe8] sm:$0xff]  ;;  %v4982_v20 = vld [vmem:[#allocation2 + $0x112] sm:$0xff] }
 0x309   : > { %v10777_v61 = vadd.f32 %v7643_v3, %v3276_v44  ;;  %8066 = vmatprep.mubr.f32.mxu0 %v5501_v13  ;;  %v3086_v15 = vpop.f32.mrf.mxu1 }
 0x30a   : > { %v3588_v58 = vpop.f32.mrf.mxu0  ;;  %v3281_v23 = vadd.f32 %v3231_v19, %v3086_v15  ;;  %v3233_v15 = vld [vmem:[%s11396_s6 + $0xe0] sm:$0xff]  ;;  %v5513_v19 = vld [vmem:[#allocation2 + $0x10b] sm:$0xff] }
 0x30b   : > { %v10782_v54 = vadd.f32 %v3588_v58, %v3275_v33  ;;  %v7548_v7 = vpop.f32.mrf.mxu1  ;;  %7969 = vmatmul.mubr.f32.gmra.mxu1 %v4976_v47  ;;  %v5508_v33 = vld [vmem:[#allocation2 + $0xe3] sm:$0xff]  ;;  %v5509_v47 = vld [vmem:[#allocation2 + $0xeb] sm:$0xff] }
 0x30c   : > { %v7646_v10 = vpop.f32.mrf.mxu0  ;;  %8067 = vmatmul.mubr.f32.gmra.mxu0 %v5502_v59  ;;  %7971 = vmatprep.mubr.f32.mxu1 %v4977_v8  ;;  %v3284_v24 = vadd.f32 %v7548_v7, %v3234_v11  ;;  %v3236_v7 = vld [vmem:[%s11396_s6 + $0xf8] sm:$0xff] }
 0x30d   : > { %v10787_v51 = vadd.f32 %v7646_v10, %v3278_v43  ;;  %8069 = vmatprep.mubr.f32.mxu0 %v5503_v63  ;;  %v3096_v49 = vpop.f32.mrf.mxu1  ;;  %v4984_v10 = vld [vmem:[#allocation2 + $0x122] sm:$0xff] }
 0x30e   : > { %v3598_v12 = vpop.f32.mrf.mxu0  ;;  %v3283_v43 = vadd.f32 %v3233_v15, %v3096_v49  ;;  %v3235_v49 = vld [vmem:[%s11396_s6 + $0xf0] sm:$0xff] }
 0x30f   : > { %v10792_v55 = vadd.f32 %v3598_v12, %v3277_v26  ;;  %v7551_v31 = vpop.f32.mrf.mxu1  ;;  %7972 = vmatmul.mubr.f32.gmra.mxu1 %v4978_v16  ;;  %v5510_v12 = vld [vmem:[#allocation2 + $0xf3] sm:$0xff]  ;;  %v4985_v16 = vld [vmem:[#allocation2 + $0x12a] sm:$0xff] }
 0x310   : > { %v7649_v6 = vpop.f32.mrf.mxu0  ;;  %8070 = vmatmul.mubr.f32.gmra.mxu0 %v5504_v18  ;;  %7974 = vmatprep.mubr.f32.mxu1 %v4979_v0  ;;  %v3286_v63 = vadd.f32 %v7551_v31, %v3236_v7  ;;  %v5511_v18 = vld [vmem:[#allocation2 + $0xfb] sm:$0xff]  ;;  %v3238_v31 = vld [vmem:[%s11396_s6 + $0x108] sm:$0xff] }
 0x311   : > { %v10797_v50 = vadd.f32 %v7649_v6, %v3280_v42  ;;  %8072 = vmatprep.mubr.f32.mxu0 %v5505_v14  ;;  %v3106_v22 = vpop.f32.mrf.mxu1  ;;  %v4989_v15 = vld [vmem:[#allocation2 + $0x14a] sm:$0xff] }
 0x312   : > { %v3608_v56 = vpop.f32.mrf.mxu0  ;;  %v3285_v0 = vadd.f32 %v3235_v49, %v3106_v22  ;;  %v3237_v22 = vld [vmem:[%s11396_s6 + $0x100] sm:$0xff] }
 0x313   : > { %v10802_v41 = vadd.f32 %v3608_v56, %v3279_v34  ;;  %v7554_v37 = vpop.f32.mrf.mxu1  ;;  %7975 = vmatmul.mubr.f32.gmra.mxu1 %v4980_v36  ;;  %v4986_v34 = vld [vmem:[#allocation2 + $0x132] sm:$0xff] }
 0x314   : > { %v7652_v29 = vpop.f32.mrf.mxu0  ;;  %8073 = vmatmul.mubr.f32.gmra.mxu0 %v5506_v60  ;;  %7977 = vmatprep.mubr.f32.mxu1 %v4981_v53  ;;  %v3288_v27 = vadd.f32 %v7554_v37, %v3238_v31  ;;  %v4987_v60 = vld [vmem:[#allocation2 + $0x13a] sm:$0xff]  ;;  %v5517_v31 = vld [vmem:[#allocation2 + $0x12b] sm:$0xff] }
 0x315   : > { %v10807_v62 = vadd.f32 %v7652_v29, %v3282_v21  ;;  %8075 = vmatprep.mubr.f32.mxu0 %v5507_v38  ;;  %v3116_v44 = vpop.f32.mrf.mxu1  ;;  %v5512_v21 = vld [vmem:[#allocation2 + $0x103] sm:$0xff]  ;;  %v3240_v37 = vld [vmem:[%s11396_s6 + $0x118] sm:$0xff] }
 0x316   : > { %v3618_v30 = vpop.f32.mrf.mxu0  ;;  %v3287_v29 = vadd.f32 %v3237_v22, %v3116_v44  ;;  %v3239_v44 = vld [vmem:[%s11396_s6 + $0x110] sm:$0xff] }
 0x317   : > { %v10812_v3 = vadd.f32 %v3618_v30, %v3281_v23  ;;  %v7557_v13 = vpop.f32.mrf.mxu1  ;;  %7978 = vmatmul.mubr.f32.gmra.mxu1 %v4982_v20  ;;  %v4988_v30 = vld [vmem:[#allocation2 + $0x142] sm:$0xff] }
 0x318   : > { %v7655_v58 = vpop.f32.mrf.mxu0  ;;  %8076 = vmatmul.mubr.f32.gmra.mxu0 %v5508_v33  ;;  %7980 = vmatprep.mubr.f32.mxu1 %v4983_v52  ;;  %v3290_v20 = vadd.f32 %v7557_v13, %v3240_v37  ;;  %v5514_v52 = vld [vmem:[#allocation2 + $0x113] sm:$0xff]  ;;  %v3242_v13 = vld [vmem:[%s11396_s6 + $0x128] sm:$0xff] }
 0x319   : > { %v10817_v59 = vadd.f32 %v7655_v58, %v3284_v24  ;;  %8078 = vmatprep.mubr.f32.mxu0 %v5509_v47  ;;  %v3126_v8 = vpop.f32.mrf.mxu1  ;;  %v5515_v47 = vld [vmem:[#allocation2 + $0x11b] sm:$0xff]  ;;  %v4993_v37 = vld [vmem:[#allocation2 + $0x16a] sm:$0xff] }
 0x31a   : > { %v3628_v45 = vpop.f32.mrf.mxu0 }
 0x31b   : > { %v10822_v26 = vadd.f32 %v3628_v45, %v3283_v43  ;;  %v7560_v35 = vpop.f32.mrf.mxu1  ;;  %7981 = vmatmul.mubr.f32.gmra.mxu1 %v4984_v10  ;;  %v3289_v43 = vadd.f32 %v3239_v44, %v3126_v8  ;;  %v3241_v8 = vld [vmem:[%s11396_s6 + $0x120] sm:$0xff] }
 0x31c   : > { %v7658_v42 = vpop.f32.mrf.mxu0  ;;  %8079 = vmatmul.mubr.f32.gmra.mxu0 %v5510_v12  ;;  %7983 = vmatprep.mubr.f32.mxu1 %v4985_v16  ;;  %v3292_v12 = vadd.f32 %v7560_v35, %v3242_v13  ;;  %v3244_v35 = vld [vmem:[%s11396_s6 + $0x138] sm:$0xff] }
 0x31d   : > { %v10827_v48 = vadd.f32 %v7658_v42, %v3286_v63  ;;  %8081 = vmatprep.mubr.f32.mxu0 %v5511_v18  ;;  %v3136_v6 = vpop.f32.mrf.mxu1  ;;  %v4990_v63 = vld [vmem:[#allocation2 + $0x152] sm:$0xff]  ;;  %v5516_v42 = vld [vmem:[#allocation2 + $0x123] sm:$0xff]  ;;  %v4991_v18 = vld [vmem:[#allocation2 + $0x15a] sm:$0xff] }
 0x31e   : > { %v3638_v14 = vpop.f32.mrf.mxu0 }
 0x31f   : > { %v10832_v56 = vadd.f32 %v3638_v14, %v3285_v0  ;;  %v7563_v36 = vpop.f32.mrf.mxu1  ;;  %7984 = vmatmul.mubr.f32.gmra.mxu1 %v4986_v34  ;;  %v3291_v14 = vadd.f32 %v3241_v8, %v3136_v6  ;;  %v3243_v6 = vld [vmem:[%s11396_s6 + $0x130] sm:$0xff] }
 0x320   : > { %v7661_v53 = vpop.f32.mrf.mxu0  ;;  %8082 = vmatmul.mubr.f32.gmra.mxu0 %v5512_v21  ;;  %7986 = vmatprep.mubr.f32.mxu1 %v4987_v60  ;;  %v4992_v60 = vld [vmem:[#allocation2 + $0x162] sm:$0xff]  ;;  %v3294_v22 = vadd.f32 %v7563_v36, %v3244_v35 }
 0x321   : > { %v10837_v38 = vadd.f32 %v7661_v53, %v3288_v27  ;;  %8084 = vmatprep.mubr.f32.mxu0 %v5513_v19  ;;  %v3146_v23 = vpop.f32.mrf.mxu1  ;;  %v3246_v36 = vld [vmem:[%s11396_s6 + $0x148] sm:$0xff] }
 0x322   : > { %v3648_v11 = vpop.f32.mrf.mxu0 }
 0x323   : > { %v10842_v24 = vadd.f32 %v3648_v11, %v3287_v29  ;;  %v7566_v33 = vpop.f32.mrf.mxu1  ;;  %7987 = vmatmul.mubr.f32.gmra.mxu1 %v4988_v30  ;;  %v5518_v29 = vld [vmem:[#allocation2 + $0x133] sm:$0xff]  ;;  %v5519_v30 = vld [vmem:[#allocation2 + $0x13b] sm:$0xff] }
 0x324   : > { %v7664_v58 = vpop.f32.mrf.mxu0  ;;  %8085 = vmatmul.mubr.f32.gmra.mxu0 %v5514_v52  ;;  %7989 = vmatprep.mubr.f32.mxu1 %v4989_v15 }
 0x325   : > { %v10847_v7 = vadd.f32 %v7664_v58, %v3290_v20  ;;  %8087 = vmatprep.mubr.f32.mxu0 %v5515_v47  ;;  %v3156_v45 = vpop.f32.mrf.mxu1  ;;  %v3293_v20 = vadd.f32 %v3243_v6, %v3146_v23  ;;  %v4994_v58 = vld [vmem:[#allocation2 + $0x172] sm:$0xff]  ;;  %v3296_v47 = vadd.f32 %v7566_v33, %v3246_v36  ;;  %v3245_v23 = vld [vmem:[%s11396_s6 + $0x140] sm:$0xff] }
 0x326   : > { %v3658_v10 = vpop.f32.mrf.mxu0  ;;  %v3248_v33 = vld [vmem:[%s11396_s6 + $0x158] sm:$0xff] }
 0x327   : > { %v10852_v16 = vadd.f32 %v3658_v10, %v3289_v43  ;;  %v7569_v49 = vpop.f32.mrf.mxu1  ;;  %7990 = vmatmul.mubr.f32.gmra.mxu1 %v4990_v63  ;;  %v5520_v10 = vld [vmem:[#allocation2 + $0x143] sm:$0xff]  ;;  %v4995_v63 = vld [vmem:[#allocation2 + $0x17a] sm:$0xff] }
 0x328   : > { %v7667_v0 = vpop.f32.mrf.mxu0  ;;  %8088 = vmatmul.mubr.f32.gmra.mxu0 %v5516_v42  ;;  %7992 = vmatprep.mubr.f32.mxu1 %v4991_v18  ;;  %v5521_v42 = vld [vmem:[#allocation2 + $0x14b] sm:$0xff]  ;;  %v3295_v18 = vadd.f32 %v3245_v23, %v3156_v45  ;;  %v3298_v35 = vadd.f32 %v7569_v49, %v3248_v33  ;;  %v5523_v6 = vld [vmem:[#allocation2 + $0x15b] sm:$0xff] }
 0x329   : > { %v10857_v34 = vadd.f32 %v7667_v0, %v3292_v12  ;;  %8090 = vmatprep.mubr.f32.mxu0 %v5517_v31  ;;  %v3166_v27 = vpop.f32.mrf.mxu1  ;;  %v3247_v45 = vld [vmem:[%s11396_s6 + $0x150] sm:$0xff]  ;;  %v3250_v49 = vld [vmem:[%s11396_s6 + $0x168] sm:$0xff]  ;;  %v4999_v23 = vld [vmem:[#allocation2 + $0x19a] sm:$0xff] }
 0x32a   : > { %v3668_v21 = vpop.f32.mrf.mxu0 }
 0x32b   : > { %v10862_v53 = vadd.f32 %v3668_v21, %v3291_v14  ;;  %v7572_v19 = vpop.f32.mrf.mxu1  ;;  %7993 = vmatmul.mubr.f32.gmra.mxu1 %v4992_v60  ;;  %v4996_v14 = vld [vmem:[#allocation2 + $0x182] sm:$0xff] }
 0x32c   : > { %v7670_v11 = vpop.f32.mrf.mxu0  ;;  %8091 = vmatmul.mubr.f32.gmra.mxu0 %v5518_v29  ;;  %7995 = vmatprep.mubr.f32.mxu1 %v4993_v37  ;;  %v4997_v29 = vld [vmem:[#allocation2 + $0x18a] sm:$0xff] }
 0x32d   : > { %v10867_v52 = vadd.f32 %v7670_v11, %v3294_v22  ;;  %8093 = vmatprep.mubr.f32.mxu0 %v5519_v30  ;;  %v3176_v15 = vpop.f32.mrf.mxu1  ;;  %v5522_v22 = vld [vmem:[#allocation2 + $0x153] sm:$0xff]  ;;  %v3297_v11 = vadd.f32 %v3247_v45, %v3166_v27  ;;  %v3249_v27 = vld [vmem:[%s11396_s6 + $0x160] sm:$0xff] }
 0x32e   : > { %v3678_v44 = vpop.f32.mrf.mxu0  ;;  %v3299_v33 = vadd.f32 %v3249_v27, %v3176_v15 }
 0x32f   : > { %v10872_v43 = vadd.f32 %v3678_v44, %v3293_v20  ;;  %v7575_v13 = vpop.f32.mrf.mxu1  ;;  %7996 = vmatmul.mubr.f32.gmra.mxu1 %v4994_v58  ;;  %v4998_v44 = vld [vmem:[#allocation2 + $0x192] sm:$0xff]  ;;  %v3300_v58 = vadd.f32 %v7572_v19, %v3250_v49 }
 0x330   : > { %v7673_v12 = vpop.f32.mrf.mxu0  ;;  %8094 = vmatmul.mubr.f32.gmra.mxu0 %v5520_v10  ;;  %7998 = vmatprep.mubr.f32.mxu1 %v4995_v63  ;;  %v5524_v63 = vld [vmem:[#allocation2 + $0x163] sm:$0xff] }
 0x331   : > { %v10877_v8 = vadd.f32 %v7673_v12, %v3296_v47  ;;  %8096 = vmatprep.mubr.f32.mxu0 %v5521_v42  ;;  %v3186_v0 = vpop.f32.mrf.mxu1  ;;  %v5525_v42 = vld [vmem:[#allocation2 + $0x16b] sm:$0xff] }
 0x332   : > { %v3688_v31 = vpop.f32.mrf.mxu0 }
 0x333   : > { %v10882_v21 = vadd.f32 %v3688_v31, %v3295_v18  ;;  %v7578_v60 = vpop.f32.mrf.mxu1  ;;  %7999 = vmatmul.mubr.f32.gmra.mxu1 %v4996_v14  ;;  %v5000_v18 = vld [vmem:[#allocation2 + $0x1a2] sm:$0xff]  ;;  %v3252_v14 = vld [vmem:[%s11396_s6 + $0x178] sm:$0xff] }
 0x334   : > { %v7676_v37 = vpop.f32.mrf.mxu0  ;;  %8097 = vmatmul.mubr.f32.gmra.mxu0 %v5522_v22  ;;  %8001 = vmatprep.mubr.f32.mxu1 %v4997_v29  ;;  %v3302_v22 = vadd.f32 %v7575_v13, %v3252_v14  ;;  %v3254_v13 = vld [vmem:[%s11396_s6 + $0x188] sm:$0xff] }
 0x335   : > { %v10887_v30 = vadd.f32 %v7676_v37, %v3298_v35  ;;  %8099 = vmatprep.mubr.f32.mxu0 %v5523_v6  ;;  %v3196_v20 = vpop.f32.mrf.mxu1  ;;  %v5526_v37 = vld [vmem:[#allocation2 + $0x173] sm:$0xff] }
 0x336   : > { %v3698_v36 = vpop.f32.mrf.mxu0  ;;  %v3251_v6 = vld [vmem:[%s11396_s6 + $0x170] sm:$0xff] }
 0x337   : > { %v10892_v47 = vadd.f32 %v3698_v36, %v3297_v11  ;;  %v7720_v10 = vpop.f32.mrf.mxu1  ;;  %8002 = vmatmul.mubr.f32.gmra.mxu1 %v4998_v44  ;;  %v5527_v11 = vld [vmem:[#allocation2 + $0x17b] sm:$0xff]  ;;  %v3301_v49 = vadd.f32 %v3251_v6, %v3186_v0  ;;  %v5529_v0 = vld [vmem:[#allocation2 + $0x18b] sm:$0xff] }
 0x338   : > { %v7679_v12 = vpop.f32.mrf.mxu0  ;;  %8100 = vmatmul.mubr.f32.gmra.mxu0 %v5524_v63  ;;  %8004 = vmatprep.mubr.f32.mxu1 %v4999_v23  ;;  %v3304_v63 = vadd.f32 %v7578_v60, %v3254_v13  ;;  %v4270_v60 = vld [vmem:[%s11396_s6 + $0x8] sm:$0xff] }
 0x339   : > { %v10897_v31 = vadd.f32 %v7679_v12, %v3300_v58  ;;  %8102 = vmatprep.mubr.f32.mxu0 %v5525_v42  ;;  %v4020_v19 = vpop.f32.mrf.mxu1  ;;  %v5528_v12 = vld [vmem:[#allocation2 + $0x183] sm:$0xff] }
 0x33a   : > { %v3708_v35 = vpop.f32.mrf.mxu0  ;;  %v3253_v42 = vld [vmem:[%s11396_s6 + $0x180] sm:$0xff] }
 0x33b   : > { %v10902_v29 = vadd.f32 %v3708_v35, %v3299_v33  ;;  %v7723_v45 = vpop.f32.mrf.mxu1  ;;  %8005 = vmatmul.mubr.f32.gmra.mxu1 %v5000_v18  ;;  %v3303_v33 = vadd.f32 %v3253_v42, %v3196_v20  ;;  %v5531_v20 = vld [vmem:[#allocation2 + $0x19b] sm:$0xff]  ;;  %v5532_v42 = vld [vmem:[#allocation2 + $0x1a3] sm:$0xff] }
 0x33c   : > { %v7682_v15 = vpop.f32.mrf.mxu0  ;;  %8103 = vmatmul.mubr.f32.gmra.mxu0 %v5526_v37  ;;  %v4320_v37 = vadd.f32 %v7720_v10, %v4270_v60  ;;  %v4272_v10 = vld [vmem:[%s11396_s6 + $0x18] sm:$0xff] }
 0x33d   : > { %v10907_v36 = vadd.f32 %v7682_v15, %v3302_v22  ;;  %8105 = vmatprep.mubr.f32.mxu0 %v5527_v11  ;;  %v4030_v44 = vpop.f32.mrf.mxu1  ;;  %v5530_v11 = vld [vmem:[#allocation2 + $0x193] sm:$0xff] }
 0x33e   : > { %v3718_v58 = vpop.f32.mrf.mxu0 }
 0x33f   : > { %v10912_v23 = vadd.f32 %v3718_v58, %v3301_v49  ;;  %v7726_v27 = vpop.f32.mrf.mxu1  ;;  %v4269_v49 = vld [vmem:[%s11396_s6] sm:$0xff] }
 0x340   : > { %v7685_v18 = vpop.f32.mrf.mxu0  ;;  %8106 = vmatmul.mubr.f32.gmra.mxu0 %v5528_v12  ;;  %v4319_v58 = vadd.f32 %v4269_v49, %v4020_v19  ;;  %v4271_v19 = vld [vmem:[%s11396_s6 + $0x10] sm:$0xff] }
 0x341   : > { %v10917_v14 = vadd.f32 %v7685_v18, %v3304_v63  ;;  %8108 = vmatprep.mubr.f32.mxu0 %v5529_v0  ;;  %v4040_v35 = vpop.f32.mrf.mxu1  ;;  %v4321_v49 = vadd.f32 %v4271_v19, %v4030_v44 }
 0x342   : > { %v3728_v22 = vpop.f32.mrf.mxu0 }
 0x343   : > { %v10922_v6 = vadd.f32 %v3728_v22, %v3303_v33  ;;  %v7729_v15 = vpop.f32.mrf.mxu1  ;;  %v4322_v33 = vadd.f32 %v7723_v45, %v4272_v10 }
 0x344   : > { %v7827_v13 = vpop.f32.mrf.mxu0  ;;  %8109 = vmatmul.mubr.f32.gmra.mxu0 %v5530_v11 }
 0x345   : > { %v10927_v63 = vadd.f32 %v7827_v13, %v4320_v37  ;;  %8111 = vmatprep.mubr.f32.mxu0 %v5531_v20  ;;  %v4050_v12 = vpop.f32.mrf.mxu1 }
 0x346   : > { %v4325_v18 = vadd.f32 %v4050_v12, %v10712_v39  ;;  %v4552_v0 = vpop.f32.mrf.mxu0  ;;  %v4274_v39 = vld [vmem:[%s11396_s6 + $0x28] sm:$0xff] }
 0x347   : > { %v10933_v60 = vadd.f32 %v4552_v0, %v4319_v58  ;;  %v7732_v22 = vpop.f32.mrf.mxu1  ;;  %v4324_v12 = vadd.f32 %v7726_v27, %v4274_v39 }
 0x348   : > { %v4328_v37 = vadd.f32 %v7732_v22, %v10717_v25  ;;  %v7830_v11 = vpop.f32.mrf.mxu0  ;;  %8112 = vmatmul.mubr.f32.gmra.mxu0 %v5532_v42  ;;  %v4273_v25 = vld [vmem:[%s11396_s6 + $0x20] sm:$0xff] }
 0x349   : > { %v10939_v13 = vadd.f32 %v7830_v11, %v4322_v33  ;;  %v4060_v20 = vpop.f32.mrf.mxu1  ;;  %v4323_v33 = vadd.f32 %v4273_v25, %v4040_v35 }
 0x34a   : > { %v4327_v45 = vadd.f32 %v4060_v20, %v10722_v57  ;;  %v4562_v58 = vpop.f32.mrf.mxu0  ;;  %v4276_v57 = vld [vmem:[%s11396_s6 + $0x38] sm:$0xff] }
 0x34b   : > { %v10945_v10 = vadd.f32 %v4562_v58, %v4321_v49  ;;  %v7735_v0 = vpop.f32.mrf.mxu1  ;;  %v4326_v49 = vadd.f32 %v7729_v15, %v4276_v57 }
 0x34c   : > { %v4330_v44 = vadd.f32 %v7735_v0, %v10727_v28  ;;  %v7833_v42 = vpop.f32.mrf.mxu0 }
 0x34d   : > { %11421 = vst [vmem:[#allocation3_spill] sm:$0xff] %v10945_v10  ;;  %v10951_v22 = vadd.f32 %v7833_v42, %v4324_v12  ;;  %v4070_v19 = vpop.f32.mrf.mxu1 }
 0x34e   : > { %v4329_v27 = vadd.f32 %v4070_v19, %v10732_v40  ;;  %v4572_v11 = vpop.f32.mrf.mxu0 }
 0x34f   : > { %11422 = vst [vmem:[#allocation4_spill] sm:$0xff] %v10951_v22  ;;  %v10957_v20 = vadd.f32 %v4572_v11, %v4323_v33  ;;  %v7738_v39 = vpop.f32.mrf.mxu1 }
 0x350   : > { %v4332_v58 = vadd.f32 %v7738_v39, %v10737_v46  ;;  %v7836_v10 = vpop.f32.mrf.mxu0 }
 0x351   : > { %v10960_v28 = vadd.f32 %v7836_v10, %v4326_v49  ;;  %v4080_v35 = vpop.f32.mrf.mxu1 }
 0x352   : > { %v4331_v12 = vadd.f32 %v4080_v35, %v10742_v9  ;;  %v4582_v0 = vpop.f32.mrf.mxu0 }
 0x353   : > { %v10963_v25 = vadd.f32 %v4582_v0, %v4325_v18  ;;  %v7741_v42 = vpop.f32.mrf.mxu1 }
 0x354   : > { %v4334_v22 = vadd.f32 %v7741_v42, %v10747_v2  ;;  %v7839_v40 = vpop.f32.mrf.mxu0 }
 0x355   : > { %v10966_v19 = vadd.f32 %v7839_v40, %v4328_v37  ;;  %v4090_v15 = vpop.f32.mrf.mxu1 }
 0x356   : > { %v4333_v33 = vadd.f32 %v4090_v15, %v10752_v32  ;;  %v4592_v57 = vpop.f32.mrf.mxu0 }
 0x357   : > { %v10969_v46 = vadd.f32 %v4592_v57, %v4327_v45  ;;  %v7744_v10 = vpop.f32.mrf.mxu1 }
 0x358   : > { %v4336_v11 = vadd.f32 %v7744_v10, %v10757_v4  ;;  %v7842_v49 = vpop.f32.mrf.mxu0 }
 0x359   : > { %v10972_v9 = vadd.f32 %v7842_v49, %v4330_v44  ;;  %v4100_v18 = vpop.f32.mrf.mxu1 }
 0x35a   : > { %v4335_v39 = vadd.f32 %v4100_v18, %v10762_v5  ;;  %v4602_v35 = vpop.f32.mrf.mxu0 }
 0x35b   : > { %v10975_v2 = vadd.f32 %v4602_v35, %v4329_v27  ;;  %v7747_v37 = vpop.f32.mrf.mxu1 }
 0x35c   : > { %v4338_v0 = vadd.f32 %v7747_v37, %v10767_v1  ;;  %v7845_v42 = vpop.f32.mrf.mxu0 }
 0x35d   : > { %v10978_v32 = vadd.f32 %v7845_v42, %v4332_v58  ;;  %v4110_v45 = vpop.f32.mrf.mxu1 }
 0x35e   : > { %v4337_v40 = vadd.f32 %v4110_v45, %v10772_v17  ;;  %v4612_v15 = vpop.f32.mrf.mxu0 }
 0x35f   : > { %v10981_v4 = vadd.f32 %v4612_v15, %v4331_v12  ;;  %v7750_v44 = vpop.f32.mrf.mxu1 }
 0x360   : > { %v4340_v57 = vadd.f32 %v7750_v44, %v10777_v61  ;;  %v7848_v10 = vpop.f32.mrf.mxu0 }
 0x361   : > { %v10984_v5 = vadd.f32 %v7848_v10, %v4334_v22  ;;  %v4120_v27 = vpop.f32.mrf.mxu1 }
 0x362   : > { %v4339_v49 = vadd.f32 %v4120_v27, %v10782_v54  ;;  %v4622_v18 = vpop.f32.mrf.mxu0 }
 0x363   : > { %v10987_v1 = vadd.f32 %v4622_v18, %v4333_v33  ;;  %v7753_v58 = vpop.f32.mrf.mxu1 }
 0x364   : > { %v4342_v35 = vadd.f32 %v7753_v58, %v10787_v51  ;;  %v7851_v37 = vpop.f32.mrf.mxu0 }
 0x365   : > { %v10990_v17 = vadd.f32 %v7851_v37, %v4336_v11  ;;  %v4130_v12 = vpop.f32.mrf.mxu1 }
 0x366   : > { %v4341_v42 = vadd.f32 %v4130_v12, %v10792_v55  ;;  %v4632_v45 = vpop.f32.mrf.mxu0 }
 0x367   : > { %v10993_v61 = vadd.f32 %v4632_v45, %v4335_v39  ;;  %v7756_v22 = vpop.f32.mrf.mxu1 }
 0x368   : > { %v4344_v15 = vadd.f32 %v7756_v22, %v10797_v50  ;;  %v7854_v44 = vpop.f32.mrf.mxu0 }
 0x369   : > { %v10996_v54 = vadd.f32 %v7854_v44, %v4338_v0  ;;  %v4140_v33 = vpop.f32.mrf.mxu1 }
 0x36a   : > { %v4343_v10 = vadd.f32 %v4140_v33, %v10802_v41  ;;  %v4642_v27 = vpop.f32.mrf.mxu0 }
 0x36b   : > { %v10999_v51 = vadd.f32 %v4642_v27, %v4337_v40  ;;  %v7759_v11 = vpop.f32.mrf.mxu1 }
 0x36c   : > { %v4346_v18 = vadd.f32 %v7759_v11, %v10807_v62  ;;  %v7857_v58 = vpop.f32.mrf.mxu0 }
 0x36d   : > { %v11002_v55 = vadd.f32 %v7857_v58, %v4340_v57  ;;  %v4150_v39 = vpop.f32.mrf.mxu1 }
 0x36e   : > { %v4345_v37 = vadd.f32 %v4150_v39, %v10812_v3  ;;  %v4652_v12 = vpop.f32.mrf.mxu0 }
 0x36f   : > { %v11005_v50 = vadd.f32 %v4652_v12, %v4339_v49  ;;  %v7762_v0 = vpop.f32.mrf.mxu1 }
 0x370   : > { %v4348_v45 = vadd.f32 %v7762_v0, %v10817_v59  ;;  %v7860_v22 = vpop.f32.mrf.mxu0 }
 0x371   : > { %v11008_v41 = vadd.f32 %v7860_v22, %v4342_v35  ;;  %v4160_v40 = vpop.f32.mrf.mxu1 }
 0x372   : > { %v4347_v44 = vadd.f32 %v4160_v40, %v10822_v26  ;;  %v4662_v33 = vpop.f32.mrf.mxu0  ;;  %v11020_v26 = vpop.permute.xlu1 %6022 }
 0x373   : > { %v11011_v62 = vadd.f32 %v4662_v33, %v4341_v42  ;;  %v7765_v57 = vpop.f32.mrf.mxu1 }
 0x374   : > { %v4350_v27 = vadd.f32 %v7765_v57, %v10827_v48  ;;  %v7863_v11 = vpop.f32.mrf.mxu0 }
 0x375   : > { %v11014_v3 = vadd.f32 %v7863_v11, %v4344_v15  ;;  %v4170_v49 = vpop.f32.mrf.mxu1  ;;  %v11025_v15 = vpop.permute.xlu0 %6017 }
 0x376   : > { %v4349_v58 = vadd.f32 %v4170_v49, %v10832_v56  ;;  %v4672_v39 = vpop.f32.mrf.mxu0 }
 0x377   : > { %v11017_v59 = vadd.f32 %v4672_v39, %v4343_v10  ;;  %v7768_v35 = vpop.f32.mrf.mxu1 }
 0x378   : > { %v4352_v12 = vadd.f32 %v7768_v35, %v10837_v38  ;;  %v7866_v0 = vpop.f32.mrf.mxu0 }
 0x379   : > { %v11022_v42 = vadd.f32 %v7866_v0, %v4346_v18  ;;  %v4180_v22 = vpop.f32.mrf.mxu1  ;;  %v11033_v18 = vpop.permute.xlu1 %6032 }
 0x37a   : > { %v4351_v48 = vadd.f32 %v4180_v22, %v10842_v24  ;;  %v4682_v40 = vpop.f32.mrf.mxu0 }
 0x37b   : > { %v11027_v33 = vadd.f32 %v4682_v40, %v4345_v37  ;;  %v7771_v56 = vpop.f32.mrf.mxu1  ;;  %v11038_v37 = vpop.permute.xlu0 %6027 }
 0x37c   : > { %v4354_v10 = vadd.f32 %v7771_v56, %v10847_v7  ;;  %v7869_v57 = vpop.f32.mrf.mxu0 }
 0x37d   : > { %v11030_v11 = vadd.f32 %v7869_v57, %v4348_v45  ;;  %v4190_v38 = vpop.f32.mrf.mxu1 }
 0x37e   : > { %v4353_v49 = vadd.f32 %v4190_v38, %v10852_v16  ;;  %v4692_v39 = vpop.f32.mrf.mxu0 }
 0x37f   : > { %11423 = vst [vmem:[#allocation5_spill] sm:$0xff] %v11030_v11  ;;  %v11035_v35 = vadd.f32 %v4692_v39, %v4347_v44  ;;  %v7774_v24 = vpop.f32.mrf.mxu1  ;;  %v11046_v44 = vpop.permute.xlu1 %6042 }
 0x380   : > { %v4356_v0 = vadd.f32 %v7774_v24, %v10857_v34  ;;  %v7872_v22 = vpop.f32.mrf.mxu0 }
 0x381   : > { %11424 = vst [vmem:[#allocation6_spill] sm:$0xff] %v11035_v35  ;;  %v11040_v40 = vadd.f32 %v7872_v22, %v4350_v27  ;;  %v4200_v7 = vpop.f32.mrf.mxu1  ;;  %v11051_v27 = vpop.permute.xlu0 %6037 }
 0x382   : > { %v4355_v45 = vadd.f32 %v4200_v7, %v10862_v53  ;;  %v4702_v56 = vpop.f32.mrf.mxu0 }
 0x383   : > { %11425 = vst [vmem:[#allocation7_spill] sm:$0xff] %v11040_v40  ;;  %v11043_v57 = vadd.f32 %v4702_v56, %v4349_v58  ;;  %v7777_v16 = vpop.f32.mrf.mxu1 }
 0x384   : > { %v4358_v38 = vadd.f32 %v7777_v16, %v10867_v52  ;;  %v7875_v11 = vpop.f32.mrf.mxu0 }
 0x385   : > { %11426 = vst [vmem:[#allocation8_spill] sm:$0xff] %v11043_v57  ;;  %v11048_v39 = vadd.f32 %v7875_v11, %v4352_v12  ;;  %v4210_v34 = vpop.f32.mrf.mxu1  ;;  %v11059_v12 = vpop.permute.xlu1 %6052 }
 0x386   : > { %v4357_v24 = vadd.f32 %v4210_v34, %v10872_v43  ;;  %v4712_v35 = vpop.f32.mrf.mxu0 }
 0x387   : > { %11427 = vst [vmem:[#allocation9_spill] sm:$0xff] %v11048_v39  ;;  %v11053_v22 = vadd.f32 %v4712_v35, %v4351_v48  ;;  %v7780_v53 = vpop.f32.mrf.mxu1  ;;  %v11064_v48 = vpop.permute.xlu0 %6047 }
 0x388   : > { %v4360_v58 = vadd.f32 %v7780_v53, %v10877_v8  ;;  %v7878_v7 = vpop.f32.mrf.mxu0 }
 0x389   : > { %11428 = vst [vmem:[#allocation10_spill] sm:$0xff] %v11053_v22  ;;  %v11056_v56 = vadd.f32 %v7878_v7, %v4354_v10  ;;  %v4220_v52 = vpop.f32.mrf.mxu1 }
 0x38a   : > { %v4359_v16 = vadd.f32 %v4220_v52, %v10882_v21  ;;  %v4722_v57 = vpop.f32.mrf.mxu0 }
 0x38b   : > { %11429 = vst [vmem:[#allocation11_spill] sm:$0xff] %v11056_v56  ;;  %v11061_v11 = vadd.f32 %v4722_v57, %v4353_v49  ;;  %v7783_v43 = vpop.f32.mrf.mxu1  ;;  %v11072_v49 = vpop.permute.xlu1 %6062 }
 0x38c   : > { %v4362_v34 = vadd.f32 %v7783_v43, %v10887_v30  ;;  %v7881_v39 = vpop.f32.mrf.mxu0 }
 0x38d   : > { %11430 = vst [vmem:[#allocation12_spill] sm:$0xff] %v11061_v11  ;;  %v11066_v35 = vadd.f32 %v7881_v39, %v4356_v0  ;;  %v4230_v8 = vpop.f32.mrf.mxu1  ;;  %v11077_v0 = vpop.permute.xlu0 %6057 }
 0x38e   : > { %v4361_v10 = vadd.f32 %v4230_v8, %v10892_v47  ;;  %v4732_v53 = vpop.f32.mrf.mxu0 }
 0x38f   : > { %11431 = vst [vmem:[#allocation13_spill] sm:$0xff] %v11066_v35  ;;  %v11069_v7 = vadd.f32 %v4732_v53, %v4355_v45  ;;  %v7786_v21 = vpop.f32.mrf.mxu1 }
 0x390   : > { %v4364_v52 = vadd.f32 %v7786_v21, %v10897_v31  ;;  %v7884_v56 = vpop.f32.mrf.mxu0 }
 0x391   : > { %11432 = vst [vmem:[#allocation14_spill] sm:$0xff] %v11069_v7  ;;  %v11074_v57 = vadd.f32 %v7884_v56, %v4358_v38  ;;  %v4240_v30 = vpop.f32.mrf.mxu1  ;;  %v11085_v38 = vpop.permute.xlu1 %6072 }
 0x392   : > { %v4363_v43 = vadd.f32 %v4240_v30, %v10902_v29  ;;  %v4742_v11 = vpop.f32.mrf.mxu0 }
 0x393   : > { %11433 = vst [vmem:[#allocation15_spill] sm:$0xff] %v11074_v57  ;;  %v11079_v39 = vadd.f32 %v4742_v11, %v4357_v24  ;;  %v7789_v47 = vpop.f32.mrf.mxu1  ;;  %v11090_v24 = vpop.permute.xlu0 %6067 }
 0x394   : > { %v4366_v45 = vadd.f32 %v7789_v47, %v10907_v36  ;;  %v7887_v8 = vpop.f32.mrf.mxu0 }
 0x395   : > { %11434 = vst [vmem:[#allocation16_spill] sm:$0xff] %v11079_v39  ;;  %v11082_v53 = vadd.f32 %v7887_v8, %v4360_v58  ;;  %v4250_v31 = vpop.f32.mrf.mxu1 }
 0x396   : > { %v4365_v21 = vadd.f32 %v4250_v31, %v10912_v23  ;;  %v4752_v7 = vpop.f32.mrf.mxu0 }
 0x397   : > { %11435 = vst [vmem:[#allocation17_spill] sm:$0xff] %v11082_v53  ;;  %v11087_v56 = vadd.f32 %v4752_v7, %v4359_v16  ;;  %v7792_v29 = vpop.f32.mrf.mxu1  ;;  %v11097_v53 = vpop.permute.xlu1 %6082 }
 0x398   : > { %v4368_v30 = vadd.f32 %v7792_v29, %v10917_v14  ;;  %v7890_v57 = vpop.f32.mrf.mxu0  ;;  %v11101_v14 = vpop.permute.xlu0 %6077 }
 0x399   : > { %11436 = vst [vmem:[#allocation18_spill] sm:$0xff] %v11087_v56  ;;  %v11092_v11 = vadd.f32 %v7890_v57, %v4362_v34  ;;  %v4260_v36 = vpop.f32.mrf.mxu1 }
 0x39a   : > { %v4367_v58 = vadd.f32 %v4260_v36, %v10922_v6  ;;  %v4762_v47 = vpop.f32.mrf.mxu0 }
 0x39b   : > { %11437 = vst [vmem:[#allocation19_spill] sm:$0xff] %v11092_v11  ;;  %v11095_v8 = vadd.f32 %v4762_v47, %v4361_v10  ;;  %v7934_v23 = vpop.f32.mrf.mxu1  ;;  %v11107_v10 = vpop.permute.xlu1 %6092 }
 0x39c   : > { %v7893_v31 = vpop.f32.mrf.mxu0 }
 0x39d   : > { %11438 = vst [vmem:[#allocation20_spill] sm:$0xff] %v11095_v8  ;;  %v11099_v16 = vadd.f32 %v7893_v31, %v4364_v52  ;;  %v5084_v7 = vpop.f32.mrf.mxu1  ;;  %v11111_v52 = vpop.permute.xlu0 %6087 }
 0x39e   : > { %v4772_v56 = vpop.f32.mrf.mxu0 }
 0x39f   : > { %11439 = vst [vmem:[#allocation21_spill] sm:$0xff] %v11099_v16  ;;  %v11103_v29 = vadd.f32 %v4772_v56, %v4363_v43  ;;  %v7937_v34 = vpop.f32.mrf.mxu1  ;;  %v5384_v43 = vadd.f32 %v7934_v23, %v10927_v63 }
 0x3a0   : > { %v7896_v57 = vpop.f32.mrf.mxu0 }
 0x3a1   : > { %11440 = vst [vmem:[#allocation22_spill] sm:$0xff] %v11103_v29  ;;  %v11105_v11 = vadd.f32 %v7896_v57, %v4366_v45  ;;  %v5094_v6 = vpop.f32.mrf.mxu1  ;;  %v5383_v29 = vadd.f32 %v5084_v7, %v10933_v60  ;;  %v11121_v22 = vpop.permute.xlu0 %6097 }
 0x3a2   : > { %v4782_v36 = vpop.f32.mrf.mxu0 }
 0x3a3   : > { %11441 = vst [vmem:[#allocation23_spill] sm:$0xff] %v11105_v11  ;;  %v11109_v47 = vadd.f32 %v4782_v36, %v4365_v21  ;;  %v7940_v8 = vpop.f32.mrf.mxu1  ;;  %v11118_v11 = vpop.permute.xlu1 %6102 }
 0x3a4   : > { %v7899_v39 = vpop.f32.mrf.mxu0 }
 0x3a5   : > { %11442 = vst [vmem:[#allocation24_spill] sm:$0xff] %v11109_v47  ;;  %v11113_v31 = vadd.f32 %v7899_v39, %v4368_v30  ;;  %v5104_v16 = vpop.f32.mrf.mxu1  ;;  %v5386_v39 = vadd.f32 %v7937_v34, %v10939_v13 }
 0x3a6   : > { %v4792_v35 = vpop.f32.mrf.mxu0 }
 0x3a7   : > { %11443 = vst [vmem:[#allocation25_spill] sm:$0xff] %v11113_v31  ;;  %v11116_v56 = vadd.f32 %v4792_v35, %v4367_v58  ;;  %v7943_v45 = vpop.f32.mrf.mxu1  ;;  %v11445_v35 = vld [vmem:[#allocation3_spill] sm:$0xff] }
 0x3a8   : > { %v8041_v57 = vpop.f32.mrf.mxu0  ;;  %v5385_v58 = vadd.f32 %v5094_v6, %v11445_v35 }
 0x3a9   : > { %11444 = vst [vmem:[#allocation26_spill] sm:$0xff] %v11116_v56  ;;  %v5916_v21 = vadd.f32 %v8041_v57, %v5384_v43  ;;  %v5114_v36 = vpop.f32.mrf.mxu1  ;;  %v11130_v57 = vpop.permute.xlu1 %6112  ;;  %v11446_v56 = vld [vmem:[#allocation4_spill] sm:$0xff] }
 0x3aa   : > { %v5616_v47 = vpop.f32.mrf.mxu0  ;;  %v5388_v13 = vadd.f32 %v7940_v8, %v11446_v56  ;;  %v5389_v35 = vadd.f32 %v5114_v36, %v10963_v25 }
 0x3ab   : > { %v6266_v30 = vmul.f32 %v11020_v26, %v5916_v21  ;;  %v5915_v31 = vadd.f32 %v5616_v47, %v5383_v29  ;;  %v7946_v40 = vpop.f32.mrf.mxu1  ;;  %v11137_v47 = vpop.permute.xlu0 %6107 }
 0x3ac   : > { %v8044_v63 = vpop.f32.mrf.mxu0 }
 0x3ad   : > { %6316 = vst [vmem:[%s11396_s6 + $0x8] sm:$0xff] %v6266_v30  ;;  %v6265_v60 = vmul.f32 %v11025_v15, %v5915_v31  ;;  %v5918_v23 = vadd.f32 %v8044_v63, %v5386_v39  ;;  %v5124_v7 = vpop.f32.mrf.mxu1  ;;  %v5387_v15 = vadd.f32 %v5104_v16, %v10957_v20  ;;  %v5390_v39 = vadd.f32 %v7943_v45, %v10960_v28  ;;  %v11149_v16 = vpop.permute.xlu1 %6122 }
 0x3ae   : > { %v5626_v43 = vpop.f32.mrf.mxu0 }
 0x3af   : > { %6315 = vst [vmem:[%s11396_s6] sm:$0xff] %v6265_v60  ;;  %v6268_v26 = vmul.f32 %v11033_v18, %v5918_v23  ;;  %v5917_v29 = vadd.f32 %v5626_v43, %v5385_v58  ;;  %v7949_v34 = vpop.f32.mrf.mxu1  ;;  %v11156_v60 = vpop.permute.xlu0 %6117 }
 0x3b0   : > { %v8047_v6 = vpop.f32.mrf.mxu0 }
 0x3b1   : > { %6318 = vst [vmem:[%s11396_s6 + $0x18] sm:$0xff] %v6268_v26  ;;  %v6267_v31 = vmul.f32 %v11038_v37, %v5917_v29  ;;  %v5920_v8 = vadd.f32 %v8047_v6, %v5388_v13  ;;  %v5134_v56 = vpop.f32.mrf.mxu1  ;;  %v5391_v13 = vadd.f32 %v5124_v7, %v10969_v46  ;;  %v5394_v6 = vadd.f32 %v7949_v34, %v10972_v9 }
 0x3b2   : > { %v5636_v21 = vpop.f32.mrf.mxu0 }
 0x3b3   : > { %6317 = vst [vmem:[%s11396_s6 + $0x10] sm:$0xff] %v6267_v31  ;;  %v6270_v18 = vmul.f32 %v11046_v44, %v5920_v8  ;;  %v5919_v30 = vadd.f32 %v5636_v21, %v5387_v15  ;;  %v7952_v63 = vpop.f32.mrf.mxu1  ;;  %v5392_v44 = vadd.f32 %v7946_v40, %v10966_v19  ;;  %v11168_v40 = vpop.permute.xlu1 %6132 }
 0x3b4   : > { %v8050_v20 = vpop.f32.mrf.mxu0  ;;  %v11175_v31 = vpop.permute.xlu0 %6127 }
 0x3b5   : > { %6320 = vst [vmem:[%s11396_s6 + $0x28] sm:$0xff] %v6270_v18  ;;  %v6269_v37 = vmul.f32 %v11051_v27, %v5919_v30  ;;  %v5922_v28 = vadd.f32 %v8050_v20, %v5390_v39  ;;  %v5144_v45 = vpop.f32.mrf.mxu1  ;;  %v5396_v39 = vadd.f32 %v7952_v63, %v10978_v32 }
 0x3b6   : > { %v5646_v58 = vpop.f32.mrf.mxu0  ;;  %v5395_v20 = vadd.f32 %v5144_v45, %v10981_v4 }
 0x3b7   : > { %6319 = vst [vmem:[%s11396_s6 + $0x20] sm:$0xff] %v6269_v37  ;;  %v6272_v23 = vmul.f32 %v11059_v12, %v5922_v28  ;;  %v5921_v25 = vadd.f32 %v5646_v58, %v5389_v35  ;;  %v7955_v36 = vpop.f32.mrf.mxu1 }
 0x3b8   : > { %v8053_v43 = vpop.f32.mrf.mxu0  ;;  %v11194_v37 = vpop.permute.xlu0 %6137 }
 0x3b9   : > { %6322 = vst [vmem:[%s11396_s6 + $0x38] sm:$0xff] %v6272_v23  ;;  %v6271_v27 = vmul.f32 %v11064_v48, %v5921_v25  ;;  %v5924_v26 = vadd.f32 %v8053_v43, %v5392_v44  ;;  %v5154_v29 = vpop.f32.mrf.mxu1  ;;  %v5393_v48 = vadd.f32 %v5134_v56, %v10975_v2  ;;  %v11187_v56 = vpop.permute.xlu1 %6142 }
 0x3ba   : > { %v5656_v19 = vpop.f32.mrf.mxu0  ;;  %v5397_v44 = vadd.f32 %v5154_v29, %v10987_v1 }
 0x3bb   : > { %6321 = vst [vmem:[%s11396_s6 + $0x30] sm:$0xff] %v6271_v27  ;;  %v6274_v12 = vmul.f32 %v11072_v49, %v5924_v26  ;;  %v5923_v46 = vadd.f32 %v5656_v19, %v5391_v13  ;;  %v7958_v7 = vpop.f32.mrf.mxu1 }
 0x3bc   : > { %v8056_v15 = vpop.f32.mrf.mxu0  ;;  %v5400_v43 = vadd.f32 %v7958_v7, %v10990_v17  ;;  %v11213_v26 = vpop.permute.xlu0 %6147 }
 0x3bd   : > { %6324 = vst [vmem:[%s11396_s6 + $0x48] sm:$0xff] %v6274_v12  ;;  %v6273_v8 = vmul.f32 %v11077_v0, %v5923_v46  ;;  %v5926_v9 = vadd.f32 %v8056_v15, %v5394_v6  ;;  %v5164_v34 = vpop.f32.mrf.mxu1 }
 0x3be   : > { %v5666_v21 = vpop.f32.mrf.mxu0 }
 0x3bf   : > { %6323 = vst [vmem:[%s11396_s6 + $0x40] sm:$0xff] %v6273_v8  ;;  %v6276_v49 = vmul.f32 %v11085_v38, %v5926_v9  ;;  %v5925_v18 = vadd.f32 %v5666_v21, %v5393_v48  ;;  %v7961_v30 = vpop.f32.mrf.mxu1  ;;  %v5398_v38 = vadd.f32 %v7955_v36, %v10984_v5  ;;  %v11206_v36 = vpop.permute.xlu1 %6152 }
 0x3c0   : > { %v8059_v2 = vpop.f32.mrf.mxu0  ;;  %v5402_v12 = vadd.f32 %v7961_v30, %v10996_v54 }
 0x3c1   : > { %6326 = vst [vmem:[%s11396_s6 + $0x58] sm:$0xff] %v6276_v49  ;;  %v6275_v0 = vmul.f32 %v11090_v24, %v5925_v18  ;;  %v5928_v32 = vadd.f32 %v8059_v2, %v5396_v39  ;;  %v5174_v63 = vpop.f32.mrf.mxu1 }
 0x3c2   : > { %v5676_v35 = vpop.f32.mrf.mxu0  ;;  %v5401_v48 = vadd.f32 %v5174_v63, %v10999_v51 }
 0x3c3   : > { %6325 = vst [vmem:[%s11396_s6 + $0x50] sm:$0xff] %v6275_v0  ;;  %v6278_v28 = vmul.f32 %v11097_v53, %v5928_v32  ;;  %v5927_v4 = vadd.f32 %v5676_v35, %v5395_v20  ;;  %v7964_v45 = vpop.f32.mrf.mxu1  ;;  %v11225_v15 = vpop.permute.xlu1 %6162 }
 0x3c4   : > { %v8062_v58 = vpop.f32.mrf.mxu0 }
 0x3c5   : > { %6328 = vst [vmem:[%s11396_s6 + $0x68] sm:$0xff] %v6278_v28  ;;  %v6277_v24 = vmul.f32 %v11101_v14, %v5927_v4  ;;  %v5930_v23 = vadd.f32 %v8062_v58, %v5398_v38  ;;  %v5184_v25 = vpop.f32.mrf.mxu1  ;;  %v5399_v14 = vadd.f32 %v5164_v34, %v10993_v61  ;;  %v11232_v34 = vpop.permute.xlu0 %6157 }
 0x3c6   : > { %v5686_v5 = vpop.f32.mrf.mxu0  ;;  %v5403_v18 = vadd.f32 %v5184_v25, %v11005_v50 }
 0x3c7   : > { %6327 = vst [vmem:[%s11396_s6 + $0x60] sm:$0xff] %v6277_v24  ;;  %v6280_v53 = vmul.f32 %v11107_v10, %v5930_v23  ;;  %v5929_v1 = vadd.f32 %v5686_v5, %v5397_v44  ;;  %v7967_v13 = vpop.f32.mrf.mxu1  ;;  %v11244_v20 = vpop.permute.xlu1 %6172 }
 0x3c8   : > { %v8065_v27 = vpop.f32.mrf.mxu0  ;;  %v5406_v0 = vadd.f32 %v7967_v13, %v11008_v41 }
 0x3c9   : > { %6330 = vst [vmem:[%s11396_s6 + $0x78] sm:$0xff] %v6280_v53  ;;  %v6279_v29 = vmul.f32 %v11111_v52, %v5929_v1  ;;  %v5932_v17 = vadd.f32 %v8065_v27, %v5400_v43  ;;  %v5194_v19 = vpop.f32.mrf.mxu1  ;;  %v11251_v35 = vpop.permute.xlu0 %6167 }
 0x3ca   : > { %v5696_v6 = vpop.f32.mrf.mxu0 }
 0x3cb   : > { %6329 = vst [vmem:[%s11396_s6 + $0x70] sm:$0xff] %v6279_v29  ;;  %v6282_v10 = vmul.f32 %v11118_v11, %v5932_v17  ;;  %v5931_v46 = vadd.f32 %v5696_v6, %v5399_v14  ;;  %v7970_v7 = vpop.f32.mrf.mxu1  ;;  %v5404_v11 = vadd.f32 %v7964_v45, %v11002_v55  ;;  %v11263_v24 = vpop.permute.xlu1 %6182 }
 0x3cc   : > { %v8068_v61 = vpop.f32.mrf.mxu0  ;;  %v5408_v45 = vadd.f32 %v7970_v7, %v11014_v3  ;;  %v11448_v7 = vld [vmem:[#allocation6_spill] sm:$0xff] }
 0x3cd   : > { %6332 = vst [vmem:[%s11396_s6 + $0x88] sm:$0xff] %v6282_v10  ;;  %v6281_v52 = vmul.f32 %v11121_v22, %v5931_v46  ;;  %v5934_v54 = vadd.f32 %v8068_v61, %v5402_v12  ;;  %v5204_v8 = vpop.f32.mrf.mxu1  ;;  %v11270_v43 = vpop.permute.xlu0 %6177 }
 0x3ce   : > { %v5706_v9 = vpop.f32.mrf.mxu0  ;;  %v5407_v23 = vadd.f32 %v5204_v8, %v11017_v59  ;;  %v11449_v8 = vld [vmem:[#allocation7_spill] sm:$0xff] }
 0x3cf   : > { %6331 = vst [vmem:[%s11396_s6 + $0x80] sm:$0xff] %v6281_v52  ;;  %v6284_v21 = vmul.f32 %v11130_v57, %v5934_v54  ;;  %v5933_v51 = vadd.f32 %v5706_v9, %v5401_v48  ;;  %v7973_v39 = vpop.f32.mrf.mxu1  ;;  %v6193_v17 = vpop.permute.xlu1 %6192 }
 0x3d0   : > { %v8071_v49 = vpop.f32.mrf.mxu0 }
 0x3d1   : > { %6334 = vst [vmem:[%s11396_s6 + $0x98] sm:$0xff] %v6284_v21  ;;  %v6283_v22 = vmul.f32 %v11137_v47, %v5933_v51  ;;  %v5936_v30 = vadd.f32 %v8071_v49, %v5404_v11  ;;  %v5214_v2 = vpop.f32.mrf.mxu1  ;;  %v5405_v47 = vadd.f32 %v5194_v19, %v11011_v62  ;;  %v11447_v19 = vld [vmem:[#allocation5_spill] sm:$0xff]  ;;  %v6188_v46 = vpop.permute.xlu0 %6187  ;;  %v11450_v49 = vld [vmem:[#allocation8_spill] sm:$0xff] }
 0x3d2   : > { %v5716_v55 = vpop.f32.mrf.mxu0  ;;  %v5409_v27 = vadd.f32 %v5214_v2, %v11027_v33 }
 0x3d3   : > { %6333 = vst [vmem:[%s11396_s6 + $0x90] sm:$0xff] %v6283_v22  ;;  %v6286_v57 = vmul.f32 %v11149_v16, %v5936_v30  ;;  %v5935_v50 = vadd.f32 %v5716_v55, %v5403_v18  ;;  %v7976_v32 = vpop.f32.mrf.mxu1 }
 0x3d4   : > { %v8074_v63 = vpop.f32.mrf.mxu0  ;;  %v5412_v6 = vadd.f32 %v7976_v32, %v11447_v19 }
 0x3d5   : > { %6336 = vst [vmem:[%s11396_s6 + $0xa8] sm:$0xff] %v6286_v57  ;;  %v6285_v38 = vmul.f32 %v11156_v60, %v5935_v50  ;;  %v5938_v41 = vadd.f32 %v8074_v63, %v5406_v0  ;;  %v5224_v28 = vpop.f32.mrf.mxu1  ;;  %v6198_v55 = vpop.permute.xlu0 %6197  ;;  %v11451_v0 = vld [vmem:[#allocation9_spill] sm:$0xff] }
 0x3d6   : > { %v5726_v4 = vpop.f32.mrf.mxu0  ;;  %v5411_v61 = vadd.f32 %v5224_v28, %v11448_v7 }
 0x3d7   : > { %6335 = vst [vmem:[%s11396_s6 + $0xa0] sm:$0xff] %v6285_v38  ;;  %v6288_v16 = vmul.f32 %v11168_v40, %v5938_v41  ;;  %v5937_v58 = vadd.f32 %v5726_v4, %v5405_v47  ;;  %v7979_v44 = vpop.f32.mrf.mxu1  ;;  %v5410_v40 = vadd.f32 %v7973_v39, %v11022_v42  ;;  %v6203_v39 = vpop.permute.xlu1 %6202  ;;  %v11452_v47 = vld [vmem:[#allocation10_spill] sm:$0xff] }
 0x3d8   : > { %v8077_v62 = vpop.f32.mrf.mxu0  ;;  %v5414_v9 = vadd.f32 %v7979_v44, %v11449_v8 }
 0x3d9   : > { %6338 = vst [vmem:[%s11396_s6 + $0xb8] sm:$0xff] %v6288_v16  ;;  %v6287_v60 = vmul.f32 %v11175_v31, %v5937_v58  ;;  %v5940_v3 = vadd.f32 %v8077_v62, %v5408_v45  ;;  %v5234_v25 = vpop.f32.mrf.mxu1  ;;  %v11453_v16 = vld [vmem:[#allocation11_spill] sm:$0xff] }
 0x3da   : > { %v5736_v5 = vpop.f32.mrf.mxu0  ;;  %v5413_v18 = vadd.f32 %v5234_v25, %v11450_v49 }
 0x3db   : > { %6337 = vst [vmem:[%s11396_s6 + $0xb0] sm:$0xff] %v6287_v60  ;;  %v6290_v53 = vmul.f32 %v11187_v56, %v5940_v3  ;;  %v5939_v59 = vadd.f32 %v5736_v5, %v5407_v23  ;;  %v7982_v1 = vpop.f32.mrf.mxu1  ;;  %v6213_v45 = vpop.permute.xlu1 %6212  ;;  %v11454_v3 = vld [vmem:[#allocation12_spill] sm:$0xff] }
 0x3dc   : > { %v8080_v13 = vpop.f32.mrf.mxu0  ;;  %v5416_v57 = vadd.f32 %v7982_v1, %v11451_v0  ;;  %v6208_v60 = vpop.permute.xlu0 %6207 }
 0x3dd   : > { %6340 = vst [vmem:[%s11396_s6 + $0xc8] sm:$0xff] %v6290_v53  ;;  %v6289_v31 = vmul.f32 %v11194_v37, %v5939_v59  ;;  %v5942_v14 = vadd.f32 %v8080_v13, %v5410_v40  ;;  %v5244_v29 = vpop.f32.mrf.mxu1  ;;  %v11455_v59 = vld [vmem:[#allocation13_spill] sm:$0xff] }
 0x3de   : > { %v5746_v42 = vpop.f32.mrf.mxu0  ;;  %v5415_v38 = vadd.f32 %v5244_v29, %v11452_v47  ;;  %v11456_v29 = vld [vmem:[#allocation14_spill] sm:$0xff] }
 0x3df   : > { %6339 = vst [vmem:[%s11396_s6 + $0xc0] sm:$0xff] %v6289_v31  ;;  %v6292_v56 = vmul.f32 %v11206_v36, %v5942_v14  ;;  %v5941_v12 = vadd.f32 %v5746_v42, %v5409_v27  ;;  %v7985_v33 = vpop.f32.mrf.mxu1  ;;  %v6223_v14 = vpop.permute.xlu1 %6222 }
 0x3e0   : > { %v8083_v10 = vpop.f32.mrf.mxu0  ;;  %v5418_v58 = vadd.f32 %v7985_v33, %v11453_v16  ;;  %v11457_v33 = vld [vmem:[#allocation15_spill] sm:$0xff] }
 0x3e1   : > { %6342 = vst [vmem:[%s11396_s6 + $0xd8] sm:$0xff] %v6292_v56  ;;  %v6291_v37 = vmul.f32 %v11213_v26, %v5941_v12  ;;  %v5944_v48 = vadd.f32 %v8083_v10, %v5412_v6  ;;  %v5254_v52 = vpop.f32.mrf.mxu1  ;;  %v6218_v12 = vpop.permute.xlu0 %6217 }
 0x3e2   : > { %v5756_v54 = vpop.f32.mrf.mxu0  ;;  %v5417_v25 = vadd.f32 %v5254_v52, %v11454_v3 }
 0x3e3   : > { %6341 = vst [vmem:[%s11396_s6 + $0xd0] sm:$0xff] %v6291_v37  ;;  %v6294_v36 = vmul.f32 %v11225_v15, %v5944_v48  ;;  %v5943_v11 = vadd.f32 %v5756_v54, %v5411_v61  ;;  %v7988_v21 = vpop.f32.mrf.mxu1  ;;  %v11458_v48 = vld [vmem:[#allocation16_spill] sm:$0xff] }
 0x3e4   : > { %v8086_v51 = vpop.f32.mrf.mxu0  ;;  %v5420_v1 = vadd.f32 %v7988_v21, %v11455_v59 }
 0x3e5   : > { %6344 = vst [vmem:[%s11396_s6 + $0xe8] sm:$0xff] %v6294_v36  ;;  %v6293_v26 = vmul.f32 %v11232_v34, %v5943_v11  ;;  %v5946_v22 = vadd.f32 %v8086_v51, %v5414_v9  ;;  %v5264_v30 = vpop.f32.mrf.mxu1  ;;  %v6233_v36 = vpop.permute.xlu1 %6232  ;;  %v11459_v11 = vld [vmem:[#allocation17_spill] sm:$0xff] }
 0x3e6   : > { %v5766_v2 = vpop.f32.mrf.mxu0  ;;  %v5419_v42 = vadd.f32 %v5264_v30, %v11456_v29 }
 0x3e7   : > { %6343 = vst [vmem:[%s11396_s6 + $0xe0] sm:$0xff] %v6293_v26  ;;  %v6296_v15 = vmul.f32 %v11244_v20, %v5946_v22  ;;  %v5945_v50 = vadd.f32 %v5766_v2, %v5413_v18  ;;  %v7991_v32 = vpop.f32.mrf.mxu1  ;;  %v6228_v18 = vpop.permute.xlu0 %6227  ;;  %v11460_v26 = vld [vmem:[#allocation18_spill] sm:$0xff] }
 0x3e8   : > { %v8089_v63 = vpop.f32.mrf.mxu0  ;;  %v5422_v10 = vadd.f32 %v7991_v32, %v11457_v33 }
 0x3e9   : > { %6346 = vst [vmem:[%s11396_s6 + $0xf8] sm:$0xff] %v6296_v15  ;;  %v6295_v34 = vmul.f32 %v11251_v35, %v5945_v50  ;;  %v5948_v41 = vadd.f32 %v8089_v63, %v5416_v57  ;;  %v5274_v28 = vpop.f32.mrf.mxu1  ;;  %v11461_v57 = vld [vmem:[#allocation19_spill] sm:$0xff]  ;;  %v6243_v47 = vpop.permute.xlu1 %6242 }
 0x3ea   : > { %v5776_v4 = vpop.f32.mrf.mxu0  ;;  %v5421_v52 = vadd.f32 %v5274_v28, %v11458_v48 }
 0x3eb   : > { %6345 = vst [vmem:[%s11396_s6 + $0xf0] sm:$0xff] %v6295_v34  ;;  %v6298_v20 = vmul.f32 %v11263_v24, %v5948_v41  ;;  %v5947_v44 = vadd.f32 %v5776_v4, %v5415_v38  ;;  %v7994_v62 = vpop.f32.mrf.mxu1  ;;  %v11462_v38 = vld [vmem:[#allocation20_spill] sm:$0xff]  ;;  %v6238_v16 = vpop.permute.xlu0 %6237 }
 0x3ec   : > { %v8092_v23 = vpop.f32.mrf.mxu0  ;;  %v5424_v21 = vadd.f32 %v7994_v62, %v11459_v11 }
 0x3ed   : > { %6348 = vst [vmem:[%s11396_s6 + $0x108] sm:$0xff] %v6298_v20  ;;  %v6297_v35 = vmul.f32 %v11270_v43, %v5947_v44  ;;  %v5950_v5 = vadd.f32 %v8092_v23, %v5418_v58  ;;  %v5284_v40 = vpop.f32.mrf.mxu1  ;;  %v11463_v58 = vld [vmem:[#allocation21_spill] sm:$0xff] }
 0x3ee   : > { %v5786_v53 = vpop.f32.mrf.mxu0  ;;  %v5423_v22 = vadd.f32 %v5284_v40, %v11460_v26 }
 0x3ef   : > { %6347 = vst [vmem:[%s11396_s6 + $0x100] sm:$0xff] %v6297_v35  ;;  %v6300_v24 = vmul.f32 %v6193_v17, %v5950_v5  ;;  %v5949_v13 = vadd.f32 %v5786_v53, %v5417_v25  ;;  %v7997_v27 = vpop.f32.mrf.mxu1  ;;  %v11465_v53 = vld [vmem:[#allocation23_spill] sm:$0xff] }
 0x3f0   : > { %v8095_v31 = vpop.f32.mrf.mxu0  ;;  %v5426_v15 = vadd.f32 %v7997_v27, %v11461_v57 }
 0x3f1   : > { %6350 = vst [vmem:[%s11396_s6 + $0x118] sm:$0xff] %v6300_v24  ;;  %v6299_v43 = vmul.f32 %v6188_v46, %v5949_v13  ;;  %v5952_v19 = vadd.f32 %v8095_v31, %v5420_v1  ;;  %v5294_v6 = vpop.f32.mrf.mxu1  ;;  %v6253_v13 = vpop.permute.xlu1 %6252 }
 0x3f2   : > { %v5796_v56 = vpop.f32.mrf.mxu0  ;;  %v5425_v34 = vadd.f32 %v5294_v6, %v11462_v38  ;;  %v6248_v31 = vpop.permute.xlu0 %6247 }
 0x3f3   : > { %6349 = vst [vmem:[%s11396_s6 + $0x110] sm:$0xff] %v6299_v43  ;;  %v6302_v17 = vmul.f32 %v6203_v39, %v5952_v19  ;;  %v5951_v7 = vadd.f32 %v5796_v56, %v5419_v42  ;;  %v8000_v61 = vpop.f32.mrf.mxu1  ;;  %v11467_v56 = vld [vmem:[#allocation25_spill] sm:$0xff] }
 0x3f4   : > { %v8098_v37 = vpop.f32.mrf.mxu0  ;;  %v5428_v20 = vadd.f32 %v8000_v61, %v11463_v58 }
 0x3f5   : > { %6352 = vst [vmem:[%s11396_s6 + $0x128] sm:$0xff] %v6302_v17  ;;  %v6301_v46 = vmul.f32 %v6198_v55, %v5951_v7  ;;  %v5954_v54 = vadd.f32 %v8098_v37, %v5422_v10  ;;  %v5304_v8 = vpop.f32.mrf.mxu1  ;;  %v11468_v7 = vld [vmem:[#allocation26_spill] sm:$0xff] }
 0x3f6   : > { %v5806_v9 = vpop.f32.mrf.mxu0 }
 0x3f7   : > { %6351 = vst [vmem:[%s11396_s6 + $0x120] sm:$0xff] %v6301_v46  ;;  %v6304_v51 = vmul.f32 %v6213_v45, %v5954_v54  ;;  %v5953_v39 = vadd.f32 %v5806_v9, %v5421_v52  ;;  %v8003_v55 = vpop.f32.mrf.mxu1  ;;  %v6263_v52 = vpop.permute.xlu1 %6262 }
 0x3f8   : > { %v8101_v49 = vpop.f32.mrf.mxu0  ;;  %v5430_v59 = vadd.f32 %v8003_v55, %v11465_v53  ;;  %v6258_v9 = vpop.permute.xlu0 %6257 }
 0x3f9   : > { %6354 = vst [vmem:[%s11396_s6 + $0x138] sm:$0xff] %v6304_v51  ;;  %v6303_v30 = vmul.f32 %v6208_v60, %v5953_v39  ;;  %v5956_v2 = vadd.f32 %v8101_v49, %v5424_v21  ;;  %v5314_v4 = vpop.f32.mrf.mxu1  ;;  %v11464_v60 = vld [vmem:[#allocation22_spill] sm:$0xff] }
 0x3fa   : > { %v5816_v0 = vpop.f32.mrf.mxu0  ;;  %v5427_v3 = vadd.f32 %v5304_v8, %v11464_v60 }
 0x3fb   : > { %6353 = vst [vmem:[%s11396_s6 + $0x130] sm:$0xff] %v6303_v30  ;;  %v6306_v50 = vmul.f32 %v6223_v14, %v5956_v2  ;;  %v5955_v32 = vadd.f32 %v5816_v0, %v5423_v22  ;;  %v8006_v5 = vpop.f32.mrf.mxu1  ;;  %v11466_v14 = vld [vmem:[#allocation24_spill] sm:$0xff] }
 0x3fc   : > { %v8104_v63 = vpop.f32.mrf.mxu0  ;;  %v5429_v29 = vadd.f32 %v5314_v4, %v11466_v14 }
 0x3fd   : > { %6356 = vst [vmem:[%s11396_s6 + $0x148] sm:$0xff] %v6306_v50  ;;  %v6305_v41 = vmul.f32 %v6218_v12, %v5955_v32  ;;  %v5958_v28 = vadd.f32 %v8104_v63, %v5426_v15  ;;  %v5324_v19 = vpop.f32.mrf.mxu1  ;;  %v5432_v12 = vadd.f32 %v8006_v5, %v11467_v56 }
 0x3fe   : > { %v5826_v45 = vpop.f32.mrf.mxu0  ;;  %v5431_v61 = vadd.f32 %v5324_v19, %v11468_v7 }
 0x3ff   : > { %6355 = vst [vmem:[%s11396_s6 + $0x140] sm:$0xff] %v6305_v41  ;;  %v6308_v44 = vmul.f32 %v6233_v36, %v5958_v28  ;;  %v5957_v62 = vadd.f32 %v5826_v45, %v5425_v34 }
 0x400   : > { %v8107_v23 = vpop.f32.mrf.mxu0 }
 0x401   : > { %6358 = vst [vmem:[%s11396_s6 + $0x158] sm:$0xff] %v6308_v44  ;;  %v6307_v25 = vmul.f32 %v6228_v18, %v5957_v62  ;;  %v5960_v35 = vadd.f32 %v8107_v23, %v5428_v20 }
 0x402   : > { %v5836_v40 = vpop.f32.mrf.mxu0 }
 0x403   : > { %6357 = vst [vmem:[%s11396_s6 + $0x150] sm:$0xff] %v6307_v25  ;;  %v6310_v1 = vmul.f32 %v6243_v47, %v5960_v35  ;;  %v5959_v24 = vadd.f32 %v5836_v40, %v5427_v3 }
 0x404   : > { %v8110_v27 = vpop.f32.mrf.mxu0 }
 0x405   : > { %6360 = vst [vmem:[%s11396_s6 + $0x168] sm:$0xff] %v6310_v1  ;;  %v6309_v42 = vmul.f32 %v6238_v16, %v5959_v24  ;;  %v5962_v43 = vadd.f32 %v8110_v27, %v5430_v59 }
 0x406   : > { %v5846_v6 = vpop.f32.mrf.mxu0 }
 0x407   : > { %6359 = vst [vmem:[%s11396_s6 + $0x160] sm:$0xff] %v6309_v42  ;;  %v6312_v33 = vmul.f32 %v6253_v13, %v5962_v43  ;;  %v5961_v10 = vadd.f32 %v5846_v6, %v5429_v29 }
 0x408   : > { %v8113_v17 = vpop.f32.mrf.mxu0 }
 0x409   : > { %6362 = vst [vmem:[%s11396_s6 + $0x178] sm:$0xff] %v6312_v33  ;;  %v6311_v37 = vmul.f32 %v6248_v31, %v5961_v10  ;;  %v5964_v48 = vadd.f32 %v8113_v17, %v5432_v12 }
 0x40a   : > { %v5856_v46 = vpop.f32.mrf.mxu0 }
 0x40b   : > { %6361 = vst [vmem:[%s11396_s6 + $0x170] sm:$0xff] %v6311_v37  ;;  %v6314_v54 = vmul.f32 %v6263_v52, %v5964_v48  ;;  %v5963_v8 = vadd.f32 %v5856_v46, %v5431_v61 }
 0x40d   : > { %6364 = vst [vmem:[%s11396_s6 + $0x188] sm:$0xff] %v6314_v54  ;;  %v6313_v36 = vmul.f32 %v6258_v9, %v5963_v8 }
 0x40f   : > { %6363 = vst [vmem:[%s11396_s6 + $0x180] sm:$0xff] %v6313_v36 }
 0x410 PF: > { %s16_s21 = sadd.s32 1, %s8187_s21  }
 0x411   : > { %p13_p5 = scmp.ge.s32.totalorder %s16_s21, 4  }
 0x413   :  { %15 = sbr.rel (!%p13_p5) target bundleno = 1 (0x1), region = 91 }

</bundles_post_ra>
